<compile_context>
chip_gen: v7x
topology: tpu7x:2x2x1
jax: 0.10.0
libtpu: 0.0.40
codegen_flags: <defaults>
</compile_context>

<pallas_src>
import functools

import jax
import jax.numpy as jnp
from jax import lax
from jax.experimental import pallas as pl
from jax.experimental.pallas import tpu as pltpu


# ----------------------------- Pallas kernel -------------------------------- #
def _repvgg_fused_conv3x3_kernel(x_ref, w_ref, b_ref, o_ref, *, w_row: int):
    """One (Cout-slab, image, row-tile) step of the fused RepVGG 3x3 conv.

    x_ref: (1, S_blk, Cin)  row-flattened input window (TH output rows + halo)
    w_ref: (3, 3, Cin, TC)  fused HWIO weight slab
    b_ref: (1, TC)          fused bias (f32)
    o_ref: (1, L, TC)       row-flattened output tile, L = TH * w_row
    """
    L = o_ref.shape[1]
    Lk = L + 2 * w_row  # rows needed after the kw pre-shift below

    # Pre-shift the window by 1 and 2 rows once so every one of the nine tap
    # windows starts on an 8-sublane boundary (w_row % 8 == 0): two relayout
    # copies instead of six per step.
    x_kw1 = x_ref[0, 1:1 + Lk, :]
    x_kw2 = x_ref[0, 2:2 + Lk, :]

    acc = None
    for kw in range(3):
        for kh in range(3):
            base = kh * w_row
            if kw == 0:
                patch = x_ref[0, base:base + L, :]
            elif kw == 1:
                patch = x_kw1[base:base + L]
            else:
                patch = x_kw2[base:base + L]
            part = jnp.dot(patch, w_ref[kh, kw],
                           preferred_element_type=jnp.float32)
            # Chained value-level accumulation (no scratch RMW): lets Mosaic
            # keep partials in MXU result storage / VMEM temporaries.
            acc = part if acc is None else acc + part

    out = jnp.maximum(acc + b_ref[...], 0.0)       # fused bias + ReLU in f32
    o_ref[0] = out.astype(o_ref.dtype)             # lane/sublane-dense store


# --------------------------------- wrapper ----------------------------------- #
def _round_up(x, m):
    return (x + m - 1) // m * m


def _pick_cout_tile(cout_p, cin_p, itemsize):
    """Largest lane-dense Cout slab whose 3x3 weight slab stays modest in VMEM."""
    for tc in (512, 384, 256, 128):
        if cout_p % tc == 0 and 9 * cin_p * tc * itemsize <= 8 * 1024 * 1024:
            return tc
    return 128


def _vmem_limit_bytes():
    try:
        cap = int(pltpu.get_tpu_info().vmem_capacity_bytes)
    except Exception:
        cap = 64 * 1024 * 1024  # conservative (v7x per-core physical VMEM)
    return min(cap * 3 // 4, 112 * 1024 * 1024)


def repvgg_block_forward(x_nchw, w_fused_oihw, b_fused, *,
                         compute_dtype=jnp.bfloat16, row_tile=32,
                         input_mode="window"):
    """Fused RepVGG block forward (stride=1, groups=1).

    x_nchw: (N, Cin, H, W); w_fused_oihw: (Cout, Cin, 3, 3); b_fused: (Cout,).
    input_mode: "window" = overlapping element-indexed windows straight from
    the padded activation (no extra HBM copy); "copy" = blocked-indexing
    fallback that materializes the overlapping windows in HBM.
    """
    N, Cin, H, W = x_nchw.shape
    Cout, Cin_w, kh_, kw_ = w_fused_oihw.shape
    assert (kh_, kw_) == (3, 3) and Cin_w == Cin
    # TODO(synk): stride=2 and groups>1 RepVGG variants are not implemented.

    LANE = 128
    Cin_p = _round_up(Cin, LANE)
    Cout_p = _round_up(Cout, LANE)
    cbytes = jnp.dtype(compute_dtype).itemsize
    TC = _pick_cout_tile(Cout_p, Cin_p, cbytes)

    # Balanced row tiles: R = ceil(H / row_tile) tiles of TH rows, output padded
    # to R*TH rows (pad sliced off below).  No exact-divisor requirement.
    # TODO(synk): for N=1 inference on v7x prefer an even grid-step count so
    # both TensorCores stay busy.
    R = pl.cdiv(H, row_tile)
    TH = pl.cdiv(H, R)
    H_t = R * TH

    # Row-flattened geometry: pad the conv-padded width (W+2) up to a multiple
    # of 8 so each spatial row starts on a sublane boundary, then flatten
    # (rows, W_row) row-major.  A 3x3 / pad-1 conv on this layout is nine
    # offset matmuls; output columns >= W of each row (and rows >= H) contain
    # garbage contributions and MUST be sliced off after the kernel (they are).
    W_row = _round_up(W + 2, 8)
    L = TH * W_row                     # flat output rows per tile
    S_blk = L + 2 * W_row + 8          # flat input rows per tile (halo + shift)

    # ---- layout prep (one fused XLA pass: transpose + pad + reshape) --------
    # TODO(synk): NHWC-native pipelines and a Cin=3 im2col first-layer special
    # case would skip the transpose and most of the channel zero-padding.
    x_nhwc = jnp.transpose(x_nchw, (0, 2, 3, 1)).astype(compute_dtype)
    x_pad = jnp.pad(x_nhwc, ((0, 0),
                             (1, H_t - H + 2),
                             (1, W_row - W - 1),
                             (0, Cin_p - Cin)))
    x_flat = x_pad.reshape(N, (H_t + 3) * W_row, Cin_p)

    w_hwio = jnp.transpose(w_fused_oihw, (2, 3, 1, 0))            # (3,3,Cin,Cout)
    w_hwio = jnp.pad(w_hwio, ((0, 0), (0, 0),
                              (0, Cin_p - Cin), (0, Cout_p - Cout)))
    w_hwio = w_hwio.astype(compute_dtype)
    b2d = jnp.pad(b_fused, (0, Cout_p - Cout)).reshape(1, Cout_p).astype(jnp.float32)

    # ---- input windowing -----------------------------------------------------
    if input_mode == "window":
        # Overlapping (TH+2)-row windows DMA'd directly out of the flat padded
        # activation via element-offset indexing: no halo-duplicating HBM copy.
        x_arg = x_flat
        x_spec = pl.BlockSpec(
            (pl.Element(1), pl.Element(S_blk), pl.Element(Cin_p)),
            lambda c, n, r: (n, r * L, 0))
    elif input_mode == "copy":
        # Portability fallback: materialize overlapping windows in HBM
        # (duplicates the 2-row halo) and use plain blocked indexing.
        x_tiles = jnp.stack([x_flat[:, r * L:r * L + S_blk, :] for r in range(R)],
                            axis=1).reshape(N * R, S_blk, Cin_p)
        x_arg = x_tiles
        x_spec = pl.BlockSpec((1, S_blk, Cin_p),
                              lambda c, n, r, R=R: (n * R + r, 0, 0))
    else:
        raise ValueError(f"unknown input_mode: {input_mode}")

    # Weight slab on the SLOWEST grid axis: fetched from HBM once per slab and
    # resident across the whole (image, row-tile) sweep.  Large (invariant)
    # slabs are single-buffered to halve their VMEM footprint.
    w_spec_kwargs = {}
    if 9 * Cin_p * TC * cbytes >= 4 * 1024 * 1024:
        w_spec_kwargs["pipeline_mode"] = pl.Buffered(1)
    w_spec = pl.BlockSpec((3, 3, Cin_p, TC), lambda c, n, r: (0, 0, 0, c),
                          **w_spec_kwargs)

    grid = (Cout_p // TC, N, R)
    kernel = functools.partial(_repvgg_fused_conv3x3_kernel, w_row=W_row)

    out_flat = pl.pallas_call(
        kernel,
        out_shape=jax.ShapeDtypeStruct((N, H_t * W_row, Cout_p), x_nchw.dtype),
        grid=grid,
        in_specs=[x_spec, w_spec,
                  pl.BlockSpec((1, TC), lambda c, n, r: (0, c))],
        out_specs=pl.BlockSpec((1, L, TC), lambda c, n, r: (n, r, c)),
        compiler_params=pltpu.CompilerParams(
            dimension_semantics=("parallel", "parallel", "parallel"),
            vmem_limit_bytes=_vmem_limit_bytes(),
        ),
    )(x_arg, w_hwio, b2d)

    # Drop pad rows/cols + Cout padding and return to NCHW in one XLA pass.
    # TODO(synk): NHWC consumers could take out_flat (sliced) directly in bf16.
    out = out_flat.reshape(N, H_t, W_row, Cout_p)[:, :H, :W, :Cout]
    return jnp.transpose(out, (0, 3, 1, 2))


# ------------------------ parameter setup / BN fusion ------------------------ #
def fuse_conv_bn(w, gamma, beta, mean, var, eps=1e-5):
    """Fold eval-mode BatchNorm into a conv weight (OIHW) + bias."""
    std = jnp.sqrt(var + eps)
    t = (gamma / std).reshape(-1, 1, 1, 1)
    return w * t, beta - mean * gamma / std


def make_repvgg_params(key, in_channels, out_channels):
    """Deterministic synthetic params for the three branches, fused into one 3x3 conv."""
    assert in_channels == out_channels, "identity branch requires Cin == Cout, stride == 1"
    ks = jax.random.split(key, 12)
    C_in, C_out = in_channels, out_channels

    # rbr_dense: conv3x3 (no bias) + BN
    w3 = jax.random.normal(ks[0], (C_out, C_in, 3, 3), jnp.float32) * 0.1
    g3 = 1.0 + 0.1 * jax.random.normal(ks[1], (C_out,), jnp.float32)
    b3 = 0.1 * jax.random.normal(ks[2], (C_out,), jnp.float32)
    m3 = 0.1 * jax.random.normal(ks[3], (C_out,), jnp.float32)
    v3 = jnp.abs(jax.random.normal(ks[4], (C_out,), jnp.float32)) + 0.5

    # rbr_1x1: conv1x1 (no bias) + BN
    w1 = jax.random.normal(ks[5], (C_out, C_in, 1, 1), jnp.float32) * 0.1
    g1 = 1.0 + 0.1 * jax.random.normal(ks[6], (C_out,), jnp.float32)
    b1 = 0.1 * jax.random.normal(ks[7], (C_out,), jnp.float32)
    m1 = 0.1 * jax.random.normal(ks[8], (C_out,), jnp.float32)
    v1 = jnp.abs(jax.random.normal(ks[9], (C_out,), jnp.float32)) + 0.5

    # rbr_identity: BN on the input (valid because C_in == C_out, stride == 1)
    gi = 1.0 + 0.1 * jax.random.normal(ks[10], (C_in,), jnp.float32)
    bi = 0.1 * jax.random.normal(ks[11], (C_in,), jnp.float32)
    mi = 0.05 * jnp.ones((C_in,), jnp.float32)
    vi = jnp.ones((C_in,), jnp.float32) * 0.8

    branches = dict(w3=w3, g3=g3, b3=b3, m3=m3, v3=v3,
                    w1=w1, g1=g1, b1=b1, m1=m1, v1=v1,
                    gi=gi, bi=bi, mi=mi, vi=vi)

    # --- fuse (mirrors get_equivalent_kernel_bias) ---
    k3, bias3 = fuse_conv_bn(w3, g3, b3, m3, v3)
    k1, bias1 = fuse_conv_bn(w1, g1, b1, m1, v1)
    k1_pad = jnp.pad(k1, ((0, 0), (0, 0), (1, 1), (1, 1)))
    wid = jnp.zeros((C_in, C_in, 3, 3), jnp.float32)
    wid = wid.at[jnp.arange(C_in), jnp.arange(C_in), 1, 1].set(1.0)
    kid, biasid = fuse_conv_bn(wid, gi, bi, mi, vi)

    w_fused = k3 + k1_pad + kid
    b_fused = bias3 + bias1 + biasid
    return branches, w_fused, b_fused


# ------------------------------- reference ----------------------------------- #
def reference_forward(x, p, eps=1e-5):
    """Unfused reference: conv3x3+BN, conv1x1+BN, identity BN, sum, ReLU (NCHW)."""
    def conv(x, w, pad):
        return lax.conv_general_dilated(
            x, w, window_strides=(1, 1), padding=[(pad, pad), (pad, pad)],
            dimension_numbers=("NCHW", "OIHW", "NCHW"),
            precision=lax.Precision.HIGHEST)

    def bn(y, g, b, m, v):
        g, b, m, v = [a.reshape(1, -1, 1, 1) for a in (g, b, m, v)]
        return (y - m) / jnp.sqrt(v + eps) * g + b

    dense = bn(conv(x, p["w3"], 1), p["g3"], p["b3"], p["m3"], p["v3"])
    one = bn(conv(x, p["w1"], 0), p["g1"], p["b1"], p["m1"], p["v1"])
    ident = bn(x, p["gi"], p["bi"], p["mi"], p["vi"])
    return jnp.maximum(dense + one + ident, 0.0)


if __name__ == "__main__":
    key = jax.random.PRNGKey(0)
    k_x, k_p = jax.random.split(key)

    # in_channels == out_channels, stride=1 -> identity branch active
    N, C, H, W = 2, 4, 16, 16
    x = jax.random.normal(k_x, (N, C, H, W), jnp.float32)

    branches, w_fused, b_fused = make_repvgg_params(k_p, C, C)
    ref = reference_forward(x, branches)

    def run(mode):
        # f32 MXU path (row_tile=8 so that R=2 row tiles are exercised).
        out32 = jax.block_until_ready(
            repvgg_block_forward(x, w_fused, b_fused,
                                 compute_dtype=jnp.float32, row_tile=8,
                                 input_mode=mode))
        assert out32.shape == (N, C, H, W)
        assert jnp.allclose(out32, ref, rtol=1e-2, atol=1e-2), (
            mode, float(jnp.max(jnp.abs(out32 - ref))))
        # bf16 MXU inputs with f32 accumulation: looser tolerance.
        outbf = jax.block_until_ready(
            repvgg_block_forward(x, w_fused, b_fused,
                                 compute_dtype=jnp.bfloat16, row_tile=8,
                                 input_mode=mode))
        assert outbf.shape == (N, C, H, W)
        assert jnp.allclose(outbf, ref, rtol=5e-2, atol=1e-1), (
            mode, float(jnp.max(jnp.abs(outbf - ref))))

    try:
        run("window")   # element-indexed overlapping-window fast path
    except Exception:
        run("copy")     # blocked-indexing fallback (halo materialized in HBM)

    print("KERNEL_OK")
</pallas_src>

<mosaic_0001>
module attributes {stable_mosaic.version = 11 : i64} {
  func.func @_repvgg_fused_conv3x3_kernel(%arg0: i32, %arg1: i32, %arg2: i32, %arg3: memref<1x248x128xf32, #tpu.memory_space<vmem>>, %arg4: memref<3x3x128x128xf32, #tpu.memory_space<vmem>>, %arg5: memref<1x128xf32, #tpu.memory_space<vmem>>, %arg6: memref<1x192x128xf32, #tpu.memory_space<vmem>>) attributes {dimension_semantics = [#tpu.dimension_semantics<parallel>, #tpu.dimension_semantics<parallel>, #tpu.dimension_semantics<parallel>], iteration_bounds = array<i64: 1, 2, 2>, scalar_prefetch = 0 : i64, scratch_operands = 0 : i64, tpu.core_type = #tpu.core_type<tc>, window_params = [{transform_indices = @transform_0, window_bounds = array<i64: 1, 248, 128>, window_kind = #tpu.element_window<[0, 0, 0], [0, 0, 0]>}, {transform_indices = @transform_1, window_bounds = array<i64: 3, 3, 128, 128>}, {transform_indices = @transform_2, window_bounds = array<i64: 1, 128>}, {transform_indices = @transform_3, window_bounds = array<i64: 1, 192, 128>}]} {
    %c0 = arith.constant 0 : index
    %c1 = arith.constant 1 : index
    %c0_0 = arith.constant 0 : index
    %0 = vector.load %arg3[%c0, %c1, %c0_0] : memref<1x248x128xf32, #tpu.memory_space<vmem>>, vector<1x240x128xf32>
    %1 = vector.shape_cast %0 : vector<1x240x128xf32> to vector<240x128xf32>
    %c0_1 = arith.constant 0 : index
    %c2 = arith.constant 2 : index
    %c0_2 = arith.constant 0 : index
    %2 = vector.load %arg3[%c0_1, %c2, %c0_2] : memref<1x248x128xf32, #tpu.memory_space<vmem>>, vector<1x240x128xf32>
    %3 = vector.shape_cast %2 : vector<1x240x128xf32> to vector<240x128xf32>
    %c0_3 = arith.constant 0 : index
    %c0_4 = arith.constant 0 : index
    %c0_5 = arith.constant 0 : index
    %4 = vector.load %arg3[%c0_3, %c0_4, %c0_5] : memref<1x248x128xf32, #tpu.memory_space<vmem>>, vector<1x192x128xf32>
    %5 = vector.shape_cast %4 : vector<1x192x128xf32> to vector<192x128xf32>
    %c0_6 = arith.constant 0 : index
    %c0_7 = arith.constant 0 : index
    %c0_8 = arith.constant 0 : index
    %c0_9 = arith.constant 0 : index
    %6 = vector.load %arg4[%c0_6, %c0_7, %c0_8, %c0_9] : memref<3x3x128x128xf32, #tpu.memory_space<vmem>>, vector<1x1x128x128xf32>
    %7 = vector.shape_cast %6 : vector<1x1x128x128xf32> to vector<128x128xf32>
    %cst = arith.constant dense<0.000000e+00> : vector<192x128xf32>
    %8 = tpu.matmul %5, %7, %cst {dimension_numbers = #tpu.dot_dimension_numbers<[1], [0], [0], [1], [0, 0, 1, 1], [], []>} : vector<192x128xf32>, vector<128x128xf32>, vector<192x128xf32> -> vector<192x128xf32>
    %c0_10 = arith.constant 0 : index
    %c24 = arith.constant 24 : index
    %c0_11 = arith.constant 0 : index
    %9 = vector.load %arg3[%c0_10, %c24, %c0_11] : memref<1x248x128xf32, #tpu.memory_space<vmem>>, vector<1x192x128xf32>
    %10 = vector.shape_cast %9 : vector<1x192x128xf32> to vector<192x128xf32>
    %c1_12 = arith.constant 1 : index
    %c0_13 = arith.constant 0 : index
    %c0_14 = arith.constant 0 : index
    %c0_15 = arith.constant 0 : index
    %11 = vector.load %arg4[%c1_12, %c0_13, %c0_14, %c0_15] : memref<3x3x128x128xf32, #tpu.memory_space<vmem>>, vector<1x1x128x128xf32>
    %12 = vector.shape_cast %11 : vector<1x1x128x128xf32> to vector<128x128xf32>
    %cst_16 = arith.constant dense<0.000000e+00> : vector<192x128xf32>
    %13 = tpu.matmul %10, %12, %cst_16 {dimension_numbers = #tpu.dot_dimension_numbers<[1], [0], [0], [1], [0, 0, 1, 1], [], []>} : vector<192x128xf32>, vector<128x128xf32>, vector<192x128xf32> -> vector<192x128xf32>
    %14 = arith.addf %8, %13 : vector<192x128xf32>
    %c0_17 = arith.constant 0 : index
    %c48 = arith.constant 48 : index
    %c0_18 = arith.constant 0 : index
    %15 = vector.load %arg3[%c0_17, %c48, %c0_18] : memref<1x248x128xf32, #tpu.memory_space<vmem>>, vector<1x192x128xf32>
    %16 = vector.shape_cast %15 : vector<1x192x128xf32> to vector<192x128xf32>
    %c2_19 = arith.constant 2 : index
    %c0_20 = arith.constant 0 : index
    %c0_21 = arith.constant 0 : index
    %c0_22 = arith.constant 0 : index
    %17 = vector.load %arg4[%c2_19, %c0_20, %c0_21, %c0_22] : memref<3x3x128x128xf32, #tpu.memory_space<vmem>>, vector<1x1x128x128xf32>
    %18 = vector.shape_cast %17 : vector<1x1x128x128xf32> to vector<128x128xf32>
    %cst_23 = arith.constant dense<0.000000e+00> : vector<192x128xf32>
    %19 = tpu.matmul %16, %18, %cst_23 {dimension_numbers = #tpu.dot_dimension_numbers<[1], [0], [0], [1], [0, 0, 1, 1], [], []>} : vector<192x128xf32>, vector<128x128xf32>, vector<192x128xf32> -> vector<192x128xf32>
    %20 = arith.addf %14, %19 : vector<192x128xf32>
    %21 = vector.extract_strided_slice %1 {offsets = [0, 0], sizes = [192, 128], strides = [1, 1]} : vector<240x128xf32> to vector<192x128xf32>
    %c0_24 = arith.constant 0 : index
    %c1_25 = arith.constant 1 : index
    %c0_26 = arith.constant 0 : index
    %c0_27 = arith.constant 0 : index
    %22 = vector.load %arg4[%c0_24, %c1_25, %c0_26, %c0_27] : memref<3x3x128x128xf32, #tpu.memory_space<vmem>>, vector<1x1x128x128xf32>
    %23 = vector.shape_cast %22 : vector<1x1x128x128xf32> to vector<128x128xf32>
    %cst_28 = arith.constant dense<0.000000e+00> : vector<192x128xf32>
    %24 = tpu.matmul %21, %23, %cst_28 {dimension_numbers = #tpu.dot_dimension_numbers<[1], [0], [0], [1], [0, 0, 1, 1], [], []>} : vector<192x128xf32>, vector<128x128xf32>, vector<192x128xf32> -> vector<192x128xf32>
    %25 = arith.addf %20, %24 : vector<192x128xf32>
    %26 = vector.extract_strided_slice %1 {offsets = [24, 0], sizes = [192, 128], strides = [1, 1]} : vector<240x128xf32> to vector<192x128xf32>
    %c1_29 = arith.constant 1 : index
    %c1_30 = arith.constant 1 : index
    %c0_31 = arith.constant 0 : index
    %c0_32 = arith.constant 0 : index
    %27 = vector.load %arg4[%c1_29, %c1_30, %c0_31, %c0_32] : memref<3x3x128x128xf32, #tpu.memory_space<vmem>>, vector<1x1x128x128xf32>
    %28 = vector.shape_cast %27 : vector<1x1x128x128xf32> to vector<128x128xf32>
    %cst_33 = arith.constant dense<0.000000e+00> : vector<192x128xf32>
    %29 = tpu.matmul %26, %28, %cst_33 {dimension_numbers = #tpu.dot_dimension_numbers<[1], [0], [0], [1], [0, 0, 1, 1], [], []>} : vector<192x128xf32>, vector<128x128xf32>, vector<192x128xf32> -> vector<192x128xf32>
    %30 = arith.addf %25, %29 : vector<192x128xf32>
    %31 = vector.extract_strided_slice %1 {offsets = [48, 0], sizes = [192, 128], strides = [1, 1]} : vector<240x128xf32> to vector<192x128xf32>
    %c2_34 = arith.constant 2 : index
    %c1_35 = arith.constant 1 : index
    %c0_36 = arith.constant 0 : index
    %c0_37 = arith.constant 0 : index
    %32 = vector.load %arg4[%c2_34, %c1_35, %c0_36, %c0_37] : memref<3x3x128x128xf32, #tpu.memory_space<vmem>>, vector<1x1x128x128xf32>
    %33 = vector.shape_cast %32 : vector<1x1x128x128xf32> to vector<128x128xf32>
    %cst_38 = arith.constant dense<0.000000e+00> : vector<192x128xf32>
    %34 = tpu.matmul %31, %33, %cst_38 {dimension_numbers = #tpu.dot_dimension_numbers<[1], [0], [0], [1], [0, 0, 1, 1], [], []>} : vector<192x128xf32>, vector<128x128xf32>, vector<192x128xf32> -> vector<192x128xf32>
    %35 = arith.addf %30, %34 : vector<192x128xf32>
    %36 = vector.extract_strided_slice %3 {offsets = [0, 0], sizes = [192, 128], strides = [1, 1]} : vector<240x128xf32> to vector<192x128xf32>
    %c0_39 = arith.constant 0 : index
    %c2_40 = arith.constant 2 : index
    %c0_41 = arith.constant 0 : index
    %c0_42 = arith.constant 0 : index
    %37 = vector.load %arg4[%c0_39, %c2_40, %c0_41, %c0_42] : memref<3x3x128x128xf32, #tpu.memory_space<vmem>>, vector<1x1x128x128xf32>
    %38 = vector.shape_cast %37 : vector<1x1x128x128xf32> to vector<128x128xf32>
    %cst_43 = arith.constant dense<0.000000e+00> : vector<192x128xf32>
    %39 = tpu.matmul %36, %38, %cst_43 {dimension_numbers = #tpu.dot_dimension_numbers<[1], [0], [0], [1], [0, 0, 1, 1], [], []>} : vector<192x128xf32>, vector<128x128xf32>, vector<192x128xf32> -> vector<192x128xf32>
    %40 = arith.addf %35, %39 : vector<192x128xf32>
    %41 = vector.extract_strided_slice %3 {offsets = [24, 0], sizes = [192, 128], strides = [1, 1]} : vector<240x128xf32> to vector<192x128xf32>
    %c1_44 = arith.constant 1 : index
    %c2_45 = arith.constant 2 : index
    %c0_46 = arith.constant 0 : index
    %c0_47 = arith.constant 0 : index
    %42 = vector.load %arg4[%c1_44, %c2_45, %c0_46, %c0_47] : memref<3x3x128x128xf32, #tpu.memory_space<vmem>>, vector<1x1x128x128xf32>
    %43 = vector.shape_cast %42 : vector<1x1x128x128xf32> to vector<128x128xf32>
    %cst_48 = arith.constant dense<0.000000e+00> : vector<192x128xf32>
    %44 = tpu.matmul %41, %43, %cst_48 {dimension_numbers = #tpu.dot_dimension_numbers<[1], [0], [0], [1], [0, 0, 1, 1], [], []>} : vector<192x128xf32>, vector<128x128xf32>, vector<192x128xf32> -> vector<192x128xf32>
    %45 = arith.addf %40, %44 : vector<192x128xf32>
    %46 = vector.extract_strided_slice %3 {offsets = [48, 0], sizes = [192, 128], strides = [1, 1]} : vector<240x128xf32> to vector<192x128xf32>
    %c2_49 = arith.constant 2 : index
    %c2_50 = arith.constant 2 : index
    %c0_51 = arith.constant 0 : index
    %c0_52 = arith.constant 0 : index
    %47 = vector.load %arg4[%c2_49, %c2_50, %c0_51, %c0_52] : memref<3x3x128x128xf32, #tpu.memory_space<vmem>>, vector<1x1x128x128xf32>
    %48 = vector.shape_cast %47 : vector<1x1x128x128xf32> to vector<128x128xf32>
    %cst_53 = arith.constant dense<0.000000e+00> : vector<192x128xf32>
    %49 = tpu.matmul %46, %48, %cst_53 {dimension_numbers = #tpu.dot_dimension_numbers<[1], [0], [0], [1], [0, 0, 1, 1], [], []>} : vector<192x128xf32>, vector<128x128xf32>, vector<192x128xf32> -> vector<192x128xf32>
    %50 = arith.addf %45, %49 : vector<192x128xf32>
    %c0_54 = arith.constant 0 : index
    %c0_55 = arith.constant 0 : index
    %51 = vector.load %arg5[%c0_54, %c0_55] : memref<1x128xf32, #tpu.memory_space<vmem>>, vector<1x128xf32>
    %52 = vector.broadcast %51 : vector<1x128xf32> to vector<192x128xf32>
    %53 = arith.addf %50, %52 : vector<192x128xf32>
    %cst_56 = arith.constant 0.000000e+00 : f32
    %54 = vector.broadcast %cst_56 : f32 to vector<192x128xf32>
    %55 = arith.maximumf %53, %54 : vector<192x128xf32>
    %c0_57 = arith.constant 0 : index
    %c0_58 = arith.constant 0 : index
    %c0_59 = arith.constant 0 : index
    %56 = vector.load %arg6[%c0_57, %c0_58, %c0_59] : memref<1x192x128xf32, #tpu.memory_space<vmem>>, vector<1x192x128xf32>
    %57 = vector.shape_cast %56 : vector<1x192x128xf32> to vector<192x128xf32>
    %58 = vector.shape_cast %55 : vector<192x128xf32> to vector<1x192x128xf32>
    tpu.vector_store %arg6[%c0_57, %c0_58, %c0_59], %58 {strides = array<i32>} : memref<1x192x128xf32, #tpu.memory_space<vmem>>, vector<1x192x128xf32>,
    return
  }
  func.func @transform_0(%arg0: i32, %arg1: i32, %arg2: i32) -> (i32, i32, i32) {
    %c192_i32 = arith.constant 192 : i32
    %0 = arith.muli %arg2, %c192_i32 : i32
    %c0_i32 = arith.constant 0 : i32
    %c0_i32_0 = arith.constant 0 : i32
    return %arg1, %0, %c0_i32 : i32, i32, i32
  }
  func.func @transform_1(%arg0: i32, %arg1: i32, %arg2: i32) -> (i32, i32, i32, i32) {
    %c0_i32 = arith.constant 0 : i32
    %c0_i32_0 = arith.constant 0 : i32
    %c0_i32_1 = arith.constant 0 : i32
    %c0_i32_2 = arith.constant 0 : i32
    return %c0_i32, %c0_i32_0, %c0_i32_1, %arg0 : i32, i32, i32, i32
  }
  func.func @transform_2(%arg0: i32, %arg1: i32, %arg2: i32) -> (i32, i32) {
    %c0_i32 = arith.constant 0 : i32
    %c0_i32_0 = arith.constant 0 : i32
    return %c0_i32, %arg0 : i32, i32
  }
  func.func @transform_3(%arg0: i32, %arg1: i32, %arg2: i32) -> (i32, i32, i32) {
    %c0_i32 = arith.constant 0 : i32
    return %arg1, %arg2, %arg0 : i32, i32, i32
  }
}

module attributes {stable_mosaic.version = 11 : i64} {
  func.func @_repvgg_fused_conv3x3_kernel(%arg0: i32, %arg1: i32, %arg2: i32, %arg3: memref<1x248x128xf32, #tpu.memory_space<vmem>>, %arg4: memref<3x3x128x128xf32, #tpu.memory_space<vmem>>, %arg5: memref<1x128xf32, #tpu.memory_space<vmem>>, %arg6: memref<1x192x128xf32, #tpu.memory_space<vmem>>) attributes {dimension_semantics = [#tpu.dimension_semantics<parallel>, #tpu.dimension_semantics<parallel>, #tpu.dimension_semantics<parallel>], iteration_bounds = array<i64: 1, 2, 2>, scalar_prefetch = 0 : i64, scratch_operands = 0 : i64, tpu.core_type = #tpu.core_type<tc>, window_params = [{transform_indices = @transform_0, window_bounds = array<i64: 1, 248, 128>}, {transform_indices = @transform_1, window_bounds = array<i64: 3, 3, 128, 128>}, {transform_indices = @transform_2, window_bounds = array<i64: 1, 128>}, {transform_indices = @transform_3, window_bounds = array<i64: 1, 192, 128>}]} {
    %c0 = arith.constant 0 : index
    %c1 = arith.constant 1 : index
    %c0_0 = arith.constant 0 : index
    %0 = vector.load %arg3[%c0, %c1, %c0_0] : memref<1x248x128xf32, #tpu.memory_space<vmem>>, vector<1x240x128xf32>
    %1 = vector.shape_cast %0 : vector<1x240x128xf32> to vector<240x128xf32>
    %c0_1 = arith.constant 0 : index
    %c2 = arith.constant 2 : index
    %c0_2 = arith.constant 0 : index
    %2 = vector.load %arg3[%c0_1, %c2, %c0_2] : memref<1x248x128xf32, #tpu.memory_space<vmem>>, vector<1x240x128xf32>
    %3 = vector.shape_cast %2 : vector<1x240x128xf32> to vector<240x128xf32>
    %c0_3 = arith.constant 0 : index
    %c0_4 = arith.constant 0 : index
    %c0_5 = arith.constant 0 : index
    %4 = vector.load %arg3[%c0_3, %c0_4, %c0_5] : memref<1x248x128xf32, #tpu.memory_space<vmem>>, vector<1x192x128xf32>
    %5 = vector.shape_cast %4 : vector<1x192x128xf32> to vector<192x128xf32>
    %c0_6 = arith.constant 0 : index
    %c0_7 = arith.constant 0 : index
    %c0_8 = arith.constant 0 : index
    %c0_9 = arith.constant 0 : index
    %6 = vector.load %arg4[%c0_6, %c0_7, %c0_8, %c0_9] : memref<3x3x128x128xf32, #tpu.memory_space<vmem>>, vector<1x1x128x128xf32>
    %7 = vector.shape_cast %6 : vector<1x1x128x128xf32> to vector<128x128xf32>
    %cst = arith.constant dense<0.000000e+00> : vector<192x128xf32>
    %8 = tpu.matmul %5, %7, %cst {dimension_numbers = #tpu.dot_dimension_numbers<[1], [0], [0], [1], [0, 0, 1, 1], [], []>} : vector<192x128xf32>, vector<128x128xf32>, vector<192x128xf32> -> vector<192x128xf32>
    %c0_10 = arith.constant 0 : index
    %c24 = arith.constant 24 : index
    %c0_11 = arith.constant 0 : index
    %9 = vector.load %arg3[%c0_10, %c24, %c0_11] : memref<1x248x128xf32, #tpu.memory_space<vmem>>, vector<1x192x128xf32>
    %10 = vector.shape_cast %9 : vector<1x192x128xf32> to vector<192x128xf32>
    %c1_12 = arith.constant 1 : index
    %c0_13 = arith.constant 0 : index
    %c0_14 = arith.constant 0 : index
    %c0_15 = arith.constant 0 : index
    %11 = vector.load %arg4[%c1_12, %c0_13, %c0_14, %c0_15] : memref<3x3x128x128xf32, #tpu.memory_space<vmem>>, vector<1x1x128x128xf32>
    %12 = vector.shape_cast %11 : vector<1x1x128x128xf32> to vector<128x128xf32>
    %cst_16 = arith.constant dense<0.000000e+00> : vector<192x128xf32>
    %13 = tpu.matmul %10, %12, %cst_16 {dimension_numbers = #tpu.dot_dimension_numbers<[1], [0], [0], [1], [0, 0, 1, 1], [], []>} : vector<192x128xf32>, vector<128x128xf32>, vector<192x128xf32> -> vector<192x128xf32>
    %14 = arith.addf %8, %13 : vector<192x128xf32>
    %c0_17 = arith.constant 0 : index
    %c48 = arith.constant 48 : index
    %c0_18 = arith.constant 0 : index
    %15 = vector.load %arg3[%c0_17, %c48, %c0_18] : memref<1x248x128xf32, #tpu.memory_space<vmem>>, vector<1x192x128xf32>
    %16 = vector.shape_cast %15 : vector<1x192x128xf32> to vector<192x128xf32>
    %c2_19 = arith.constant 2 : index
    %c0_20 = arith.constant 0 : index
    %c0_21 = arith.constant 0 : index
    %c0_22 = arith.constant 0 : index
    %17 = vector.load %arg4[%c2_19, %c0_20, %c0_21, %c0_22] : memref<3x3x128x128xf32, #tpu.memory_space<vmem>>, vector<1x1x128x128xf32>
    %18 = vector.shape_cast %17 : vector<1x1x128x128xf32> to vector<128x128xf32>
    %cst_23 = arith.constant dense<0.000000e+00> : vector<192x128xf32>
    %19 = tpu.matmul %16, %18, %cst_23 {dimension_numbers = #tpu.dot_dimension_numbers<[1], [0], [0], [1], [0, 0, 1, 1], [], []>} : vector<192x128xf32>, vector<128x128xf32>, vector<192x128xf32> -> vector<192x128xf32>
    %20 = arith.addf %14, %19 : vector<192x128xf32>
    %21 = vector.extract_strided_slice %1 {offsets = [0, 0], sizes = [192, 128], strides = [1, 1]} : vector<240x128xf32> to vector<192x128xf32>
    %c0_24 = arith.constant 0 : index
    %c1_25 = arith.constant 1 : index
    %c0_26 = arith.constant 0 : index
    %c0_27 = arith.constant 0 : index
    %22 = vector.load %arg4[%c0_24, %c1_25, %c0_26, %c0_27] : memref<3x3x128x128xf32, #tpu.memory_space<vmem>>, vector<1x1x128x128xf32>
    %23 = vector.shape_cast %22 : vector<1x1x128x128xf32> to vector<128x128xf32>
    %cst_28 = arith.constant dense<0.000000e+00> : vector<192x128xf32>
    %24 = tpu.matmul %21, %23, %cst_28 {dimension_numbers = #tpu.dot_dimension_numbers<[1], [0], [0], [1], [0, 0, 1, 1], [], []>} : vector<192x128xf32>, vector<128x128xf32>, vector<192x128xf32> -> vector<192x128xf32>
    %25 = arith.addf %20, %24 : vector<192x128xf32>
    %26 = vector.extract_strided_slice %1 {offsets = [24, 0], sizes = [192, 128], strides = [1, 1]} : vector<240x128xf32> to vector<192x128xf32>
    %c1_29 = arith.constant 1 : index
    %c1_30 = arith.constant 1 : index
    %c0_31 = arith.constant 0 : index
    %c0_32 = arith.constant 0 : index
    %27 = vector.load %arg4[%c1_29, %c1_30, %c0_31, %c0_32] : memref<3x3x128x128xf32, #tpu.memory_space<vmem>>, vector<1x1x128x128xf32>
    %28 = vector.shape_cast %27 : vector<1x1x128x128xf32> to vector<128x128xf32>
    %cst_33 = arith.constant dense<0.000000e+00> : vector<192x128xf32>
    %29 = tpu.matmul %26, %28, %cst_33 {dimension_numbers = #tpu.dot_dimension_numbers<[1], [0], [0], [1], [0, 0, 1, 1], [], []>} : vector<192x128xf32>, vector<128x128xf32>, vector<192x128xf32> -> vector<192x128xf32>
    %30 = arith.addf %25, %29 : vector<192x128xf32>
    %31 = vector.extract_strided_slice %1 {offsets = [48, 0], sizes = [192, 128], strides = [1, 1]} : vector<240x128xf32> to vector<192x128xf32>
    %c2_34 = arith.constant 2 : index
    %c1_35 = arith.constant 1 : index
    %c0_36 = arith.constant 0 : index
    %c0_37 = arith.constant 0 : index
    %32 = vector.load %arg4[%c2_34, %c1_35, %c0_36, %c0_37] : memref<3x3x128x128xf32, #tpu.memory_space<vmem>>, vector<1x1x128x128xf32>
    %33 = vector.shape_cast %32 : vector<1x1x128x128xf32> to vector<128x128xf32>
    %cst_38 = arith.constant dense<0.000000e+00> : vector<192x128xf32>
    %34 = tpu.matmul %31, %33, %cst_38 {dimension_numbers = #tpu.dot_dimension_numbers<[1], [0], [0], [1], [0, 0, 1, 1], [], []>} : vector<192x128xf32>, vector<128x128xf32>, vector<192x128xf32> -> vector<192x128xf32>
    %35 = arith.addf %30, %34 : vector<192x128xf32>
    %36 = vector.extract_strided_slice %3 {offsets = [0, 0], sizes = [192, 128], strides = [1, 1]} : vector<240x128xf32> to vector<192x128xf32>
    %c0_39 = arith.constant 0 : index
    %c2_40 = arith.constant 2 : index
    %c0_41 = arith.constant 0 : index
    %c0_42 = arith.constant 0 : index
    %37 = vector.load %arg4[%c0_39, %c2_40, %c0_41, %c0_42] : memref<3x3x128x128xf32, #tpu.memory_space<vmem>>, vector<1x1x128x128xf32>
    %38 = vector.shape_cast %37 : vector<1x1x128x128xf32> to vector<128x128xf32>
    %cst_43 = arith.constant dense<0.000000e+00> : vector<192x128xf32>
    %39 = tpu.matmul %36, %38, %cst_43 {dimension_numbers = #tpu.dot_dimension_numbers<[1], [0], [0], [1], [0, 0, 1, 1], [], []>} : vector<192x128xf32>, vector<128x128xf32>, vector<192x128xf32> -> vector<192x128xf32>
    %40 = arith.addf %35, %39 : vector<192x128xf32>
    %41 = vector.extract_strided_slice %3 {offsets = [24, 0], sizes = [192, 128], strides = [1, 1]} : vector<240x128xf32> to vector<192x128xf32>
    %c1_44 = arith.constant 1 : index
    %c2_45 = arith.constant 2 : index
    %c0_46 = arith.constant 0 : index
    %c0_47 = arith.constant 0 : index
    %42 = vector.load %arg4[%c1_44, %c2_45, %c0_46, %c0_47] : memref<3x3x128x128xf32, #tpu.memory_space<vmem>>, vector<1x1x128x128xf32>
    %43 = vector.shape_cast %42 : vector<1x1x128x128xf32> to vector<128x128xf32>
    %cst_48 = arith.constant dense<0.000000e+00> : vector<192x128xf32>
    %44 = tpu.matmul %41, %43, %cst_48 {dimension_numbers = #tpu.dot_dimension_numbers<[1], [0], [0], [1], [0, 0, 1, 1], [], []>} : vector<192x128xf32>, vector<128x128xf32>, vector<192x128xf32> -> vector<192x128xf32>
    %45 = arith.addf %40, %44 : vector<192x128xf32>
    %46 = vector.extract_strided_slice %3 {offsets = [48, 0], sizes = [192, 128], strides = [1, 1]} : vector<240x128xf32> to vector<192x128xf32>
    %c2_49 = arith.constant 2 : index
    %c2_50 = arith.constant 2 : index
    %c0_51 = arith.constant 0 : index
    %c0_52 = arith.constant 0 : index
    %47 = vector.load %arg4[%c2_49, %c2_50, %c0_51, %c0_52] : memref<3x3x128x128xf32, #tpu.memory_space<vmem>>, vector<1x1x128x128xf32>
    %48 = vector.shape_cast %47 : vector<1x1x128x128xf32> to vector<128x128xf32>
    %cst_53 = arith.constant dense<0.000000e+00> : vector<192x128xf32>
    %49 = tpu.matmul %46, %48, %cst_53 {dimension_numbers = #tpu.dot_dimension_numbers<[1], [0], [0], [1], [0, 0, 1, 1], [], []>} : vector<192x128xf32>, vector<128x128xf32>, vector<192x128xf32> -> vector<192x128xf32>
    %50 = arith.addf %45, %49 : vector<192x128xf32>
    %c0_54 = arith.constant 0 : index
    %c0_55 = arith.constant 0 : index
    %51 = vector.load %arg5[%c0_54, %c0_55] : memref<1x128xf32, #tpu.memory_space<vmem>>, vector<1x128xf32>
    %52 = vector.broadcast %51 : vector<1x128xf32> to vector<192x128xf32>
    %53 = arith.addf %50, %52 : vector<192x128xf32>
    %cst_56 = arith.constant 0.000000e+00 : f32
    %54 = vector.broadcast %cst_56 : f32 to vector<192x128xf32>
    %55 = arith.maximumf %53, %54 : vector<192x128xf32>
    %c0_57 = arith.constant 0 : index
    %c0_58 = arith.constant 0 : index
    %c0_59 = arith.constant 0 : index
    %56 = vector.load %arg6[%c0_57, %c0_58, %c0_59] : memref<1x192x128xf32, #tpu.memory_space<vmem>>, vector<1x192x128xf32>
    %57 = vector.shape_cast %56 : vector<1x192x128xf32> to vector<192x128xf32>
    %58 = vector.shape_cast %55 : vector<192x128xf32> to vector<1x192x128xf32>
    tpu.vector_store %arg6[%c0_57, %c0_58, %c0_59], %58 {strides = array<i32>} : memref<1x192x128xf32, #tpu.memory_space<vmem>>, vector<1x192x128xf32>,
    return
  }
  func.func @transform_0(%arg0: i32, %arg1: i32, %arg2: i32) -> (i32, i32, i32) {
    %c2_i32 = arith.constant 2 : i32
    %0 = arith.muli %arg1, %c2_i32 : i32
    %1 = arith.addi %0, %arg2 : i32
    %c0_i32 = arith.constant 0 : i32
    %c0_i32_0 = arith.constant 0 : i32
    %c0_i32_1 = arith.constant 0 : i32
    return %1, %c0_i32, %c0_i32_0 : i32, i32, i32
  }
  func.func @transform_1(%arg0: i32, %arg1: i32, %arg2: i32) -> (i32, i32, i32, i32) {
    %c0_i32 = arith.constant 0 : i32
    %c0_i32_0 = arith.constant 0 : i32
    %c0_i32_1 = arith.constant 0 : i32
    %c0_i32_2 = arith.constant 0 : i32
    return %c0_i32, %c0_i32_0, %c0_i32_1, %arg0 : i32, i32, i32, i32
  }
  func.func @transform_2(%arg0: i32, %arg1: i32, %arg2: i32) -> (i32, i32) {
    %c0_i32 = arith.constant 0 : i32
    %c0_i32_0 = arith.constant 0 : i32
    return %c0_i32, %arg0 : i32, i32
  }
  func.func @transform_3(%arg0: i32, %arg1: i32, %arg2: i32) -> (i32, i32, i32) {
    %c0_i32 = arith.constant 0 : i32
    return %arg1, %arg2, %arg0 : i32, i32, i32
  }
}

</mosaic_0001>

<bundles_post_ra>
// kernel: tpu_custom_call.1
= control target key start
LH: loop header
LB: loop body
LE: loop exit
PB: predicated region body
PF: predicated region fallthrough
CT: control target
= control target key end

     0   :  { %s5211_s0 = inlined_call_operand.hbm [shape: f32[2,456,128], index: 0, kind: input, shape index: {}]   ;;  %s5212_s1 = inlined_call_operand.hbm [shape: f32[3,3,128,128], index: 1, kind: input, shape index: {}]   ;;  %s5213_s2 = inlined_call_operand.vmem [shape: f32[1,128], index: 2, kind: input, shape index: {}]   ;;  %s5214_s3 = inlined_call_operand.hbm [shape: f32[2,384,128], index: 3, kind: output, shape index: {}]  }
   0x1   :  { %5228 = sst [smem:[#allocation15_spill]] %s5212_s1 }
   0x2   :  { %5229 = sst [smem:[#allocation16_spill]] %s5214_s3 }
   0x3   :  { %8 = vsyncpa [#allocation3], 0 }
   0x4   :  { %10 = vsyncpa [#allocation3 + $0x1], 0 }
   0x5   :  { %11 = vsyncpa [#allocation6], 0 }
   0x6   :  { %12 = vsyncpa [#allocation4], 0 }
   0x7   :  { %14 = vsyncpa [#allocation4 + $0x1], 0  ;;  %s4417_s12 = smov 0   ;;  %s4419_s13 = smov 0  }
   0x8   :  { %s4421_s14 = smov 0   ;;  %s4423_s15 = smov 0  }
   0x9   :  { %s4425_s16 = smov 0   ;;  %s4427_s17 = smov 0  }
   0xa   :  { %s4429_s18 = smov 0   ;;  %s4431_s19 = smov 0  }
   0xb   :  { %s4433_s20 = smov 0   ;;  %s4435_s21 = smov 0  }
   0xc   :  { %s4437_s22 = smov 0  }
   0xd LB: > { %5230 = sst [smem:[#allocation11_spill]] %s4348_s12  ;;  %s2597_s23 = sadd.s32 4294967295, %s4388_s22   ;;  %s4388_s22 = sphi %s4437_s22, %s20_s22   ;;  %s4384_s21 = sphi %s4435_s21, %s5264_s21   ;;  %s4380_s20 = sphi %s4433_s20, %s5263_s20   ;;  %s4376_s19 = sphi %s4431_s19, %s5262_s19   ;;  %s4372_s18 = sphi %s4429_s18, %s5261_s18   ;;  %s4368_s17 = sphi %s4427_s17, %s5260_s17   ;;  %s4364_s16 = sphi %s4425_s16, %s5259_s16   ;;  %s4360_s15 = sphi %s4423_s15, %s5258_s15   ;;  %s4356_s14 = sphi %s4421_s14, %s5257_s14   ;;  %s4352_s13 = sphi %s4419_s13, %s5256_s13   ;;  %s4348_s12 = sphi %s4417_s12, %s5255_s12  }
   0xe   : > { %s2598_s24 = sadd.s32 4294967294, %s4388_s22   ;;  %p79_p0 = scmp.ne.s32.totalorder %s4364_s16, %s4360_s15 }
   0xf   : > { %p4473_p1 = scmp.eq.s32.totalorder %s2597_s23, 0  ;;  %p158_p2 = scmp.ne.s32.totalorder %s4356_s14, %s4352_s13 }
  0x10   : > { %p159_p4 = scmp.eq.s32.totalorder %s2597_s23, 3  ;;  %p164_p5 = scmp.ne.s32.totalorder %s4352_s13, %s4348_s12 }
  0x11   : > { %s5231_s25 = scalar_select %p4473_p1, 1, 0 }
  0x12   : > { %p4482_p3 = por %p4473_p1, %p79_p0  ;;  %p165_p6 = scmp.eq.s32.totalorder %s2598_s24, 3 }
  0x13   : > { %p4488_p7 = por %p159_p4, %p158_p2  ;;  %p2601_p8 = scmp.ge.s32.totalorder %s4388_s22, 1 }
  0x14   : > { %s5232_s27 = scalar_select %p4482_p3, 1, 0 }
  0x15   : > { %s5233_s28 = scalar_select %p4488_p7, 1, 0 }
  0x16   : > { %p4493_p9 = por %p165_p6, %p164_p5  ;;  %p172_p10 = scmp.lt.s32.totalorder %s4388_s22, 5 }
  0x17   : > { %5234 = sst [smem:[#allocation12_spill]] %s5233_s28  ;;  %s4390_s4 = smov [#allocation5]  }
  0x18   : > { %s5235_s29 = scalar_select %p4493_p9, 1, 0 }
  0x19   : > { %p4498_p11 = pnand %p2601_p8, %p172_p10  ;;  %s186_s5 = sshll.u32 %s4390_s4, 4  ;;  %s187_s5 = int_to_ptr.vmem [resolvable:$true] %s186_s5 }
  0x1a   : > { %5236 = sst [smem:[#allocation13_spill]] %s5235_s29  ;;  %s5239_s1 = sld [smem:[#allocation15_spill]] }
  0x1b   : > { %s5237_s30 = scalar_select %p4498_p11, 1, 0 }
  0x1c   : > { %p4094_p12 = pneg %p4498_p11 }
  0x1e   : > { %p4506_p13 = pnand %p4094_p12, %p4473_p1 }
  0x20   : > { %s4204_s9 = scalar_lea.hbm %s5239_s1, 18432  ;;  %p4206_p2 = pneg %p4506_p13 }
  0x21   : > { %p4205_p0 = scmp.ne.s32.totalorder %s5239_s1, %s4204_s9  ;;  %p4211_p6 = scmp.lt.u32.totalorder %s4204_s9, %s5239_s1 }
  0x23   : > { %p4207_p4 = pnand %p4206_p2, %p4205_p0 }
  0x25   : > { %p4208_p5 = pneg %p4207_p4 }
  0x27   : > { %p4213_p8 = pnand %p4211_p6, %p4208_p5 }
  0x29   : > { %4216 = shalt.err (!%p4213_p8)
}
  0x2a   : > { %s4217_s24 = scalar_lea.vmem %s187_s5, 18432  ;;  %p4225_p7 = scmp.lt.s32.totalorder %s187_s5, %s187_s5 }
  0x2b   : > { %p4218_p10 = scmp.ne.s32.totalorder %s187_s5, %s4217_s24  ;;  %p4226_p1 = scmp.lt.s32.totalorder %s4217_s24, %s4217_s24 }
  0x2d   : > { %p4220_p12 = pnand %p4218_p10, %p4206_p2  ;;  %p4227_p3 = por %p4226_p1, %p4225_p7 }
  0x2f   : > { %p4221_p9 = pneg %p4220_p12 }
  0x31   : > { %p4228_p11 = pnand %p4227_p3, %p4221_p9 }
  0x33   : > { %4231 = shalt.err (!%p4228_p11)
}
  0x34   : > { %s5220_s4 = smov 128   ;;  %s5221_s7 = smov 8  }
  0x35   : > { %4097 = dma.hbm_to_vmem [thread:$0]  (!%p4506_p13), %s5239_s1, 18432, %s187_s5, [#allocation6], %s5220_s4, %s5220_s4, %s5221_s7  }
  0x36   : > { %s32_s10 = sadd.s32 1, %s4380_s20  ;;  %s35_s11 = sadd.s32 1, %s4384_s21 }
  0x37   : > { %p33_p1 = scmp.ge.s32.totalorder %s32_s10, 2  ;;  %s43_s15 = smul.u32 192, %s4380_s20 }
  0x38   : > { %s66_s23 = sadd.s32 1, %s4368_s17  ;;  %p73_p7 = scmp.ne.s32.totalorder %s4368_s17, %s4364_s16 }
  0x39   : > { %s5266_s10 = smov (%p33_p1, %s32_s10), 0  ;;  %s5268_s11 = smov (!%p33_p1, %s35_s11), %s4384_s21 }
  0x3a   : > { %s47_s6 = ssub.s32 0, %s43_s15  ;;  %p37_p3 = scmp.ge.s32.totalorder %s5268_s11, 2 }
  0x3b   : > { %s2599_s24 = smin.u32 %s47_s6, %s43_s15  ;;  %s52_s5 = smul.u32 192, %s5266_s10 }
  0x3c   : > { %s49_s8 = sshrl.u32 %s2599_s24, 3  ;;  %s5270_s11 = smov (%p37_p3, %s5268_s11), 0 }
  0x3d   : > { %5240 = sst [smem:[#allocation14_spill]] %s5270_s11  ;;  %s56_s9 = ssub.s32 0, %s52_s5 }
  0x3e   : > { %s61_s4 = ssub.s32 %s4384_s21, %s5270_s11  ;;  %s2600_s7 = smin.u32 %s56_s9, %s52_s5 }
  0x3f   : > { %s58_s26 = sshrl.u32 %s2600_s7, 3  ;;  %p74_p9 = scmp.eq.s32.totalorder %s4388_s22, 0 }
  0x40   : > { %s142_s1 = ssub.s32 %s4380_s20, %s5266_s10  ;;  %s62_s6 = ssub.s32 %s49_s8, %s58_s26 }
  0x41   : > { %p75_p11 = por %p74_p9, %p73_p7  ;;  %s143_s15 = sor.u32 %s142_s1, %s61_s4 }
  0x42   : > { %p146_p13 = scmp.eq.s32.totalorder %s143_s15, 0  ;;  %s63_s24 = sor.u32 %s62_s6, %s61_s4 }
  0x43   : > { %p4107_p0 = scmp.lt.s32.totalorder %s4388_s22, 4  ;;  %p64_p2 = scmp.eq.s32.totalorder %s63_s24, 0 }
  0x44   : > { %s206_s29 = sand.u32 1, %s4368_s17   ;;  %s5241_s12 = sadd.s32 1, %s4356_s14 }
  0x45   : > { %s4551_s3 = scalar_select %p146_p13, %s4356_s14, %s5241_s12  }
  0x46   : > { %s4554_s28 = scalar_select %p64_p2, %s4368_s17, %s66_s23  }
  0x47   : > { %s4081_s11 = smul.u32 248, %s206_s29  ;;  %p4557_p4 = pnand %p4107_p0, %p75_p11 }
  0x48   : > { %s4082_s5 = smul.u32 57, %s4384_s21  ;;  %s4568_s23 = scalar_lea.sflag [#allocation3], %s206_s29 }
  0x49   : > { %s210_s26 = scalar_lea.vmem [#allocation2], %s4081_s11  ;;  %p4234_p6 = pneg %p4557_p4 }
  0x4a   : > { %s224_s1 = sadd.s32 %s4082_s5, %s49_s8  ;;  %s227_s7 = sshll.u32 %s210_s26, 4  ;;  %s4561_s7 = int_to_ptr.vmem [resolvable:$true] %s227_s7 }
  0x4b   : > { %s2606_s4 = sshll.u32 %s224_s1, 7  ;;  %s4237_s5 = scalar_lea.hbm %s5211_s0, 14592 }
  0x4c   : > { %s4566_s12 = scalar_lea.hbm %s5211_s0, %s2606_s4 }
  0x4d   : > { %s4232_s24 = scalar_lea.hbm %s4566_s12, 3968  ;;  %p4238_p12 = scmp.lt.u32.totalorder %s4566_s12, %s5211_s0 }
  0x4e   : > { %p4233_p5 = scmp.ne.s32.totalorder %s4566_s12, %s4232_s24  ;;  %p4239_p1 = scmp.lt.u32.totalorder %s4237_s5, %s4232_s24 }
  0x4f   : > { %p4241_p7 = scmp.lt.u32.totalorder %s4232_s24, %s4566_s12 }
  0x50   : > { %p4235_p8 = pnand %p4234_p6, %p4233_p5  ;;  %p4240_p3 = por %p4239_p1, %p4238_p12 }
  0x52   : > { %p4236_p10 = pneg %p4235_p8  ;;  %p4242_p9 = por %p4241_p7, %p4240_p3 }
  0x54   : > { %p4243_p11 = pnand %p4242_p9, %p4236_p10 }
  0x56   : > { %4246 = shalt.err (!%p4243_p11)
}
  0x57   : > { %s4247_s29 = scalar_lea.vmem %s4561_s7, 3968  ;;  %s4393_s4 = smov [#allocation2]  }
  0x58   : > { %p4248_p13 = scmp.ne.s32.totalorder %s4561_s7, %s4247_s29  ;;  %s4252_s15 = sshll.u32 %s4393_s4, 4  ;;  %s4253_s15 = int_to_ptr.vmem [resolvable:$false] %s4252_s15 }
  0x59   : > { %s4254_s6 = scalar_lea.vmem %s4253_s15, 7936  ;;  %p4255_p5 = scmp.lt.s32.totalorder %s4561_s7, %s4253_s15 }
  0x5a   : > { %p4250_p0 = pnand %p4248_p13, %p4234_p6  ;;  %p4256_p8 = scmp.lt.s32.totalorder %s4254_s6, %s4247_s29 }
  0x5c   : > { %p4251_p2 = pneg %p4250_p0  ;;  %p4257_p12 = por %p4256_p8, %p4255_p5 }
  0x5e   : > { %p4258_p1 = pnand %p4257_p12, %p4251_p2 }
  0x60   : > { %4261 = shalt.err (!%p4258_p1)
}
  0x61   : > { %s5243_s24 = smov 8   ;;  %s5244_s11 = smov 128  }
  0x62   : > { %4101 = dma.hbm_to_vmem [thread:$0]  (!%p4557_p4), %s4566_s12, 3968, %s4561_s7, %s4568_s23, %s5244_s11, %s5244_s11, %s5243_s24  }
  0x63   : > { %p5245_p6 = scmp.ne.s32.totalorder %s5237_s30, 0 }
  0x64   : > { %s241_s8 = sand.u32 (!%p5245_p6), 1, %s4364_s16   ;;  %p5246_p10 = scmp.ne.s32.totalorder (!%p5245_p6), %s5232_s27, 0 }
  0x65   : > { %239 = sbr.rel (%p5245_p6) target bundleno = 594 (0x252), region = 32  ;;  %s242_s1 = scalar_lea.sflag (!%p5245_p6), [#allocation3], %s241_s8 }
  0x66   : > { %s4083_s5 = smul.u32 (!%p5245_p6), 248, %s241_s8 }
  0x68   : > { %s4602_s26 = scalar_lea.vmem (!%p5245_p6), [#allocation2], %s4083_s5 }
  0x6c   : > { %4335 = dma.done.wait (%p5246_p10), %s242_s1, 3968  }
  0x6d   : > { %4337 = vsyncadd (%p5246_p10), %s242_s1, 4294963328  ;;  %p5247_p3 = scmp.ne.s32.totalorder %s5231_s25, 0 }
  0x6f   : > { %4339 = dma.done.wait (%p5247_p3), [#allocation6], 18432  }
  0x70   : > { %4341 = vsyncadd (%p5247_p3), [#allocation6], 4294948864  ;;  %v392_v0 = vld [vmem:[#allocation5 + $0x180] sm:$0xff]  ;;  %v393_v1 = vld [vmem:[#allocation5 + $0x188] sm:$0xff]  ;;  %s272_s25 = sand.u32 1, %s4352_s13   ;;  %s2471_s12 = smul.u32 24, %s4372_s18 }
  0x71   : > { %v1255_v2 = vld [vmem:[#allocation5 + $0x200] sm:$0xff]  ;;  %v3585_v3 = vpack.c.bf16 %v393_v1, %v392_v0  ;;  %v1256_v4 = vld [vmem:[#allocation5 + $0x208] sm:$0xff]  ;;  %v394_v5 = vld [vmem:[#allocation5 + $0x190] sm:$0xff]  ;;  %s4084_s27 = smul.u32 192, %s272_s25  ;;  %s5248_s4 = sld [smem:[#allocation12_spill]] }
  0x72   : > { %v395_v6 = vld [vmem:[#allocation5 + $0x198] sm:$0xff]  ;;  %v3713_v7 = vpack.c.bf16 %v1256_v4, %v1255_v2  ;;  %v1257_v9 = vld [vmem:[#allocation5 + $0x210] sm:$0xff]  ;;  %v396_v11 = vld [vmem:[#allocation5 + $0x1a0] sm:$0xff]  ;;  %s4085_s23 = smul.u32 48, %s4376_s19  ;;  %s5249_s24 = sld [smem:[#allocation16_spill]] }
  0x73   : > { %v3589_v8 = vpack.c.bf16 %v395_v6, %v394_v5  ;;  %v1258_v10 = vld [vmem:[#allocation5 + $0x218] sm:$0xff]  ;;  %3586 = vmatprep.subr.bf16.mxu1 %v3585_v3  ;;  %v397_v13 = vld [vmem:[#allocation5 + $0x1a8] sm:$0xff]  ;;  %v1259_v14 = vld [vmem:[#allocation5 + $0x220] sm:$0xff]  ;;  %s5076_s7 = scalar_lea.vmem [#allocation7], %s4084_s27  ;;  %s5150_s8 = scalar_lea.sflag [#allocation4], %s272_s25 }
  0x74   : > { %v3717_v12 = vpack.c.bf16 %v1258_v10, %v1257_v9  ;;  %v1260_v15 = vld [vmem:[#allocation5 + $0x228] sm:$0xff]  ;;  %3714 = vmatprep.subr.bf16.mxu0 %v3713_v7  ;;  %3588 = vmatpush3.bf16.msra.mxu1 %v3585_v3  ;;  %v3593_v16 = vpack.c.bf16 %v397_v13, %v396_v11  ;;  %v398_v18 = vld [vmem:[#allocation5 + $0x1b0] sm:$0xff]  ;;  %v399_v19 = vld [vmem:[#allocation5 + $0x1b8] sm:$0xff]  ;;  %s2477_s18 = sadd.s32 %s4085_s23, %s2471_s12  ;;  %s2480_s29 = sshll.u32 %s5076_s7, 4  ;;  %s5142_s29 = int_to_ptr.vmem [resolvable:$true] %s2480_s29 }
  0x75   : > { %3716 = vmatpush3.bf16.msra.mxu0 %v3713_v7  ;;  %3590 = vmatprep.subr.bf16.mxu1 %v3589_v8  ;;  %v3721_v17 = vpack.c.bf16 %v1260_v15, %v1259_v14  ;;  %v1261_v20 = vld [vmem:[#allocation5 + $0x230] sm:$0xff]  ;;  %v1262_v21 = vld [vmem:[#allocation5 + $0x238] sm:$0xff]  ;;  %v3597_v22 = vpack.c.bf16 %v399_v19, %v398_v18  ;;  %v400_v24 = vld [vmem:[#allocation5 + $0x1c0] sm:$0xff]  ;;  %s2610_s19 = sshll.u32 %s2477_s18, 7  ;;  %s4262_s5 = scalar_lea.vmem %s5142_s29, 3072 }
  0x76   : > { %3718 = vmatprep.subr.bf16.mxu0 %v3717_v12  ;;  %v3725_v23 = vpack.c.bf16 %v1262_v21, %v1261_v20  ;;  %v401_v25 = vld [vmem:[#allocation5 + $0x1c8] sm:$0xff]  ;;  %v1263_v27 = vld [vmem:[#allocation5 + $0x240] sm:$0xff]  ;;  %v402_v32 = vld [vmem:[#allocation5 + $0x1d0] sm:$0xff]  ;;  %p4263_p4 = scmp.ne.s32.totalorder %s5142_s29, %s4262_s5  ;;  %s4394_s1 = smov [#allocation7]  }
  0x77   : > { %v4613_v26 = vld [vmem:[%s4602_s26 + $0x18] sm:$0xff]  ;;  %v3601_v30 = vpack.c.bf16 %v401_v25, %v400_v24  ;;  %v403_v33 = vld [vmem:[#allocation5 + $0x1d8] sm:$0xff]  ;;  %v1265_v34 = vld [vmem:[#allocation5 + $0x250] sm:$0xff]  ;;  %p5250_p7 = scmp.ne.s32.totalorder %s5248_s4, 0 }
  0x78   : > { %3592 = vmatpush3.bf16.msra.mxu1 %v3589_v8  ;;  %v1264_v28 = vld [vmem:[#allocation5 + $0x248] sm:$0xff]  ;;  %3005 = vmatprep.mubr.f32.mxu1 %v4613_v26  ;;  %v1266_v35 = vld [vmem:[#allocation5 + $0x258] sm:$0xff]  ;;  %v3605_v36 = vpack.c.bf16 %v403_v33, %v402_v32  ;;  %v404_v38 = vld [vmem:[#allocation5 + $0x1e0] sm:$0xff]  ;;  %s5140_s11 = scalar_lea.hbm %s5249_s24, %s2610_s19 }
  0x79   : > { %3720 = vmatpush3.bf16.msra.mxu0 %v3717_v12  ;;  %3594 = vmatprep.subr.bf16.mxu1 %v3593_v16  ;;  %v291_v29 = vld [vmem:[%s4602_s26 + $0x19] sm:$0xff]  ;;  %v3729_v31 = vpack.c.bf16 %v1264_v28, %v1263_v27  ;;  %v3733_v37 = vpack.c.bf16 %v1266_v35, %v1265_v34  ;;  %v407_v45 = vld [vmem:[#allocation5 + $0x1f8] sm:$0xff]  ;;  %p4264_p9 = pnand %p4263_p4, %p5250_p7 }
  0x7a   : > { %3722 = vmatprep.subr.bf16.mxu0 %v3721_v17  ;;  %3277 = vmatprep.mubr.f32.mxu0 %v291_v29  ;;  %v405_v39 = vld [vmem:[#allocation5 + $0x1e8] sm:$0xff]  ;;  %v1267_v40 = vld [vmem:[#allocation5 + $0x260] sm:$0xff]  ;;  %v406_v44 = vld [vmem:[#allocation5 + $0x1f0] sm:$0xff] }
  0x7b   : > { %v1268_v41 = vld [vmem:[#allocation5 + $0x268] sm:$0xff]  ;;  %v3609_v42 = vpack.c.bf16 %v405_v39, %v404_v38  ;;  %v1269_v46 = vld [vmem:[#allocation5 + $0x270] sm:$0xff]  ;;  %v1270_v47 = vld [vmem:[#allocation5 + $0x278] sm:$0xff]  ;;  %v3613_v48 = vpack.c.bf16 %v407_v45, %v406_v44  ;;  %p4265_p11 = pneg %p4264_p9 }
  0x7c   : > { %3596 = vmatpush3.bf16.msra.mxu1 %v3593_v16  ;;  %v3737_v43 = vpack.c.bf16 %v1268_v41, %v1267_v40  ;;  %v3741_v49 = vpack.c.bf16 %v1270_v47, %v1269_v46  ;;  %v372_v50 = vld [vmem:[#allocation5] sm:$0xff]  ;;  %v373_v51 = vld [vmem:[#allocation5 + $0x8] sm:$0xff]  ;;  %v374_v56 = vld [vmem:[#allocation5 + $0x10] sm:$0xff] }
  0x7d   : > { %3724 = vmatpush3.bf16.msra.mxu0 %v3721_v17  ;;  %3598 = vmatprep.subr.bf16.mxu1 %v3597_v22  ;;  %v1481_v52 = vld [vmem:[#allocation5 + $0x380] sm:$0xff]  ;;  %v1482_v53 = vld [vmem:[#allocation5 + $0x388] sm:$0xff]  ;;  %v3617_v54 = vpack.c.bf16 %v373_v51, %v372_v50  ;;  %v375_v57 = vld [vmem:[#allocation5 + $0x18] sm:$0xff] }
  0x7e   : > { %3726 = vmatprep.subr.bf16.mxu0 %v3725_v23  ;;  %v3745_v55 = vpack.c.bf16 %v1482_v53, %v1481_v52  ;;  %v4618_v58 = vld [vmem:[%s4602_s26 + $0x20] sm:$0xff]  ;;  %v1484_v60 = vld [vmem:[#allocation5 + $0x398] sm:$0xff]  ;;  %v3621_v63 = vpack.c.bf16 %v375_v57, %v374_v56  ;;  %v376_v2 = vld [vmem:[#allocation5 + $0x20] sm:$0xff] }
  0x7f   : > { %v1483_v59 = vld [vmem:[#allocation5 + $0x390] sm:$0xff]  ;;  %v377_v3 = vld [vmem:[#allocation5 + $0x28] sm:$0xff]  ;;  %v4632_v4 = vld [vmem:[%s4602_s26 + $0x30] sm:$0xff] }
  0x80   : > { %3600 = vmatpush3.bf16.msra.mxu1 %v3597_v22  ;;  %v4621_v61 = vld [vmem:[%s4602_s26 + $0x21] sm:$0xff]  ;;  %v4628_v0 = vld [vmem:[%s4602_s26 + $0x29] sm:$0xff]  ;;  %v3749_v1 = vpack.c.bf16 %v1484_v60, %v1483_v59  ;;  %v4636_v7 = vld [vmem:[%s4602_s26 + $0x31] sm:$0xff]  ;;  %v3625_v10 = vpack.c.bf16 %v377_v3, %v376_v2 }
  0x81   : > { %3728 = vmatpush3.bf16.msra.mxu0 %v3725_v23  ;;  %3602 = vmatprep.subr.bf16.mxu1 %v3601_v30  ;;  %v4624_v62 = vld [vmem:[%s4602_s26 + $0x28] sm:$0xff]  ;;  %v1485_v5 = vld [vmem:[#allocation5 + $0x3a0] sm:$0xff]  ;;  %v1486_v6 = vld [vmem:[#allocation5 + $0x3a8] sm:$0xff] }
  0x82   : > { %3730 = vmatprep.subr.bf16.mxu0 %v3729_v31  ;;  %v4639_v8 = vld [vmem:[%s4602_s26 + $0x38] sm:$0xff]  ;;  %v3753_v11 = vpack.c.bf16 %v1486_v6, %v1485_v5  ;;  %v378_v12 = vld [vmem:[#allocation5 + $0x30] sm:$0xff]  ;;  %v379_v13 = vld [vmem:[#allocation5 + $0x38] sm:$0xff] }
  0x83   : > { %v4643_v9 = vld [vmem:[%s4602_s26 + $0x39] sm:$0xff]  ;;  %v1488_v16 = vld [vmem:[#allocation5 + $0x3b8] sm:$0xff]  ;;  %v3629_v20 = vpack.c.bf16 %v379_v13, %v378_v12 }
  0x84   : > { %3604 = vmatpush3.bf16.msra.mxu1 %v3601_v30  ;;  %v4649_v14 = vld [vmem:[%s4602_s26 + $0x40] sm:$0xff]  ;;  %v4656_v18 = vld [vmem:[%s4602_s26 + $0x48] sm:$0xff]  ;;  %v380_v22 = vld [vmem:[#allocation5 + $0x40] sm:$0xff] }
  0x85   : > { %3732 = vmatpush3.bf16.msra.mxu0 %v3729_v31  ;;  %3606 = vmatprep.subr.bf16.mxu1 %v3605_v36  ;;  %v1487_v15 = vld [vmem:[#allocation5 + $0x3b0] sm:$0xff]  ;;  %v381_v23 = vld [vmem:[#allocation5 + $0x48] sm:$0xff]  ;;  %v4665_v24 = vld [vmem:[%s4602_s26 + $0x50] sm:$0xff] }
  0x86   : > { %3734 = vmatprep.subr.bf16.mxu0 %v3733_v37  ;;  %v4653_v17 = vld [vmem:[%s4602_s26 + $0x41] sm:$0xff]  ;;  %v4659_v19 = vld [vmem:[%s4602_s26 + $0x49] sm:$0xff]  ;;  %v3757_v21 = vpack.c.bf16 %v1488_v16, %v1487_v15  ;;  %v4669_v28 = vld [vmem:[%s4602_s26 + $0x51] sm:$0xff]  ;;  %v3633_v31 = vpack.c.bf16 %v381_v23, %v380_v22 }
  0x87   : > { %v1489_v25 = vld [vmem:[#allocation5 + $0x3c0] sm:$0xff]  ;;  %v1490_v27 = vld [vmem:[#allocation5 + $0x3c8] sm:$0xff]  ;;  %v382_v33 = vld [vmem:[#allocation5 + $0x50] sm:$0xff] }
  0x88   : > { %3608 = vmatpush3.bf16.msra.mxu1 %v3605_v36  ;;  %v4672_v29 = vld [vmem:[%s4602_s26 + $0x58] sm:$0xff]  ;;  %v3761_v32 = vpack.c.bf16 %v1490_v27, %v1489_v25  ;;  %v383_v34 = vld [vmem:[#allocation5 + $0x58] sm:$0xff]  ;;  %v4681_v35 = vld [vmem:[%s4602_s26 + $0x60] sm:$0xff] }
  0x89   : > { %3736 = vmatpush3.bf16.msra.mxu0 %v3733_v37  ;;  %3610 = vmatprep.subr.bf16.mxu1 %v3609_v42  ;;  %v4675_v30 = vld [vmem:[%s4602_s26 + $0x59] sm:$0xff]  ;;  %v1492_v37 = vld [vmem:[#allocation5 + $0x3d8] sm:$0xff]  ;;  %v3637_v41 = vpack.c.bf16 %v383_v34, %v382_v33 }
  0x8a   : > { %3738 = vmatprep.subr.bf16.mxu0 %v3737_v43  ;;  %v1491_v36 = vld [vmem:[#allocation5 + $0x3d0] sm:$0xff]  ;;  %v385_v44 = vld [vmem:[#allocation5 + $0x68] sm:$0xff]  ;;  %v4697_v45 = vld [vmem:[%s4602_s26 + $0x70] sm:$0xff] }
  0x8b   : > { %v4685_v38 = vld [vmem:[%s4602_s26 + $0x61] sm:$0xff]  ;;  %v4691_v40 = vld [vmem:[%s4602_s26 + $0x69] sm:$0xff]  ;;  %v4707_v50 = vld [vmem:[%s4602_s26 + $0x79] sm:$0xff] }
  0x8c   : > { %3612 = vmatpush3.bf16.msra.mxu1 %v3609_v42  ;;  %v4688_v39 = vld [vmem:[%s4602_s26 + $0x68] sm:$0xff]  ;;  %v3765_v42 = vpack.c.bf16 %v1492_v37, %v1491_v36  ;;  %v1493_v46 = vld [vmem:[#allocation5 + $0x3e0] sm:$0xff]  ;;  %v1494_v47 = vld [vmem:[#allocation5 + $0x3e8] sm:$0xff] }
  0x8d   : > { %3740 = vmatpush3.bf16.msra.mxu0 %v3737_v43  ;;  %3614 = vmatprep.subr.bf16.mxu1 %v3613_v48  ;;  %v384_v43 = vld [vmem:[#allocation5 + $0x60] sm:$0xff]  ;;  %v3769_v52 = vpack.c.bf16 %v1494_v47, %v1493_v46  ;;  %v386_v53 = vld [vmem:[#allocation5 + $0x70] sm:$0xff]  ;;  %v1496_v57 = vld [vmem:[#allocation5 + $0x3f8] sm:$0xff] }
  0x8e   : > { %3742 = vmatprep.subr.bf16.mxu0 %v3741_v49  ;;  %v3641_v51 = vpack.c.bf16 %v385_v44, %v384_v43  ;;  %v1495_v56 = vld [vmem:[#allocation5 + $0x3f0] sm:$0xff]  ;;  %v803_v3 = vld [vmem:[#allocation5 + $0x300] sm:$0xff]  ;;  %v804_v5 = vld [vmem:[#allocation5 + $0x308] sm:$0xff] }
  0x8f   : > { %v4717_v59 = vld [vmem:[%s4602_s26 + $0x81] sm:$0xff]  ;;  %v3773_v2 = vpack.c.bf16 %v1496_v57, %v1495_v56  ;;  %v4729_v6 = vld [vmem:[%s4602_s26 + $0x90] sm:$0xff]  ;;  %v4736_v13 = vld [vmem:[%s4602_s26 + $0x98] sm:$0xff]  ;;  %v3649_v16 = vpack.c.bf16 %v804_v5, %v803_v3 }
  0x90   : > { %3616 = vmatpush3.bf16.msra.mxu1 %v3613_v48  ;;  %v4701_v48 = vld [vmem:[%s4602_s26 + $0x71] sm:$0xff]  ;;  %v4720_v60 = vld [vmem:[%s4602_s26 + $0x88] sm:$0xff]  ;;  %v4739_v15 = vld [vmem:[%s4602_s26 + $0x99] sm:$0xff] }
  0x91   : > { %3744 = vmatpush3.bf16.msra.mxu0 %v3741_v49  ;;  %3618 = vmatprep.subr.bf16.mxu1 %v3617_v54  ;;  %v4704_v49 = vld [vmem:[%s4602_s26 + $0x78] sm:$0xff]  ;;  %v4749_v22 = vld [vmem:[%s4602_s26 + $0xa1] sm:$0xff]  ;;  %v4755_v25 = vld [vmem:[%s4602_s26 + $0xa9] sm:$0xff] }
  0x92   : > { %3746 = vmatprep.subr.bf16.mxu0 %v3745_v55  ;;  %v4733_v12 = vld [vmem:[%s4602_s26 + $0x91] sm:$0xff]  ;;  %v4752_v23 = vld [vmem:[%s4602_s26 + $0xa8] sm:$0xff]  ;;  %v4771_v33 = vld [vmem:[%s4602_s26 + $0xb9] sm:$0xff] }
  0x93   : > { %3006 = vmatmul.mubr.f32.vlgmr.msra.gmra.mrb[0].mxu1 %v4618_v58  ;;  %v4761_v27 = vld [vmem:[%s4602_s26 + $0xb0] sm:$0xff]  ;;  %v4777_v34 = vld [vmem:[%s4602_s26 + $0xc0] sm:$0xff]  ;;  %v4784_v37 = vld [vmem:[%s4602_s26 + $0xc8] sm:$0xff] }
  0x94   : > { %3278 = vmatmul.mubr.f32.vlgmr.msra.gmra.mrb[0].mxu0 %v4621_v61  ;;  %3620 = vmatpush3.bf16.msra.mxu1 %v3617_v54  ;;  %v387_v54 = vld [vmem:[#allocation5 + $0x78] sm:$0xff]  ;;  %v348_v44 = vld [vmem:[%s4602_s26] sm:$0xff]  ;;  %v1711_v3 = vld [vmem:[#allocation5 + $0x120] sm:$0xff] }
  0x95   : > { %3748 = vmatpush3.bf16.msra.mxu0 %v3745_v55  ;;  %3008 = vmatprep.mubr.f32.mxu1 %v4624_v62  ;;  %v4713_v55 = vld [vmem:[%s4602_s26 + $0x80] sm:$0xff]  ;;  %v4797_v43 = vld [vmem:[%s4602_s26 + $0xd1] sm:$0xff] }
  0x96   : > { %3280 = vmatprep.mubr.f32.mxu0 %v4628_v0  ;;  %3622 = vmatprep.subr.bf16.mxu1 %v3621_v63  ;;  %v4781_v36 = vld [vmem:[%s4602_s26 + $0xc1] sm:$0xff] }
  0x97   : > { %3009 = vmatmul.mubr.f32.gmra.mrb[2].mxu1 %v4632_v4  ;;  %3750 = vmatprep.subr.bf16.mxu0 %v3749_v1  ;;  %v805_v46 = vld [vmem:[#allocation5 + $0x310] sm:$0xff]  ;;  %v806_v47 = vld [vmem:[#allocation5 + $0x318] sm:$0xff]  ;;  %v1712_v5 = vld [vmem:[#allocation5 + $0x128] sm:$0xff] }
  0x98   : > { %3281 = vmatmul.mubr.f32.gmra.mrb[2].mxu0 %v4636_v7  ;;  %3011 = vmatprep.mubr.f32.mxu1 %v4639_v8  ;;  %v3653_v56 = vpack.c.bf16 %v806_v47, %v805_v46  ;;  %v810_v46 = vld [vmem:[#allocation5 + $0x338] sm:$0xff]  ;;  %v1713_v47 = vld [vmem:[#allocation5 + $0x130] sm:$0xff] }
  0x99   : > { %3624 = vmatpush3.bf16.msra.mxu1 %v3621_v63  ;;  %3283 = vmatprep.mubr.f32.mxu0 %v4643_v9  ;;  %v4723_v63 = vld [vmem:[%s4602_s26 + $0x89] sm:$0xff] }
  0x9a   : > { %3752 = vmatpush3.bf16.msra.mxu0 %v3749_v1  ;;  %3626 = vmatprep.subr.bf16.mxu1 %v3625_v10  ;;  %v3645_v1 = vpack.c.bf16 %v387_v54, %v386_v53  ;;  %v1710_v53 = vld [vmem:[#allocation5 + $0x118] sm:$0xff] }
  0x9b   : > { %3012 = vmatmul.mubr.f32.gmra.mrb[4].mxu1 %v4649_v14  ;;  %3754 = vmatprep.subr.bf16.mxu0 %v3753_v11  ;;  %v350_v54 = vld [vmem:[%s4602_s26 + $0x10] sm:$0xff] }
  0x9c   : > { %3284 = vmatmul.mubr.f32.gmra.mrb[4].mxu0 %v4653_v17  ;;  %3014 = vmatprep.mubr.f32.mxu1 %v4656_v18 }
  0x9d   : > { %3286 = vmatprep.mubr.f32.mxu0 %v4659_v19  ;;  %3628 = vmatpush3.bf16.msra.mxu1 %v3625_v10  ;;  %v1707_v10 = vld [vmem:[#allocation5 + $0x100] sm:$0xff] }
  0x9e   : > { %3756 = vmatpush3.bf16.msra.mxu0 %v3753_v11  ;;  %3630 = vmatprep.subr.bf16.mxu1 %v3629_v20  ;;  %v1708_v11 = vld [vmem:[#allocation5 + $0x108] sm:$0xff] }
  0x9f   : > { %3015 = vmatmul.mubr.f32.gmra.mrb[6].mxu1 %v4665_v24  ;;  %3758 = vmatprep.subr.bf16.mxu0 %v3757_v21 }
  0xa0   : > { %3287 = vmatmul.mubr.f32.gmra.mrb[6].mxu0 %v4669_v28  ;;  %3017 = vmatprep.mubr.f32.mxu1 %v4672_v29 }
  0xa1   : > { %3289 = vmatprep.mubr.f32.mxu0 %v4675_v30  ;;  %3632 = vmatpush3.bf16.msra.mxu1 %v3629_v20  ;;  %v3777_v20 = vpack.c.bf16 %v1708_v11, %v1707_v10  ;;  %v3785_v11 = vpack.c.bf16 %v1712_v5, %v1711_v3 }
  0xa2   : > { %3760 = vmatpush3.bf16.msra.mxu0 %v3757_v21  ;;  %3634 = vmatprep.subr.bf16.mxu1 %v3633_v31  ;;  %v4745_v21 = vld [vmem:[%s4602_s26 + $0xa0] sm:$0xff] }
  0xa3   : > { %3018 = vmatmul.mubr.f32.gmra.mrb[8].mxu1 %v4681_v35  ;;  %3762 = vmatprep.subr.bf16.mxu0 %v3761_v32 }
  0xa4   : > { %3290 = vmatmul.mubr.f32.gmra.mrb[8].mxu0 %v4685_v38  ;;  %3020 = vmatprep.mubr.f32.mxu1 %v4688_v39 }
  0xa5   : > { %3292 = vmatprep.mubr.f32.mxu0 %v4691_v40  ;;  %3636 = vmatpush3.bf16.msra.mxu1 %v3633_v31  ;;  %v4765_v31 = vld [vmem:[%s4602_s26 + $0xb1] sm:$0xff] }
  0xa6   : > { %3764 = vmatpush3.bf16.msra.mxu0 %v3761_v32  ;;  %3638 = vmatprep.subr.bf16.mxu1 %v3637_v41  ;;  %v4768_v32 = vld [vmem:[%s4602_s26 + $0xb8] sm:$0xff] }
  0xa7   : > { %3021 = vmatmul.mubr.f32.gmra.mrb[10].mxu1 %v4697_v45  ;;  %3766 = vmatprep.subr.bf16.mxu0 %v3765_v42 }
  0xa8   : > { %3293 = vmatmul.mubr.f32.gmra.mrb[10].mxu0 %v4701_v48  ;;  %3023 = vmatprep.mubr.f32.mxu1 %v4704_v49 }
  0xa9   : > { %3295 = vmatprep.mubr.f32.mxu0 %v4707_v50  ;;  %3640 = vmatpush3.bf16.msra.mxu1 %v3637_v41  ;;  %v4787_v41 = vld [vmem:[%s4602_s26 + $0xc9] sm:$0xff] }
  0xaa   : > { %3768 = vmatpush3.bf16.msra.mxu0 %v3765_v42  ;;  %3642 = vmatprep.subr.bf16.mxu1 %v3641_v51  ;;  %v4793_v42 = vld [vmem:[%s4602_s26 + $0xd0] sm:$0xff] }
  0xab   : > { %3024 = vmatmul.mubr.f32.gmra.mrb[12].mxu1 %v4713_v55  ;;  %3770 = vmatprep.subr.bf16.mxu0 %v3769_v52 }
  0xac   : > { %3296 = vmatmul.mubr.f32.gmra.mrb[12].mxu0 %v4717_v59  ;;  %3026 = vmatprep.mubr.f32.mxu1 %v4720_v60 }
  0xad   : > { %3298 = vmatprep.mubr.f32.mxu0 %v4723_v63  ;;  %3644 = vmatpush3.bf16.msra.mxu1 %v3641_v51  ;;  %v349_v51 = vld [vmem:[%s4602_s26 + $0x8] sm:$0xff] }
  0xae   : > { %3772 = vmatpush3.bf16.msra.mxu0 %v3769_v52  ;;  %3646 = vmatprep.subr.bf16.mxu1 %v3645_v1  ;;  %v1709_v52 = vld [vmem:[#allocation5 + $0x110] sm:$0xff] }
  0xaf   : > { %3027 = vmatmul.mubr.f32.gmra.mrb[14].mxu1 %v4729_v6  ;;  %3774 = vmatprep.subr.bf16.mxu0 %v3773_v2  ;;  %v3781_v57 = vpack.c.bf16 %v1710_v53, %v1709_v52  ;;  %v812_v52 = vld [vmem:[#allocation5 + $0x348] sm:$0xff]  ;;  %v1715_v53 = vld [vmem:[#allocation5 + $0x140] sm:$0xff] }
  0xb0   : > { %3299 = vmatmul.mubr.f32.gmra.mrb[14].mxu0 %v4733_v12  ;;  %3029 = vmatprep.mubr.f32.mxu1 %v4736_v13 }
  0xb1   : > { %3301 = vmatprep.mubr.f32.mxu0 %v4739_v15  ;;  %3648 = vmatpush3.bf16.msra.mxu1 %v3645_v1  ;;  %v807_v1 = vld [vmem:[#allocation5 + $0x320] sm:$0xff] }
  0xb2   : > { %3776 = vmatpush3.bf16.msra.mxu0 %v3773_v2  ;;  %3650 = vmatprep.subr.bf16.mxu1 %v3649_v16  ;;  %v808_v2 = vld [vmem:[#allocation5 + $0x328] sm:$0xff] }
  0xb3   : > { %3030 = vmatmul.mubr.f32.gmra.mrb[16].mxu1 %v4745_v21  ;;  %3778 = vmatprep.subr.bf16.mxu0 %v3777_v20  ;;  %v3657_v10 = vpack.c.bf16 %v808_v2, %v807_v1  ;;  %v1717_v1 = vld [vmem:[#allocation5 + $0x150] sm:$0xff]  ;;  %v1718_v2 = vld [vmem:[#allocation5 + $0x158] sm:$0xff] }
  0xb4   : > { %3302 = vmatmul.mubr.f32.gmra.mrb[16].mxu0 %v4749_v22  ;;  %3032 = vmatprep.mubr.f32.mxu1 %v4752_v23  ;;  %v3797_v5 = vpack.c.bf16 %v1718_v2, %v1717_v1 }
  0xb5   : > { %3304 = vmatprep.mubr.f32.mxu0 %v4755_v25 }
  0xb7   : > { %3033 = vmatmul.mubr.f32.gmra.mrb[18].mxu1 %v4761_v27 }
  0xb8   : > { %3305 = vmatmul.mubr.f32.gmra.mrb[18].mxu0 %v4765_v31  ;;  %3035 = vmatprep.mubr.f32.mxu1 %v4768_v32 }
  0xb9   : > { %3307 = vmatprep.mubr.f32.mxu0 %v4771_v33 }
  0xbb   : > { %3036 = vmatmul.mubr.f32.gmra.mrb[20].mxu1 %v4777_v34 }
  0xbc   : > { %3308 = vmatmul.mubr.f32.gmra.mrb[20].mxu0 %v4781_v36  ;;  %3038 = vmatprep.mubr.f32.mxu1 %v4784_v37 }
  0xbd   : > { %3310 = vmatprep.mubr.f32.mxu0 %v4787_v41 }
  0xbf   : > { %3039 = vmatmul.mubr.f32.gmra.mrb[22].mxu1 %v4793_v42 }
  0xc0   : > { %3311 = vmatmul.mubr.f32.gmra.mrb[22].mxu0 %v4797_v43  ;;  %3073 = vmatprep.mubr.f32.mxu1 %v348_v44  ;;  %v809_v44 = vld [vmem:[#allocation5 + $0x330] sm:$0xff] }
  0xc1   : > { %3345 = vmatprep.mubr.f32.mxu0 %v4636_v7 }
  0xc3   : > { %3074 = vmatmul.mubr.f32.vlgmr.msra.gmra.mrb[0].mxu1 %v349_v51  ;;  %v811_v51 = vld [vmem:[#allocation5 + $0x340] sm:$0xff] }
  0xc4   : > { %3346 = vmatmul.mubr.f32.vlgmr.msra.gmra.mrb[0].mxu0 %v4643_v9  ;;  %3652 = vmatpush3.bf16.msra.mxu1 %v3649_v16  ;;  %v1714_v16 = vld [vmem:[#allocation5 + $0x138] sm:$0xff] }
  0xc5   : > { %3780 = vmatpush3.bf16.msra.mxu0 %v3777_v20  ;;  %3076 = vmatprep.mubr.f32.mxu1 %v350_v54  ;;  %v3661_v20 = vpack.c.bf16 %v810_v46, %v809_v44  ;;  %v3665_v54 = vpack.c.bf16 %v812_v52, %v811_v51  ;;  %v1719_v44 = vld [vmem:[#allocation5 + $0x160] sm:$0xff]  ;;  %v1720_v46 = vld [vmem:[#allocation5 + $0x168] sm:$0xff]  ;;  %v1721_v51 = vld [vmem:[#allocation5 + $0x170] sm:$0xff] }
  0xc6   : > { %3348 = vmatprep.mubr.f32.mxu0 %v4653_v17  ;;  %3654 = vmatprep.subr.bf16.mxu1 %v3653_v56  ;;  %v1722_v52 = vld [vmem:[#allocation5 + $0x178] sm:$0xff] }
  0xc7   : > { %3077 = vmatmul.mubr.f32.gmra.mrb[2].mxu1 %v4613_v26  ;;  %3782 = vmatprep.subr.bf16.mxu0 %v3781_v57  ;;  %v3789_v26 = vpack.c.bf16 %v1714_v16, %v1713_v47  ;;  %v3801_v16 = vpack.c.bf16 %v1720_v46, %v1719_v44  ;;  %v1936_v44 = vld [vmem:[#allocation5 + $0x298] sm:$0xff] }
  0xc8   : > { %3349 = vmatmul.mubr.f32.gmra.mrb[2].mxu0 %v4659_v19  ;;  %3079 = vmatprep.mubr.f32.mxu1 %v4618_v58  ;;  %v1716_v58 = vld [vmem:[#allocation5 + $0x148] sm:$0xff]  ;;  %v319_v46 = vld [vmem:[%s4602_s26 + $0xa] sm:$0xff] }
  0xc9   : > { %3656 = vmatpush3.bf16.msra.mxu1 %v3653_v56  ;;  %3351 = vmatprep.mubr.f32.mxu0 %v4669_v28  ;;  %v813_v56 = vld [vmem:[#allocation5 + $0x350] sm:$0xff] }
  0xca   : > { %3784 = vmatpush3.bf16.msra.mxu0 %v3781_v57  ;;  %3658 = vmatprep.subr.bf16.mxu1 %v3657_v10  ;;  %v814_v57 = vld [vmem:[#allocation5 + $0x358] sm:$0xff] }
  0xcb   : > { %3080 = vmatmul.mubr.f32.gmra.mrb[4].mxu1 %v4624_v62  ;;  %3786 = vmatprep.subr.bf16.mxu0 %v3785_v11  ;;  %v3793_v62 = vpack.c.bf16 %v1716_v58, %v1715_v53  ;;  %v3669_v3 = vpack.c.bf16 %v814_v57, %v813_v56  ;;  %v3805_v58 = vpack.c.bf16 %v1722_v52, %v1721_v51  ;;  %v1933_v56 = vld [vmem:[#allocation5 + $0x280] sm:$0xff]  ;;  %v1934_v57 = vld [vmem:[#allocation5 + $0x288] sm:$0xff] }
  0xcc   : > { %3352 = vmatmul.mubr.f32.gmra.mrb[4].mxu0 %v4675_v30  ;;  %3082 = vmatprep.mubr.f32.mxu1 %v4632_v4  ;;  %v3809_v2 = vpack.c.bf16 %v1934_v57, %v1933_v56  ;;  %v1034_v51 = vld [vmem:[#allocation5 + $0xa8] sm:$0xff]  ;;  %v1937_v52 = vld [vmem:[#allocation5 + $0x2a0] sm:$0xff]  ;;  %v1036_v56 = vld [vmem:[#allocation5 + $0xb8] sm:$0xff] }
  0xcd   : > { %3354 = vmatprep.mubr.f32.mxu0 %v4685_v38  ;;  %3660 = vmatpush3.bf16.msra.mxu1 %v3657_v10  ;;  %v815_v10 = vld [vmem:[#allocation5 + $0x360] sm:$0xff]  ;;  %v1940_v57 = vld [vmem:[#allocation5 + $0x2b8] sm:$0xff] }
  0xce   : > { %3788 = vmatpush3.bf16.msra.mxu0 %v3785_v11  ;;  %3662 = vmatprep.subr.bf16.mxu1 %v3661_v20  ;;  %v816_v11 = vld [vmem:[#allocation5 + $0x368] sm:$0xff] }
  0xcf   : > { %3083 = vmatmul.mubr.f32.gmra.mrb[6].mxu1 %v4639_v8  ;;  %3790 = vmatprep.subr.bf16.mxu0 %v3789_v26  ;;  %v3673_v47 = vpack.c.bf16 %v816_v11, %v815_v10  ;;  %v317_v10 = vld [vmem:[%s4602_s26 + $0xe9] sm:$0xff] }
  0xd0   : > { %3355 = vmatmul.mubr.f32.gmra.mrb[6].mxu0 %v4691_v40  ;;  %3085 = vmatprep.mubr.f32.mxu1 %v4649_v14  ;;  %v1031_v11 = vld [vmem:[#allocation5 + $0x90] sm:$0xff] }
  0xd1   : > { %3357 = vmatprep.mubr.f32.mxu0 %v4701_v48  ;;  %3664 = vmatpush3.bf16.msra.mxu1 %v3661_v20  ;;  %v817_v20 = vld [vmem:[#allocation5 + $0x370] sm:$0xff] }
  0xd2   : > { %3792 = vmatpush3.bf16.msra.mxu0 %v3789_v26  ;;  %3666 = vmatprep.subr.bf16.mxu1 %v3665_v54  ;;  %v818_v26 = vld [vmem:[#allocation5 + $0x378] sm:$0xff] }
  0xd3   : > { %3086 = vmatmul.mubr.f32.gmra.mrb[8].mxu1 %v4656_v18  ;;  %3794 = vmatprep.subr.bf16.mxu0 %v3793_v62  ;;  %v3677_v53 = vpack.c.bf16 %v818_v26, %v817_v20  ;;  %v1033_v26 = vld [vmem:[#allocation5 + $0xa0] sm:$0xff] }
  0xd4   : > { %3358 = vmatmul.mubr.f32.gmra.mrb[8].mxu0 %v4707_v50  ;;  %3088 = vmatprep.mubr.f32.mxu1 %v4665_v24 }
  0xd5   : > { %3360 = vmatprep.mubr.f32.mxu0 %v4717_v59  ;;  %3668 = vmatpush3.bf16.msra.mxu1 %v3665_v54  ;;  %v1029_v54 = vld [vmem:[#allocation5 + $0x80] sm:$0xff] }
  0xd6   : > { %3796 = vmatpush3.bf16.msra.mxu0 %v3793_v62  ;;  %3670 = vmatprep.subr.bf16.mxu1 %v3669_v3  ;;  %v1030_v62 = vld [vmem:[#allocation5 + $0x88] sm:$0xff] }
  0xd7   : > { %3089 = vmatmul.mubr.f32.gmra.mrb[10].mxu1 %v4672_v29  ;;  %3798 = vmatprep.subr.bf16.mxu0 %v3797_v5  ;;  %v3681_v1 = vpack.c.bf16 %v1030_v62, %v1029_v54  ;;  %v1035_v62 = vld [vmem:[#allocation5 + $0xb0] sm:$0xff] }
  0xd8   : > { %3361 = vmatmul.mubr.f32.gmra.mrb[10].mxu0 %v4723_v63  ;;  %3091 = vmatprep.mubr.f32.mxu1 %v4681_v35 }
  0xd9   : > { %3363 = vmatprep.mubr.f32.mxu0 %v4733_v12  ;;  %3672 = vmatpush3.bf16.msra.mxu1 %v3669_v3  ;;  %v315_v3 = vld [vmem:[%s4602_s26 + $0xd9] sm:$0xff] }
  0xda   : > { %3800 = vmatpush3.bf16.msra.mxu0 %v3797_v5  ;;  %3674 = vmatprep.subr.bf16.mxu1 %v3673_v47  ;;  %v316_v5 = vld [vmem:[%s4602_s26 + $0xe1] sm:$0xff] }
  0xdb   : > { %3092 = vmatmul.mubr.f32.gmra.mrb[12].mxu1 %v4688_v39  ;;  %3802 = vmatprep.subr.bf16.mxu0 %v3801_v16 }
  0xdc   : > { %3364 = vmatmul.mubr.f32.gmra.mrb[12].mxu0 %v4739_v15  ;;  %3094 = vmatprep.mubr.f32.mxu1 %v4697_v45 }
  0xdd   : > { %3366 = vmatprep.mubr.f32.mxu0 %v4749_v22  ;;  %3676 = vmatpush3.bf16.msra.mxu1 %v3673_v47 }
  0xde   : > { %3804 = vmatpush3.bf16.msra.mxu0 %v3801_v16  ;;  %3678 = vmatprep.subr.bf16.mxu1 %v3677_v53  ;;  %v320_v16 = vld [vmem:[%s4602_s26 + $0x12] sm:$0xff] }
  0xdf   : > { %3095 = vmatmul.mubr.f32.gmra.mrb[14].mxu1 %v4704_v49  ;;  %3806 = vmatprep.subr.bf16.mxu0 %v3805_v58 }
  0xe0   : > { %3367 = vmatmul.mubr.f32.gmra.mrb[14].mxu0 %v4755_v25  ;;  %3097 = vmatprep.mubr.f32.mxu1 %v4713_v55 }
  0xe1   : > { %3369 = vmatprep.mubr.f32.mxu0 %v4765_v31  ;;  %3680 = vmatpush3.bf16.msra.mxu1 %v3677_v53  ;;  %v1938_v53 = vld [vmem:[#allocation5 + $0x2a8] sm:$0xff] }
  0xe2   : > { %3808 = vmatpush3.bf16.msra.mxu0 %v3805_v58  ;;  %3682 = vmatprep.subr.bf16.mxu1 %v3681_v1  ;;  %v4859_v58 = vld [vmem:[%s4602_s26 + $0x22] sm:$0xff]  ;;  %v3817_v54 = vpack.c.bf16 %v1938_v53, %v1937_v52  ;;  %v1945_v52 = vld [vmem:[#allocation5 + $0x2e0] sm:$0xff] }
  0xe3   : > { %3098 = vmatmul.mubr.f32.gmra.mrb[16].mxu1 %v4720_v60  ;;  %3810 = vmatprep.subr.bf16.mxu0 %v3809_v2  ;;  %v1946_v53 = vld [vmem:[#allocation5 + $0x2e8] sm:$0xff] }
  0xe4   : > { %3370 = vmatmul.mubr.f32.gmra.mrb[16].mxu0 %v4771_v33  ;;  %3100 = vmatprep.mubr.f32.mxu1 %v4729_v6 }
  0xe5   : > { %3372 = vmatprep.mubr.f32.mxu0 %v4781_v36  ;;  %v318_v36 = vld [vmem:[%s4602_s26 + $0x2] sm:$0xff] }
  0xe7   : > { %3101 = vmatmul.mubr.f32.gmra.mrb[18].mxu1 %v4736_v13 }
  0xe8   : > { %3373 = vmatmul.mubr.f32.gmra.mrb[18].mxu0 %v4787_v41  ;;  %3103 = vmatprep.mubr.f32.mxu1 %v4745_v21  ;;  %v1032_v41 = vld [vmem:[#allocation5 + $0x98] sm:$0xff] }
  0xe9   : > { %3375 = vmatprep.mubr.f32.mxu0 %v4797_v43  ;;  %v1935_v43 = vld [vmem:[#allocation5 + $0x290] sm:$0xff]  ;;  %v3685_v47 = vpack.c.bf16 %v1032_v41, %v1031_v11 }
  0xea   : > { %v3813_v20 = vpack.c.bf16 %v1936_v44, %v1935_v43  ;;  %v4876_v11 = vld [vmem:[%s4602_s26 + $0x3a] sm:$0xff]  ;;  %v4879_v41 = vld [vmem:[%s4602_s26 + $0x42] sm:$0xff] }
  0xeb   : > { %3104 = vmatmul.mubr.f32.gmra.mrb[20].mxu1 %v4752_v23  ;;  %v1039_v44 = vld [vmem:[#allocation5 + $0xd0] sm:$0xff] }
  0xec   : > { %3376 = vmatmul.mubr.f32.gmra.mrb[20].mxu0 %v315_v3  ;;  %3106 = vmatprep.mubr.f32.mxu1 %v4761_v27 }
  0xed   : > { %3378 = vmatprep.mubr.f32.mxu0 %v316_v5  ;;  %v1037_v5 = vld [vmem:[#allocation5 + $0xc0] sm:$0xff] }
  0xef   : > { %3107 = vmatmul.mubr.f32.gmra.mrb[22].mxu1 %v4768_v32 }
  0xf0   : > { %3379 = vmatmul.mubr.f32.gmra.mrb[22].mxu0 %v317_v10  ;;  %3141 = vmatprep.mubr.f32.mxu1 %v4632_v4  ;;  %v4856_v4 = vld [vmem:[%s4602_s26 + $0x1a] sm:$0xff] }
  0xf1   : > { %3413 = vmatprep.mubr.f32.mxu0 %v318_v36  ;;  %v1941_v10 = vld [vmem:[#allocation5 + $0x2c0] sm:$0xff]  ;;  %v1942_v36 = vld [vmem:[#allocation5 + $0x2c8] sm:$0xff] }
  0xf2   : > { %v3825_v43 = vpack.c.bf16 %v1942_v36, %v1941_v10  ;;  %v4916_v10 = vld [vmem:[%s4602_s26 + $0x7a] sm:$0xff]  ;;  %v4919_v36 = vld [vmem:[%s4602_s26 + $0x82] sm:$0xff] }
  0xf3   : > { %3142 = vmatmul.mubr.f32.vlgmr.msra.gmra.mrb[0].mxu1 %v4639_v8  ;;  %v3689_v8 = vpack.c.bf16 %v1034_v51, %v1033_v26  ;;  %v1041_v51 = vld [vmem:[#allocation5 + $0xe0] sm:$0xff] }
  0xf4   : > { %3414 = vmatmul.mubr.f32.vlgmr.msra.gmra.mrb[0].mxu0 %v319_v46  ;;  %3684 = vmatpush3.bf16.msra.mxu1 %v3681_v1  ;;  %v4866_v1 = vld [vmem:[%s4602_s26 + $0x2a] sm:$0xff] }
  0xf5   : > { %3812 = vmatpush3.bf16.msra.mxu0 %v3809_v2  ;;  %3144 = vmatprep.mubr.f32.mxu1 %v4649_v14  ;;  %v1939_v14 = vld [vmem:[#allocation5 + $0x2b0] sm:$0xff]  ;;  %v4869_v2 = vld [vmem:[%s4602_s26 + $0x32] sm:$0xff] }
  0xf6   : > { %3416 = vmatprep.mubr.f32.mxu0 %v320_v16  ;;  %3686 = vmatprep.subr.bf16.mxu1 %v3685_v47  ;;  %v3821_v3 = vpack.c.bf16 %v1940_v57, %v1939_v14  ;;  %v1943_v46 = vld [vmem:[#allocation5 + $0x2d0] sm:$0xff]  ;;  %v1948_v57 = vld [vmem:[#allocation5 + $0x2f8] sm:$0xff] }
  0xf7   : > { %3145 = vmatmul.mubr.f32.gmra.mrb[2].mxu1 %v4656_v18  ;;  %3814 = vmatprep.subr.bf16.mxu0 %v3813_v20  ;;  %v3693_v18 = vpack.c.bf16 %v1036_v56, %v1035_v62  ;;  %v4886_v16 = vld [vmem:[%s4602_s26 + $0x4a] sm:$0xff]  ;;  %v3833_v62 = vpack.c.bf16 %v1946_v53, %v1945_v52  ;;  %v2164_v52 = vld [vmem:[#allocation5 + $0x428] sm:$0xff] }
  0xf8   : > { %3417 = vmatmul.mubr.f32.gmra.mrb[2].mxu0 %v4856_v4  ;;  %3147 = vmatprep.mubr.f32.mxu1 %v4665_v24  ;;  %v1038_v24 = vld [vmem:[#allocation5 + $0xc8] sm:$0xff]  ;;  %v1043_v56 = vld [vmem:[#allocation5 + $0xf0] sm:$0xff] }
  0xf9   : > { %3688 = vmatpush3.bf16.msra.mxu1 %v3685_v47  ;;  %3419 = vmatprep.mubr.f32.mxu0 %v4859_v58  ;;  %v1944_v47 = vld [vmem:[#allocation5 + $0x2d8] sm:$0xff]  ;;  %v1947_v14 = vld [vmem:[#allocation5 + $0x2f0] sm:$0xff] }
  0xfa   : > { %3816 = vmatpush3.bf16.msra.mxu0 %v3813_v20  ;;  %3690 = vmatprep.subr.bf16.mxu1 %v3689_v8  ;;  %v4889_v20 = vld [vmem:[%s4602_s26 + $0x52] sm:$0xff]  ;;  %v3829_v26 = vpack.c.bf16 %v1944_v47, %v1943_v46  ;;  %v2161_v46 = vld [vmem:[#allocation5 + $0x410] sm:$0xff] }
  0xfb   : > { %3148 = vmatmul.mubr.f32.gmra.mrb[4].mxu1 %v4672_v29  ;;  %3818 = vmatprep.subr.bf16.mxu0 %v3817_v54  ;;  %v3697_v29 = vpack.c.bf16 %v1038_v24, %v1037_v5  ;;  %v3837_v5 = vpack.c.bf16 %v1948_v57, %v1947_v14  ;;  %v2159_v24 = vld [vmem:[#allocation5 + $0x400] sm:$0xff]  ;;  %v2162_v47 = vld [vmem:[#allocation5 + $0x418] sm:$0xff]  ;;  %v2172_v57 = vld [vmem:[#allocation5 + $0x468] sm:$0xff] }
  0xfc   : > { %3420 = vmatmul.mubr.f32.gmra.mrb[4].mxu0 %v4866_v1  ;;  %3150 = vmatprep.mubr.f32.mxu1 %v4681_v35  ;;  %v1040_v35 = vld [vmem:[#allocation5 + $0xd8] sm:$0xff] }
  0xfd   : > { %3422 = vmatprep.mubr.f32.mxu0 %v4869_v2  ;;  %3692 = vmatpush3.bf16.msra.mxu1 %v3689_v8  ;;  %v4896_v8 = vld [vmem:[%s4602_s26 + $0x5a] sm:$0xff]  ;;  %v2170_v14 = vld [vmem:[#allocation5 + $0x458] sm:$0xff] }
  0xfe   : > { %3820 = vmatpush3.bf16.msra.mxu0 %v3817_v54  ;;  %3694 = vmatprep.subr.bf16.mxu1 %v3693_v18  ;;  %v4899_v54 = vld [vmem:[%s4602_s26 + $0x62] sm:$0xff] }
  0xff   : > { %3151 = vmatmul.mubr.f32.gmra.mrb[6].mxu1 %v4688_v39  ;;  %3822 = vmatprep.subr.bf16.mxu0 %v3821_v3  ;;  %v3701_v39 = vpack.c.bf16 %v1040_v35, %v1039_v44  ;;  %v4951_v44 = vld [vmem:[%s4602_s26 + $0xb2] sm:$0xff]  ;;  %v801_v35 = vld [vmem:[%s4602_s26 + $0xe8] sm:$0xff] }
 0x100   : > { %3423 = vmatmul.mubr.f32.gmra.mrb[6].mxu0 %v4876_v11  ;;  %3153 = vmatprep.mubr.f32.mxu1 %v4697_v45  ;;  %v1042_v45 = vld [vmem:[#allocation5 + $0xe8] sm:$0xff] }
 0x101   : > { %3425 = vmatprep.mubr.f32.mxu0 %v4879_v41  ;;  %3696 = vmatpush3.bf16.msra.mxu1 %v3693_v18  ;;  %v4906_v18 = vld [vmem:[%s4602_s26 + $0x6a] sm:$0xff] }
 0x102   : > { %3824 = vmatpush3.bf16.msra.mxu0 %v3821_v3  ;;  %3698 = vmatprep.subr.bf16.mxu1 %v3697_v29  ;;  %v4909_v3 = vld [vmem:[%s4602_s26 + $0x72] sm:$0xff] }
 0x103   : > { %3154 = vmatmul.mubr.f32.gmra.mrb[8].mxu1 %v4704_v49  ;;  %3826 = vmatprep.subr.bf16.mxu0 %v3825_v43  ;;  %v3705_v49 = vpack.c.bf16 %v1042_v45, %v1041_v51  ;;  %v3845_v51 = vpack.c.bf16 %v2162_v47, %v2161_v46  ;;  %v2163_v45 = vld [vmem:[#allocation5 + $0x420] sm:$0xff] }
 0x104   : > { %3426 = vmatmul.mubr.f32.gmra.mrb[8].mxu0 %v4886_v16  ;;  %3156 = vmatprep.mubr.f32.mxu1 %v4713_v55  ;;  %v1044_v55 = vld [vmem:[#allocation5 + $0xf8] sm:$0xff]  ;;  %v3849_v53 = vpack.c.bf16 %v2164_v52, %v2163_v45 }
 0x105   : > { %3428 = vmatprep.mubr.f32.mxu0 %v4889_v20  ;;  %3700 = vmatpush3.bf16.msra.mxu1 %v3697_v29  ;;  %v4929_v29 = vld [vmem:[%s4602_s26 + $0x92] sm:$0xff] }
 0x106   : > { %3828 = vmatpush3.bf16.msra.mxu0 %v3825_v43  ;;  %3702 = vmatprep.subr.bf16.mxu1 %v3701_v39  ;;  %v4947_v43 = vld [vmem:[%s4602_s26 + $0xaa] sm:$0xff] }
 0x107   : > { %3157 = vmatmul.mubr.f32.gmra.mrb[10].mxu1 %v4720_v60  ;;  %3830 = vmatprep.subr.bf16.mxu0 %v3829_v26  ;;  %v3709_v60 = vpack.c.bf16 %v1044_v55, %v1043_v56  ;;  %v2166_v56 = vld [vmem:[#allocation5 + $0x438] sm:$0xff]  ;;  %v2169_v55 = vld [vmem:[#allocation5 + $0x450] sm:$0xff] }
 0x108   : > { %3429 = vmatmul.mubr.f32.gmra.mrb[10].mxu0 %v4896_v8  ;;  %3159 = vmatprep.mubr.f32.mxu1 %v4729_v6  ;;  %v2160_v6 = vld [vmem:[#allocation5 + $0x408] sm:$0xff] }
 0x109   : > { %3431 = vmatprep.mubr.f32.mxu0 %v4899_v54  ;;  %3704 = vmatpush3.bf16.msra.mxu1 %v3701_v39  ;;  %v289_v39 = vld [vmem:[%s4602_s26 + $0x9] sm:$0xff] }
 0x10a   : > { %3832 = vmatpush3.bf16.msra.mxu0 %v3829_v26  ;;  %3706 = vmatprep.subr.bf16.mxu1 %v3705_v49  ;;  %v290_v26 = vld [vmem:[%s4602_s26 + $0x11] sm:$0xff] }
 0x10b   : > { %3160 = vmatmul.mubr.f32.gmra.mrb[12].mxu1 %v4736_v13  ;;  %3834 = vmatprep.subr.bf16.mxu0 %v3833_v62  ;;  %v3841_v13 = vpack.c.bf16 %v2160_v6, %v2159_v24 }
 0x10c   : > { %3432 = vmatmul.mubr.f32.gmra.mrb[12].mxu0 %v4906_v18  ;;  %3162 = vmatprep.mubr.f32.mxu1 %v4745_v21  ;;  %v4926_v21 = vld [vmem:[%s4602_s26 + $0x8a] sm:$0xff] }
 0x10d   : > { %3434 = vmatprep.mubr.f32.mxu0 %v4909_v3  ;;  %3708 = vmatpush3.bf16.msra.mxu1 %v3705_v49  ;;  %v4203_v49 = vld [vmem:[%s4602_s26 + $0x19] sm:$0xff] }
 0x10e   : > { %3836 = vmatpush3.bf16.msra.mxu0 %v3833_v62  ;;  %3710 = vmatprep.subr.bf16.mxu1 %v3709_v60  ;;  %v2165_v62 = vld [vmem:[#allocation5 + $0x430] sm:$0xff] }
 0x10f   : > { %3163 = vmatmul.mubr.f32.gmra.mrb[14].mxu1 %v4752_v23  ;;  %3838 = vmatprep.subr.bf16.mxu0 %v3837_v5  ;;  %v4936_v23 = vld [vmem:[%s4602_s26 + $0x9a] sm:$0xff] }
 0x110   : > { %3435 = vmatmul.mubr.f32.gmra.mrb[14].mxu0 %v4916_v10  ;;  %3165 = vmatprep.mubr.f32.mxu1 %v4761_v27  ;;  %v4939_v27 = vld [vmem:[%s4602_s26 + $0xa2] sm:$0xff] }
 0x111   : > { %3437 = vmatprep.mubr.f32.mxu0 %v4919_v36  ;;  %3712 = vmatpush3.bf16.msra.mxu1 %v3709_v60  ;;  %v2174_v60 = vld [vmem:[#allocation5 + $0x478] sm:$0xff] }
 0x112   : > { %3840 = vmatpush3.bf16.msra.mxu0 %v3837_v5  ;;  %3873 = vmatprep.subr.bf16.mxu1 %v3841_v13 }
 0x113   : > { %3166 = vmatmul.mubr.f32.gmra.mrb[16].mxu1 %v4768_v32  ;;  %3842 = vmatprep.subr.bf16.mxu0 %v3841_v13  ;;  %v799_v32 = vld [vmem:[%s4602_s26 + $0xd8] sm:$0xff] }
 0x114   : > { %3438 = vmatmul.mubr.f32.gmra.mrb[16].mxu0 %v4926_v21  ;;  %3168 = vmatprep.mubr.f32.mxu1 %v4777_v34  ;;  %v800_v34 = vld [vmem:[%s4602_s26 + $0xe0] sm:$0xff] }
 0x115   : > { %3440 = vmatprep.mubr.f32.mxu0 %v4929_v29 }
 0x117   : > { %3169 = vmatmul.mubr.f32.gmra.mrb[18].mxu1 %v4784_v37  ;;  %v4957_v37 = vld [vmem:[%s4602_s26 + $0xba] sm:$0xff] }
 0x118   : > { %3441 = vmatmul.mubr.f32.gmra.mrb[18].mxu0 %v4936_v23  ;;  %3171 = vmatprep.mubr.f32.mxu1 %v4793_v42  ;;  %v288_v42 = vld [vmem:[%s4602_s26 + $0x1] sm:$0xff] }
 0x119   : > { %3443 = vmatprep.mubr.f32.mxu0 %v4939_v27 }
 0x11b   : > { %3172 = vmatmul.mubr.f32.gmra.mrb[20].mxu1 %v799_v32 }
 0x11c   : > { %3444 = vmatmul.mubr.f32.gmra.mrb[20].mxu0 %v4947_v43  ;;  %3174 = vmatprep.mubr.f32.mxu1 %v800_v34 }
 0x11d   : > { %3446 = vmatprep.mubr.f32.mxu0 %v4951_v44 }
 0x11f   : > { %3175 = vmatmul.mubr.f32.gmra.mrb[22].mxu1 %v801_v35 }
 0x120   : > { %3447 = vmatmul.mubr.f32.gmra.mrb[22].mxu0 %v4957_v37  ;;  %3209 = vmatprep.mubr.f32.mxu1 %v288_v42 }
 0x121   : > { %3481 = vmatprep.mubr.f32.mxu0 %v4856_v4  ;;  %v3853_v4 = vpack.c.bf16 %v2166_v56, %v2165_v62 }
 0x123   : > { %3210 = vmatmul.mubr.f32.vlgmr.msra.gmra.mrb[0].mxu1 %v289_v39 }
 0x124   : > { %3482 = vmatmul.mubr.f32.vlgmr.msra.gmra.mrb[0].mxu0 %v4859_v58  ;;  %3881 = vmatpush3.bf16.msra.mxu1 %v3841_v13  ;;  %v2167_v58 = vld [vmem:[#allocation5 + $0x440] sm:$0xff] }
 0x125   : > { %3844 = vmatpush3.bf16.msra.mxu0 %v3841_v13  ;;  %3212 = vmatprep.mubr.f32.mxu1 %v290_v26 }
 0x126   : > { %3484 = vmatprep.mubr.f32.mxu0 %v4866_v1  ;;  %3846 = vmatprep.subr.bf16.mxu0 %v3845_v51  ;;  %v2168_v1 = vld [vmem:[#allocation5 + $0x448] sm:$0xff] }
 0x127   : > { %3213 = vmatmul.mubr.f32.gmra.mrb[2].mxu1 %v4203_v49  ;;  %3874 = vmatprep.subr.bf16.mxu1 %v3845_v51 }
 0x128   : > { %3485 = vmatmul.mubr.f32.gmra.mrb[2].mxu0 %v4869_v2  ;;  %3215 = vmatprep.mubr.f32.mxu1 %v4621_v61  ;;  %v3857_v61 = vpack.c.bf16 %v2168_v1, %v2167_v58 }
 0x129   : > { %3487 = vmatprep.mubr.f32.mxu0 %v4876_v11  ;;  %3848 = vmatpush3.bf16.msra.mxu0 %v3845_v51 }
 0x12a   : > { %3882 = vmatpush3.bf16.msra.mxu1 %v3845_v51  ;;  %3850 = vmatprep.subr.bf16.mxu0 %v3849_v53 }
 0x12b   : > { %3216 = vmatmul.mubr.f32.gmra.mrb[4].mxu1 %v4628_v0  ;;  %3875 = vmatprep.subr.bf16.mxu1 %v3849_v53  ;;  %v3861_v0 = vpack.c.bf16 %v2170_v14, %v2169_v55 }
 0x12c   : > { %3488 = vmatmul.mubr.f32.gmra.mrb[4].mxu0 %v4879_v41  ;;  %3218 = vmatprep.mubr.f32.mxu1 %v4636_v7  ;;  %v2171_v7 = vld [vmem:[#allocation5 + $0x460] sm:$0xff] }
 0x12d   : > { %3490 = vmatprep.mubr.f32.mxu0 %v4886_v16  ;;  %3852 = vmatpush3.bf16.msra.mxu0 %v3849_v53 }
 0x12e   : > { %3883 = vmatpush3.bf16.msra.mxu1 %v3849_v53  ;;  %3854 = vmatprep.subr.bf16.mxu0 %v3853_v4 }
 0x12f   : > { %3219 = vmatmul.mubr.f32.gmra.mrb[6].mxu1 %v4643_v9  ;;  %3876 = vmatprep.subr.bf16.mxu1 %v3853_v4  ;;  %v3865_v9 = vpack.c.bf16 %v2172_v57, %v2171_v7 }
 0x130   : > { %3491 = vmatmul.mubr.f32.gmra.mrb[6].mxu0 %v4889_v20  ;;  %3221 = vmatprep.mubr.f32.mxu1 %v4653_v17  ;;  %v2173_v17 = vld [vmem:[#allocation5 + $0x470] sm:$0xff] }
 0x131   : > { %3493 = vmatprep.mubr.f32.mxu0 %v4896_v8  ;;  %3856 = vmatpush3.bf16.msra.mxu0 %v3853_v4 }
 0x132   : > { %3884 = vmatpush3.bf16.msra.mxu1 %v3853_v4  ;;  %3858 = vmatprep.subr.bf16.mxu0 %v3857_v61 }
 0x133   : > { %3222 = vmatmul.mubr.f32.gmra.mrb[8].mxu1 %v4659_v19  ;;  %3877 = vmatprep.subr.bf16.mxu1 %v3857_v61  ;;  %v3869_v19 = vpack.c.bf16 %v2174_v60, %v2173_v17 }
 0x134   : > { %3494 = vmatmul.mubr.f32.gmra.mrb[8].mxu0 %v4899_v54  ;;  %3224 = vmatprep.mubr.f32.mxu1 %v4669_v28  ;;  %v342_v28 = vld [vmem:[%s4602_s26 + $0xc2] sm:$0xff] }
 0x135   : > { %3496 = vmatprep.mubr.f32.mxu0 %v4906_v18  ;;  %3860 = vmatpush3.bf16.msra.mxu0 %v3857_v61 }
 0x136   : > { %3885 = vmatpush3.bf16.msra.mxu1 %v3857_v61  ;;  %3862 = vmatprep.subr.bf16.mxu0 %v3861_v0  ;;  %v5069_v61 = vld [vmem:[%s5213_s2] ss:$0 sm:$0xff] }
 0x137   : > { %3225 = vmatmul.mubr.f32.gmra.mrb[10].mxu1 %v4675_v30  ;;  %3878 = vmatprep.subr.bf16.mxu1 %v3861_v0  ;;  %v343_v30 = vld [vmem:[%s4602_s26 + $0xca] sm:$0xff] }
 0x138   : > { %3497 = vmatmul.mubr.f32.gmra.mrb[10].mxu0 %v4909_v3  ;;  %3227 = vmatprep.mubr.f32.mxu1 %v4685_v38  ;;  %v344_v38 = vld [vmem:[%s4602_s26 + $0xd2] sm:$0xff] }
 0x139   : > { %3499 = vmatprep.mubr.f32.mxu0 %v4916_v10  ;;  %3864 = vmatpush3.bf16.msra.mxu0 %v3861_v0 }
 0x13a   : > { %3886 = vmatpush3.bf16.msra.mxu1 %v3861_v0  ;;  %3866 = vmatprep.subr.bf16.mxu0 %v3865_v9 }
 0x13b   : > { %3228 = vmatmul.mubr.f32.gmra.mrb[12].mxu1 %v4691_v40  ;;  %3879 = vmatprep.subr.bf16.mxu1 %v3865_v9  ;;  %v345_v40 = vld [vmem:[%s4602_s26 + $0xda] sm:$0xff] }
 0x13c   : > { %3500 = vmatmul.mubr.f32.gmra.mrb[12].mxu0 %v4919_v36  ;;  %3230 = vmatprep.mubr.f32.mxu1 %v4701_v48  ;;  %v346_v48 = vld [vmem:[%s4602_s26 + $0xe2] sm:$0xff] }
 0x13d   : > { %3502 = vmatprep.mubr.f32.mxu0 %v4926_v21  ;;  %3868 = vmatpush3.bf16.msra.mxu0 %v3865_v9 }
 0x13e   : > { %3887 = vmatpush3.bf16.msra.mxu1 %v3865_v9  ;;  %3870 = vmatprep.subr.bf16.mxu0 %v3869_v19 }
 0x13f   : > { %3231 = vmatmul.mubr.f32.gmra.mrb[14].mxu1 %v4707_v50  ;;  %3880 = vmatprep.subr.bf16.mxu1 %v3869_v19  ;;  %v347_v50 = vld [vmem:[%s4602_s26 + $0xea] sm:$0xff]  ;;  %s4266_s26 = sshll.u32 %s4394_s1, 4  ;;  %s4267_s26 = int_to_ptr.vmem [resolvable:$false] %s4266_s26 }
 0x140   : > { %3503 = vmatmul.mubr.f32.gmra.mrb[14].mxu0 %v4929_v29  ;;  %3233 = vmatprep.mubr.f32.mxu1 %v4717_v59  ;;  %s4268_s27 = scalar_lea.vmem %s4267_s26, 6144  ;;  %p4269_p13 = scmp.lt.s32.totalorder %s5142_s29, %s4267_s26 }
 0x141   : > { %3505 = vmatprep.mubr.f32.mxu0 %v4936_v23  ;;  %3872 = vmatpush3.bf16.msra.mxu0 %v3869_v19  ;;  %p4270_p0 = scmp.lt.s32.totalorder %s4268_s27, %s4262_s5 }
 0x142   : > { %3888 = vmatpush3.bf16.msra.mxu1 %v3869_v19 }
 0x143   : > { %3234 = vmatmul.mubr.f32.gmra.mrb[16].mxu1 %v4723_v63  ;;  %p4271_p2 = por %p4270_p0, %p4269_p13 }
 0x144   : > { %3506 = vmatmul.mubr.f32.gmra.mrb[16].mxu0 %v4939_v27  ;;  %3236 = vmatprep.mubr.f32.mxu1 %v4733_v12 }
 0x145   : > { %3508 = vmatprep.mubr.f32.mxu0 %v4947_v43  ;;  %p4272_p5 = pnand %p4271_p2, %p4265_p11 }
 0x147   : > { %3237 = vmatmul.mubr.f32.gmra.mrb[18].mxu1 %v4739_v15 }
 0x148   : > { %3509 = vmatmul.mubr.f32.gmra.mrb[18].mxu0 %v4951_v44  ;;  %3239 = vmatprep.mubr.f32.mxu1 %v4749_v22 }
 0x149   : > { %3511 = vmatprep.mubr.f32.mxu0 %v4957_v37 }
 0x14b   : > { %3240 = vmatmul.mubr.f32.gmra.mrb[20].mxu1 %v4755_v25 }
 0x14c   : > { %3512 = vmatmul.mubr.f32.gmra.mrb[20].mxu0 %v342_v28  ;;  %3242 = vmatprep.mubr.f32.mxu1 %v4765_v31 }
 0x14d   : > { %3514 = vmatprep.mubr.f32.mxu0 %v343_v30 }
 0x14f   : > { %3243 = vmatmul.mubr.f32.gmra.mrb[22].mxu1 %v4771_v33 }
 0x150   : > { %3515 = vmatmul.mubr.f32.gmra.mrb[22].mxu0 %v344_v38  ;;  %3567 = vmatprep.mubr.f32.mxu1 %v4929_v29 }
 0x151   : > { %3549 = vmatprep.mubr.f32.mxu0 %v4869_v2 }
 0x153   : > { %3568 = vmatmul.mubr.f32.vlgmr.msra.gmra.mrb[24].mxu1 %v4936_v23 }
 0x154   : > { %3550 = vmatmul.mubr.f32.vlgmr.msra.gmra.mrb[0].mxu0 %v4876_v11  ;;  %3570 = vmatprep.mubr.f32.mxu1 %v4939_v27 }
 0x155   : > { %3552 = vmatprep.mubr.f32.mxu0 %v4879_v41 }
 0x157   : > { %3571 = vmatmul.mubr.f32.gmra.mrb[26].mxu1 %v4947_v43 }
 0x158   : > { %3553 = vmatmul.mubr.f32.gmra.mrb[2].mxu0 %v4886_v16  ;;  %3573 = vmatprep.mubr.f32.mxu1 %v4951_v44 }
 0x159   : > { %3555 = vmatprep.mubr.f32.mxu0 %v4889_v20 }
 0x15b   : > { %3574 = vmatmul.mubr.f32.gmra.mrb[28].mxu1 %v4957_v37 }
 0x15c   : > { %3556 = vmatmul.mubr.f32.gmra.mrb[4].mxu0 %v4896_v8  ;;  %3576 = vmatprep.mubr.f32.mxu1 %v342_v28 }
 0x15d   : > { %3558 = vmatprep.mubr.f32.mxu0 %v4899_v54 }
 0x15f   : > { %3577 = vmatmul.mubr.f32.gmra.mrb[30].mxu1 %v343_v30 }
 0x160   : > { %3559 = vmatmul.mubr.f32.gmra.mrb[6].mxu0 %v4906_v18  ;;  %3579 = vmatprep.mubr.f32.mxu1 %v344_v38 }
 0x161   : > { %3561 = vmatprep.mubr.f32.mxu0 %v4909_v3 }
 0x163   : > { %3580 = vmatmul.mubr.f32.gmra.mrb[32].mxu1 %v345_v40 }
 0x164   : > { %3562 = vmatmul.mubr.f32.gmra.mrb[8].mxu0 %v4916_v10  ;;  %3582 = vmatprep.mubr.f32.mxu1 %v346_v48 }
 0x165   : > { %3564 = vmatprep.mubr.f32.mxu0 %v4919_v36 }
 0x167   : > { %3583 = vmatmul.mubr.f32.gmra.mrb[34].mxu1 %v347_v50 }
 0x168   : > { %3565 = vmatmul.mubr.f32.gmra.mrb[10].mxu0 %v4926_v21 }
 0x1f6   : > { %v3211_v59 = vpop.f32.mrb[0].mxu1 }
 0x1f7   : > { %v1111_v63 = vpop.f32.mrb[1].mxu1 }
 0x1fa   : > { %v5029_v12 = vpop.f32.mrb[2].mxu1 }
 0x1fb   : > { %v5031_v15 = vpop.f32.mrb[3].mxu1 }
 0x1fe   : > { %v5033_v22 = vpop.f32.mrb[4].mxu1 }
 0x1ff   : > { %v5035_v25 = vpop.f32.mrb[5].mxu1 }
 0x202   : > { %v5037_v31 = vpop.f32.mrb[6].mxu1 }
 0x203   : > { %v5039_v33 = vpop.f32.mrb[7].mxu1 }
 0x206   : > { %v5041_v2 = vpop.f32.mrb[8].mxu1 }
 0x207   : > { %v5043_v11 = vpop.f32.mrb[9].mxu1 }
 0x20a   : > { %v5045_v41 = vpop.f32.mrb[10].mxu1 }
 0x20b   : > { %v5047_v16 = vpop.f32.mrb[11].mxu1 }
 0x20e   : > { %v3229_v20 = vpop.f32.mrb[12].mxu1 }
 0x20f   : > { %v3501_v8 = vpop.f32.mrb[12].mxu0  ;;  %v1171_v54 = vpop.f32.mrb[13].mxu1 }
 0x210   : > { %v3901_v18 = vadd.f32 %v3501_v8, %v3229_v20  ;;  %v2075_v3 = vpop.f32.mrb[13].mxu0 }
 0x211   : > { %v3903_v5 = vadd.f32 %v2075_v3, %v1171_v54 }
 0x212   : > { %v3232_v24 = vpop.f32.mrb[14].mxu1 }
 0x213   : > { %v3504_v6 = vpop.f32.mrb[14].mxu0  ;;  %v1181_v10 = vpop.f32.mrb[15].mxu1 }
 0x214   : > { %v3905_v36 = vadd.f32 %v3504_v6, %v3232_v24  ;;  %v2085_v13 = vpop.f32.mrb[15].mxu0 }
 0x215   : > { %v3907_v21 = vadd.f32 %v2085_v13, %v1181_v10 }
 0x216   : > { %v3235_v29 = vpop.f32.mrb[16].mxu1 }
 0x217   : > { %v3507_v23 = vpop.f32.mrb[16].mxu0  ;;  %v1191_v27 = vpop.f32.mrb[17].mxu1 }
 0x218   : > { %v3909_v32 = vadd.f32 %v3507_v23, %v3235_v29  ;;  %v2095_v43 = vpop.f32.mrb[17].mxu0 }
 0x219   : > { %v5049_v34 = vadd.f32 %v2095_v43, %v1191_v27 }
 0x21a   : > { %v3238_v44 = vpop.f32.mrb[18].mxu1 }
 0x21b   : > { %v3510_v35 = vpop.f32.mrb[18].mxu0  ;;  %v1201_v37 = vpop.f32.mrb[19].mxu1 }
 0x21c   : > { %v5051_v42 = vadd.f32 %v3510_v35, %v3238_v44  ;;  %v2105_v46 = vpop.f32.mrb[19].mxu0 }
 0x21d   : > { %v5053_v47 = vadd.f32 %v2105_v46, %v1201_v37 }
 0x21e   : > { %v3241_v39 = vpop.f32.mrb[20].mxu1 }
 0x21f   : > { %v3513_v26 = vpop.f32.mrb[20].mxu0  ;;  %v1211_v51 = vpop.f32.mrb[21].mxu1 }
 0x220   : > { %v5055_v45 = vadd.f32 %v3513_v26, %v3241_v39  ;;  %v2115_v52 = vpop.f32.mrb[21].mxu0 }
 0x221   : > { %v5057_v53 = vadd.f32 %v2115_v52, %v1211_v51 }
 0x222   : > { %v3244_v49 = vpop.f32.mrb[22].mxu1 }
 0x223   : > { %v3516_v62 = vpop.f32.mrb[22].mxu0  ;;  %v1221_v56 = vpop.f32.mrb[23].mxu1 }
 0x224   : > { %v5060_v4 = vadd.f32 %v3516_v62, %v3244_v49  ;;  %v2125_v58 = vpop.f32.mrb[23].mxu0 }
 0x225   : > { %v5062_v1 = vadd.f32 %v2125_v58, %v1221_v56 }
 0x226   : > { %v3569_v55 = vpop.f32.mrb[24].mxu1 }
 0x227   : > { %v3551_v14 = vpop.f32.mrb[0].mxu0  ;;  %v3902_v0 = vadd.f32 %v3901_v18, %v3569_v55  ;;  %v2301_v7 = vpop.f32.mrb[25].mxu1 }
 0x228   : > { %v3889_v57 = vadd.f32 %v3551_v14, %v3211_v59  ;;  %v2241_v9 = vpop.f32.mrb[1].mxu0  ;;  %v3904_v17 = vadd.f32 %v3903_v5, %v2301_v7 }
 0x229   : > { %v2404_v60 = vadd.f32 %v3902_v0, %v5069_v61  ;;  %v3890_v19 = vadd.f32 %v2241_v9, %v1111_v63 }
 0x22a   : > { %v2392_v28 = vadd.f32 %v3889_v57, %v5069_v61  ;;  %v2403_v30 = vadd.f32 %v3904_v17, %v5069_v61  ;;  %v3572_v38 = vpop.f32.mrb[26].mxu1 }
 0x22b   : > { %v2428_v40 = vmax.f32 %v2404_v60, 0.0  ;;  %v2391_v48 = vadd.f32 %v3890_v19, %v5069_v61  ;;  %v3554_v50 = vpop.f32.mrb[2].mxu0  ;;  %v3906_v20 = vadd.f32 %v3905_v36, %v3572_v38  ;;  %v2311_v8 = vpop.f32.mrb[27].mxu1 }
 0x22c   : > { %v2416_v54 = vmax.f32 %v2392_v28, 0.0  ;;  %v2427_v18 = vmax.f32 %v2403_v30, 0.0  ;;  %v3891_v59 = vadd.f32 %v3554_v50, %v5029_v12  ;;  %v2251_v3 = vpop.f32.mrb[3].mxu0  ;;  %v3908_v5 = vadd.f32 %v3907_v21, %v2311_v8 }
 0x22d   : > { %2452 = vst [vmem:[%s5076_s7 + $0x68] sm:$0xff] %v2428_v40  ;;  %v2415_v63 = vmax.f32 %v2391_v48, 0.0  ;;  %v2406_v24 = vadd.f32 %v3906_v20, %v5069_v61  ;;  %v3892_v6 = vadd.f32 %v2251_v3, %v5031_v15 }
 0x22e   : > { %2440 = vst [vmem:[%s5076_s7 + $0x8] sm:$0xff] %v2416_v54  ;;  %2451 = vst [vmem:[%s5076_s7 + $0x60] sm:$0xff] %v2427_v18  ;;  %v2394_v10 = vadd.f32 %v3891_v59, %v5069_v61  ;;  %v2405_v12 = vadd.f32 %v3908_v5, %v5069_v61  ;;  %v3575_v36 = vpop.f32.mrb[28].mxu1 }
 0x22f   : > { %2439 = vst [vmem:[%s5076_s7] sm:$0xff] %v2415_v63  ;;  %v2430_v13 = vmax.f32 %v2406_v24, 0.0  ;;  %v2393_v21 = vadd.f32 %v3892_v6, %v5069_v61  ;;  %v3557_v29 = vpop.f32.mrb[4].mxu0  ;;  %v3910_v23 = vadd.f32 %v3909_v32, %v3575_v36  ;;  %v2321_v27 = vpop.f32.mrb[29].mxu1 }
 0x230   : > { %v2418_v43 = vmax.f32 %v2394_v10, 0.0  ;;  %v2429_v15 = vmax.f32 %v2405_v12, 0.0  ;;  %v3893_v44 = vadd.f32 %v3557_v29, %v5033_v22  ;;  %v2261_v35 = vpop.f32.mrb[5].mxu0  ;;  %v3912_v37 = vadd.f32 %v5049_v34, %v2321_v27 }
 0x231   : > { %2454 = vst [vmem:[%s5076_s7 + $0x78] sm:$0xff] %v2430_v13  ;;  %v2417_v46 = vmax.f32 %v2393_v21, 0.0  ;;  %v2408_v39 = vadd.f32 %v3910_v23, %v5069_v61  ;;  %v3894_v26 = vadd.f32 %v2261_v35, %v5035_v25 }
 0x232   : > { %2442 = vst [vmem:[%s5076_s7 + $0x18] sm:$0xff] %v2418_v43  ;;  %2453 = vst [vmem:[%s5076_s7 + $0x70] sm:$0xff] %v2429_v15  ;;  %v2396_v32 = vadd.f32 %v3893_v44, %v5069_v61  ;;  %v2407_v51 = vadd.f32 %v3912_v37, %v5069_v61  ;;  %v3578_v52 = vpop.f32.mrb[30].mxu1 }
 0x233   : > { %2441 = vst [vmem:[%s5076_s7 + $0x10] sm:$0xff] %v2417_v46  ;;  %v2432_v22 = vmax.f32 %v2408_v39, 0.0  ;;  %v2395_v34 = vadd.f32 %v3894_v26, %v5069_v61  ;;  %v3560_v49 = vpop.f32.mrb[6].mxu0  ;;  %v3914_v62 = vadd.f32 %v5051_v42, %v3578_v52  ;;  %v2331_v56 = vpop.f32.mrb[31].mxu1 }
 0x234   : > { %v2420_v25 = vmax.f32 %v2396_v32, 0.0  ;;  %v2431_v58 = vmax.f32 %v2407_v51, 0.0  ;;  %v3895_v55 = vadd.f32 %v3560_v49, %v5037_v31  ;;  %v2271_v14 = vpop.f32.mrb[7].mxu0  ;;  %v3916_v0 = vadd.f32 %v5053_v47, %v2331_v56 }
 0x235   : > { %2456 = vst [vmem:[%s5076_s7 + $0x88] sm:$0xff] %v2432_v22  ;;  %v2419_v7 = vmax.f32 %v2395_v34, 0.0  ;;  %v2410_v57 = vadd.f32 %v3914_v62, %v5069_v61  ;;  %v3896_v9 = vadd.f32 %v2271_v14, %v5039_v33 }
 0x236   : > { %2444 = vst [vmem:[%s5076_s7 + $0x28] sm:$0xff] %v2420_v25  ;;  %2455 = vst [vmem:[%s5076_s7 + $0x80] sm:$0xff] %v2431_v58  ;;  %v2398_v42 = vadd.f32 %v3895_v55, %v5069_v61  ;;  %v2409_v17 = vadd.f32 %v3916_v0, %v5069_v61  ;;  %v3581_v60 = vpop.f32.mrb[32].mxu1 }
 0x237   : > { %2443 = vst [vmem:[%s5076_s7 + $0x20] sm:$0xff] %v2419_v7  ;;  %v2434_v31 = vmax.f32 %v2410_v57, 0.0  ;;  %v2397_v47 = vadd.f32 %v3896_v9, %v5069_v61  ;;  %v3563_v19 = vpop.f32.mrb[8].mxu0  ;;  %v3918_v28 = vadd.f32 %v5055_v45, %v3581_v60  ;;  %v2341_v33 = vpop.f32.mrb[33].mxu1 }
 0x238   : > { %v2422_v30 = vmax.f32 %v2398_v42, 0.0  ;;  %v2433_v38 = vmax.f32 %v2409_v17, 0.0  ;;  %v3897_v40 = vadd.f32 %v3563_v19, %v5041_v2  ;;  %v2281_v48 = vpop.f32.mrb[9].mxu0  ;;  %v3920_v50 = vadd.f32 %v5057_v53, %v2341_v33 }
 0x239   : > { %2458 = vst [vmem:[%s5076_s7 + $0x98] sm:$0xff] %v2434_v31  ;;  %v2421_v20 = vmax.f32 %v2397_v47, 0.0  ;;  %v2412_v8 = vadd.f32 %v3918_v28, %v5069_v61  ;;  %v3898_v54 = vadd.f32 %v2281_v48, %v5043_v11 }
 0x23a   : > { %2446 = vst [vmem:[%s5076_s7 + $0x38] sm:$0xff] %v2422_v30  ;;  %2457 = vst [vmem:[%s5076_s7 + $0x90] sm:$0xff] %v2433_v38  ;;  %v2400_v45 = vadd.f32 %v3897_v40, %v5069_v61  ;;  %v2411_v18 = vadd.f32 %v3920_v50, %v5069_v61  ;;  %v3584_v59 = vpop.f32.mrb[34].mxu1 }
 0x23b   : > { %2445 = vst [vmem:[%s5076_s7 + $0x30] sm:$0xff] %v2421_v20  ;;  %v2436_v2 = vmax.f32 %v2412_v8, 0.0  ;;  %v2399_v53 = vadd.f32 %v3898_v54, %v5069_v61  ;;  %v3566_v3 = vpop.f32.mrb[10].mxu0  ;;  %v3922_v5 = vadd.f32 %v5060_v4, %v3584_v59  ;;  %v2351_v11 = vpop.f32.mrb[35].mxu1 }
 0x23c   : > { %v2424_v63 = vmax.f32 %v2400_v45, 0.0  ;;  %v2435_v24 = vmax.f32 %v2411_v18, 0.0  ;;  %v3899_v6 = vadd.f32 %v3566_v3, %v5045_v41  ;;  %v2291_v10 = vpop.f32.mrb[11].mxu0  ;;  %v3924_v12 = vadd.f32 %v5062_v1, %v2351_v11 }
 0x23d   : > { %2460 = vst [vmem:[%s5076_s7 + $0xa8] sm:$0xff] %v2436_v2  ;;  %v2423_v36 = vmax.f32 %v2399_v53, 0.0  ;;  %v2414_v13 = vadd.f32 %v3922_v5, %v5069_v61  ;;  %v3900_v21 = vadd.f32 %v2291_v10, %v5047_v16 }
 0x23e   : > { %2448 = vst [vmem:[%s5076_s7 + $0x48] sm:$0xff] %v2424_v63  ;;  %2459 = vst [vmem:[%s5076_s7 + $0xa0] sm:$0xff] %v2435_v24  ;;  %v2402_v41 = vadd.f32 %v3899_v6, %v5069_v61  ;;  %v2413_v4 = vadd.f32 %v3924_v12, %v5069_v61 }
 0x23f   : > { %2447 = vst [vmem:[%s5076_s7 + $0x40] sm:$0xff] %v2423_v36  ;;  %v2438_v1 = vmax.f32 %v2414_v13, 0.0  ;;  %v2401_v29 = vadd.f32 %v3900_v21, %v5069_v61 }
 0x240   : > { %v2426_v23 = vmax.f32 %v2402_v41, 0.0  ;;  %v2437_v27 = vmax.f32 %v2413_v4, 0.0 }
 0x241   : > { %2462 = vst [vmem:[%s5076_s7 + $0xb8] sm:$0xff] %v2438_v1  ;;  %v2425_v16 = vmax.f32 %v2401_v29, 0.0 }
 0x242   : > { %2450 = vst [vmem:[%s5076_s7 + $0x58] sm:$0xff] %v2426_v23  ;;  %2461 = vst [vmem:[%s5076_s7 + $0xb0] sm:$0xff] %v2437_v27 }
 0x243   : > { %2449 = vst [vmem:[%s5076_s7 + $0x50] sm:$0xff] %v2425_v16 }
 0x244   : > { %4275 = shalt.err (!%p4272_p5)
}
 0x245   : > { %s4276_s25 = scalar_lea.hbm %s5140_s11, 3072  ;;  %s4280_s7 = scalar_lea.hbm %s5249_s24, 12288 }
 0x246   : > { %p4277_p8 = scmp.ne.s32.totalorder %s5140_s11, %s4276_s25  ;;  %p4281_p6 = scmp.lt.u32.totalorder %s5140_s11, %s5249_s24 }
 0x247   : > { %p4282_p10 = scmp.lt.u32.totalorder %s4280_s7, %s4276_s25  ;;  %p4284_p4 = scmp.lt.u32.totalorder %s4276_s25, %s5140_s11 }
 0x248   : > { %p4278_p12 = pnand %p4277_p8, %p5250_p7 }
 0x249   : > { %p4283_p3 = por %p4282_p10, %p4281_p6 }
 0x24a   : > { %p4279_p1 = pneg %p4278_p12 }
 0x24b   : > { %p4285_p9 = por %p4284_p4, %p4283_p3 }
 0x24d   : > { %p4286_p11 = pnand %p4285_p9, %p4279_p1 }
 0x24f   : > { %4289 = shalt.err (!%p4286_p11)
}
 0x250   : > { %s4395_s18 = smov 128   ;;  %s4396_s19 = smov 8  }
 0x251   : > { %4092 = dma.vmem_to_hbm [thread:$0]  (%p5250_p7), %s5142_s29, 3072, %s5140_s11, %s5150_s8, %s4395_s18, %s4395_s18, %s4396_s19  }
 0x252 PF: > { %s5251_s15 = sld [smem:[#allocation11_spill]]  ;;  %s5252_s6 = sld [smem:[#allocation13_spill]] }
 0x253   : > { %p4109_p13 = scmp.ge.s32.totalorder %s4388_s22, 2 }
 0x258   : > { %s2495_s5 = sand.u32 1, %s5251_s15   ;;  %p5253_p0 = scmp.ne.s32.totalorder %s5252_s6, 0 }
 0x259   : > { %s2496_s1 = scalar_lea.sflag [#allocation4], %s2495_s5 }
 0x25a   : > { %p4103_p2 = pnand %p4109_p13, %p5253_p0 }
 0x25c   : > { %4343 = dma.done.wait (!%p4103_p2), %s2496_s1, 3072  }
 0x25d   : > { %4345 = vsyncadd (!%p4103_p2), %s2496_s1, 4294964224  ;;  %s20_s22 = sadd.s32 1, %s4388_s22   ;;  %s5254_s29 = sld [smem:[#allocation14_spill]] }
 0x25e   : > { %p17_p5 = scmp.ge.s32.totalorder %s20_s22, 6   ;;  %s5255_s12 = smov %s4352_s13 }
 0x25f   : > { %s5256_s13 = smov %s4356_s14  ;;  %s5257_s14 = smov %s4551_s3 }
 0x260   : > { %s5258_s15 = smov %s4364_s16  ;;  %s5259_s16 = smov %s4368_s17 }
 0x261   : > { %s5260_s17 = smov %s4554_s28  ;;  %s5261_s18 = smov %s4380_s20 }
 0x262   : > { %s5262_s19 = smov %s4384_s21  ;;  %s5263_s20 = smov %s5266_s10 }
 0x263   : > { %s5264_s21 = smov %s5254_s29  ;;  %19 = sbr.rel (!%p17_p5) target bundleno = 13 (0xd), region = 93 }
 0x26a   :  { %2501 = vsyncpa [#allocation3], 1 }
 0x26b   :  { %2503 = vsyncpa [#allocation3 + $0x1], 1 }
 0x26c   :  { %2504 = vsyncpa [#allocation6], 1 }
 0x26d   :  { %2505 = vsyncpa [#allocation4], 1 }
 0x26e   :  { %2507 = vsyncpa [#allocation4 + $0x1], 1 }

// kernel: tpu_custom_call.1
= control target key start
LH: loop header
LB: loop body
LE: loop exit
PB: predicated region body
PF: predicated region fallthrough
CT: control target
= control target key end

     0   :  { %s5185_s0 = inlined_call_operand.hbm [shape: f32[4,248,128], index: 0, kind: input, shape index: {}]   ;;  %s5186_s1 = inlined_call_operand.hbm [shape: f32[3,3,128,128], index: 1, kind: input, shape index: {}]   ;;  %s5187_s2 = inlined_call_operand.vmem [shape: f32[1,128], index: 2, kind: input, shape index: {}]   ;;  %s5188_s3 = inlined_call_operand.hbm [shape: f32[2,384,128], index: 3, kind: output, shape index: {}]  }
   0x1   :  { %5203 = sst [smem:[#allocation16_spill]] %s5186_s1 }
   0x2   :  { %5204 = sst [smem:[#allocation17_spill]] %s5188_s3 }
   0x3   :  { %8 = vsyncpa [#allocation3], 0 }
   0x4   :  { %10 = vsyncpa [#allocation3 + $0x1], 0 }
   0x5   :  { %11 = vsyncpa [#allocation6], 0 }
   0x6   :  { %12 = vsyncpa [#allocation4], 0 }
   0x7   :  { %14 = vsyncpa [#allocation4 + $0x1], 0  ;;  %s4386_s12 = smov 0   ;;  %s4388_s13 = smov 0  }
   0x8   :  { %s4390_s14 = smov 0   ;;  %s4392_s15 = smov 0  }
   0x9   :  { %s4394_s16 = smov 0   ;;  %s4396_s17 = smov 0  }
   0xa   :  { %s4398_s18 = smov 0   ;;  %s4400_s19 = smov 0  }
   0xb   :  { %s4402_s20 = smov 0   ;;  %s4404_s21 = smov 0  }
   0xc   :  { %s4406_s22 = smov 0  }
   0xd LB: > { %5205 = sst [smem:[#allocation11_spill]] %s4317_s12  ;;  %s2566_s23 = sadd.s32 4294967295, %s4357_s22   ;;  %s4357_s22 = sphi %s4406_s22, %s20_s22   ;;  %s4353_s21 = sphi %s4404_s21, %s5241_s21   ;;  %s4349_s20 = sphi %s4402_s20, %s5240_s20   ;;  %s4345_s19 = sphi %s4400_s19, %s5239_s19   ;;  %s4341_s18 = sphi %s4398_s18, %s5231_s18   ;;  %s4337_s17 = sphi %s4396_s17, %s5238_s17   ;;  %s4333_s16 = sphi %s4394_s16, %s5237_s16   ;;  %s4329_s15 = sphi %s4392_s15, %s5236_s15   ;;  %s4325_s14 = sphi %s4390_s14, %s5235_s14   ;;  %s4321_s13 = sphi %s4388_s13, %s5234_s13   ;;  %s4317_s12 = sphi %s4386_s12, %s5233_s12  }
   0xe   : > { %5206 = sst [smem:[#allocation12_spill]] %s4349_s20  ;;  %s2567_s24 = sadd.s32 4294967294, %s4357_s22  }
   0xf   : > { %5207 = sst [smem:[#allocation13_spill]] %s4357_s22  ;;  %p63_p0 = scmp.ne.s32.totalorder %s4333_s16, %s4329_s15 }
  0x10   : > { %p4442_p1 = scmp.eq.s32.totalorder %s2566_s23, 0  ;;  %p142_p2 = scmp.ne.s32.totalorder %s4325_s14, %s4321_s13 }
  0x11   : > { %p143_p3 = scmp.eq.s32.totalorder %s2566_s23, 3  ;;  %p148_p5 = scmp.ne.s32.totalorder %s4321_s13, %s4317_s12 }
  0x12   : > { %s5208_s25 = scalar_select %p4442_p1, 1, 0 }
  0x13   : > { %p4450_p4 = por %p4442_p1, %p63_p0  ;;  %p4456_p6 = por %p143_p3, %p142_p2 }
  0x14   : > { %p149_p7 = scmp.eq.s32.totalorder %s2567_s24, 3  ;;  %p2570_p8 = scmp.ge.s32.totalorder %s4357_s22, 1 }
  0x15   : > { %s5209_s26 = scalar_select %p4450_p4, 1, 0 }
  0x16   : > { %s5210_s27 = scalar_select %p4456_p6, 1, 0 }
  0x17   : > { %p156_p9 = scmp.lt.s32.totalorder %s4357_s22, 5  ;;  %p4462_p10 = por %p149_p7, %p148_p5 }
  0x18   : > { %s4359_s30 = smov [#allocation5]   ;;  %s5215_s1 = sld [smem:[#allocation16_spill]] }
  0x19   : > { %s5211_s28 = scalar_select %p4462_p10, 1, 0 }
  0x1a   : > { %p4466_p11 = pnand %p2570_p8, %p156_p9  ;;  %s170_s4 = sshll.u32 %s4359_s30, 4  ;;  %s171_s4 = int_to_ptr.vmem [resolvable:$true] %s170_s4 }
  0x1b   : > { %5212 = sst [smem:[#allocation14_spill]] %s5211_s28 }
  0x1c   : > { %s5213_s29 = scalar_select %p4466_p11, 1, 0 }
  0x1d   : > { %p4063_p12 = pneg %p4466_p11 }
  0x1e   : > { %s4173_s8 = scalar_lea.hbm %s5215_s1, 18432 }
  0x1f   : > { %p4474_p13 = pnand %p4063_p12, %p4442_p1  ;;  %p4174_p0 = scmp.ne.s32.totalorder %s5215_s1, %s4173_s8 }
  0x20   : > { %p4180_p7 = scmp.lt.u32.totalorder %s4173_s8, %s5215_s1 }
  0x21   : > { %p4175_p2 = pneg %p4474_p13 }
  0x23   : > { %p4176_p3 = pnand %p4175_p2, %p4174_p0 }
  0x25   : > { %p4177_p5 = pneg %p4176_p3 }
  0x27   : > { %p4182_p8 = pnand %p4180_p7, %p4177_p5 }
  0x29   : > { %4185 = shalt.err (!%p4182_p8)
}
  0x2a   : > { %s4186_s23 = scalar_lea.vmem %s171_s4, 18432  ;;  %p4194_p6 = scmp.lt.s32.totalorder %s171_s4, %s171_s4 }
  0x2b   : > { %p4187_p9 = scmp.ne.s32.totalorder %s171_s4, %s4186_s23  ;;  %p4195_p1 = scmp.lt.s32.totalorder %s4186_s23, %s4186_s23 }
  0x2d   : > { %p4189_p12 = pnand %p4187_p9, %p4175_p2  ;;  %p4196_p4 = por %p4195_p1, %p4194_p6 }
  0x2f   : > { %p4190_p10 = pneg %p4189_p12 }
  0x31   : > { %p4197_p11 = pnand %p4196_p4, %p4190_p10 }
  0x33   : > { %4200 = shalt.err (!%p4197_p11)
}
  0x34   : > { %s5194_s24 = smov 128   ;;  %s5195_s30 = smov 8  }
  0x35   : > { %4066 = dma.hbm_to_vmem [thread:$0]  (!%p4474_p13), %s5215_s1, 18432, %s171_s4, [#allocation6], %s5194_s24, %s5194_s24, %s5195_s30  }
  0x36   : > { %s32_s8 = sadd.s32 1, %s4349_s20  ;;  %s35_s9 = sadd.s32 1, %s4353_s21 }
  0x37   : > { %p33_p1 = scmp.ge.s32.totalorder %s32_s8, 2  ;;  %s2568_s10 = sshll.u32 %s4353_s21, 1 }
  0x38   : > { %s44_s11 = sadd.s32 %s4349_s20, %s2568_s10  ;;  %p57_p4 = scmp.ne.s32.totalorder %s4337_s17, %s4333_s16 }
  0x39   : > { %s5243_s8 = smov (%p33_p1, %s32_s8), 0  ;;  %s5245_s9 = smov (!%p33_p1, %s35_s9), %s4353_s21 }
  0x3a   : > { %p58_p6 = scmp.eq.s32.totalorder %s4357_s22, 0  ;;  %p37_p10 = scmp.ge.s32.totalorder %s5245_s9, 2 }
  0x3b   : > { %s50_s5 = sadd.s32 1, %s4337_s17  ;;  %s126_s15 = ssub.s32 %s4349_s20, %s5243_s8 }
  0x3c   : > { %p4508_p11 = por %p58_p6, %p57_p4  ;;  %s5247_s9 = smov (%p37_p10, %s5245_s9), 0 }
  0x3d   : > { %5217 = sst [smem:[#allocation15_spill]] %s5247_s9  ;;  %s132_s23 = sadd.s32 1, %s4325_s14 }
  0x3e   : > { %p4076_p13 = scmp.lt.s32.totalorder %s4357_s22, 4  ;;  %s2569_s6 = sshll.u32 %s5247_s9, 1 }
  0x3f   : > { %s125_s7 = ssub.s32 %s4353_s21, %s5247_s9  ;;  %s46_s10 = sadd.s32 %s2569_s6, %s5243_s8 }
  0x40   : > { %s127_s24 = sor.u32 %s126_s15, %s125_s7  ;;  %s47_s30 = ssub.s32 %s44_s11, %s46_s10 }
  0x41   : > { %p130_p0 = scmp.eq.s32.totalorder %s127_s24, 0  ;;  %p48_p2 = scmp.eq.s32.totalorder %s47_s30, 0 }
  0x42   : > { %s190_s1 = sand.u32 1, %s4337_s17   ;;  %p4531_p3 = pnand %p4076_p13, %p4508_p11 }
  0x43   : > { %s4524_s28 = scalar_select %p130_p0, %s4325_s14, %s132_s23  }
  0x44   : > { %s4527_s12 = scalar_select %p48_p2, %s4337_s17, %s50_s5  }
  0x45   : > { %s4050_s3 = smul.u32 248, %s190_s1  ;;  %s4542_s5 = scalar_lea.sflag [#allocation3], %s190_s1 }
  0x46   : > { %s4051_s22 = smul.u32 3968, %s44_s11  ;;  %p4203_p7 = pneg %p4531_p3 }
  0x47   : > { %s194_s24 = scalar_lea.vmem [#allocation2], %s4050_s3  ;;  %s4206_s11 = scalar_lea.hbm %s5185_s0, 15872 }
  0x48   : > { %s4538_s15 = scalar_lea.hbm %s5185_s0, %s4051_s22  ;;  %s203_s30 = sshll.u32 %s194_s24, 4  ;;  %s4540_s30 = int_to_ptr.vmem [resolvable:$true] %s203_s30 }
  0x49   : > { %s4201_s4 = scalar_lea.hbm %s4538_s15, 3968  ;;  %p4207_p12 = scmp.lt.u32.totalorder %s4538_s15, %s5185_s0 }
  0x4a   : > { %p4202_p5 = scmp.ne.s32.totalorder %s4538_s15, %s4201_s4  ;;  %p4208_p1 = scmp.lt.u32.totalorder %s4206_s11, %s4201_s4 }
  0x4b   : > { %p4210_p6 = scmp.lt.u32.totalorder %s4201_s4, %s4538_s15 }
  0x4c   : > { %p4204_p8 = pnand %p4203_p7, %p4202_p5  ;;  %p4209_p4 = por %p4208_p1, %p4207_p12 }
  0x4e   : > { %p4205_p9 = pneg %p4204_p8  ;;  %p4211_p10 = por %p4210_p6, %p4209_p4 }
  0x50   : > { %p4212_p11 = pnand %p4211_p10, %p4205_p9 }
  0x52   : > { %4215 = shalt.err (!%p4212_p11)
}
  0x53   : > { %s4216_s1 = scalar_lea.vmem %s4540_s30, 3968  ;;  %s4362_s3 = smov [#allocation2]  }
  0x54   : > { %p4217_p13 = scmp.ne.s32.totalorder %s4540_s30, %s4216_s1  ;;  %s4221_s10 = sshll.u32 %s4362_s3, 4  ;;  %s4222_s10 = int_to_ptr.vmem [resolvable:$false] %s4221_s10 }
  0x55   : > { %s4223_s6 = scalar_lea.vmem %s4222_s10, 7936  ;;  %p4224_p5 = scmp.lt.s32.totalorder %s4540_s30, %s4222_s10 }
  0x56   : > { %p4219_p0 = pnand %p4217_p13, %p4203_p7  ;;  %p4225_p8 = scmp.lt.s32.totalorder %s4223_s6, %s4216_s1 }
  0x58   : > { %p4220_p2 = pneg %p4219_p0  ;;  %p4226_p12 = por %p4225_p8, %p4224_p5 }
  0x5a   : > { %p4227_p1 = pnand %p4226_p12, %p4220_p2 }
  0x5c   : > { %4230 = shalt.err (!%p4227_p1)
}
  0x5d   : > { %s5219_s24 = smov 8   ;;  %s5220_s4 = smov 128  }
  0x5e   : > { %4070 = dma.hbm_to_vmem [thread:$0]  (!%p4531_p3), %s4538_s15, 3968, %s4540_s30, %s4542_s5, %s5220_s4, %s5220_s4, %s5219_s24  }
  0x5f   : > { %p5221_p7 = scmp.ne.s32.totalorder %s5213_s29, 0 }
  0x60   : > { %s217_s22 = sand.u32 (!%p5221_p7), 1, %s4333_s16   ;;  %p5222_p9 = scmp.ne.s32.totalorder (!%p5221_p7), %s5209_s26, 0 }
  0x61   : > { %215 = sbr.rel (%p5221_p7) target bundleno = 590 (0x24e), region = 32  ;;  %s218_s11 = scalar_lea.sflag (!%p5221_p7), [#allocation3], %s217_s22 }
  0x62   : > { %s4052_s9 = smul.u32 (!%p5221_p7), 248, %s217_s22 }
  0x64   : > { %s4576_s23 = scalar_lea.vmem (!%p5221_p7), [#allocation2], %s4052_s9 }
  0x68   : > { %4304 = dma.done.wait (%p5222_p9), %s218_s11, 3968  }
  0x69   : > { %4306 = vsyncadd (%p5222_p9), %s218_s11, 4294963328  ;;  %p5223_p4 = scmp.ne.s32.totalorder %s5208_s25, 0 }
  0x6b   : > { %4308 = dma.done.wait (%p5223_p4), [#allocation6], 18432  }
  0x6c   : > { %4310 = vsyncadd (%p5223_p4), [#allocation6], 4294948864  ;;  %v361_v0 = vld [vmem:[#allocation5 + $0x180] sm:$0xff]  ;;  %v362_v1 = vld [vmem:[#allocation5 + $0x188] sm:$0xff]  ;;  %s248_s20 = sand.u32 1, %s4321_s13   ;;  %s2440_s30 = smul.u32 24, %s4341_s18 }
  0x6d   : > { %v1224_v2 = vld [vmem:[#allocation5 + $0x200] sm:$0xff]  ;;  %v3554_v3 = vpack.c.bf16 %v362_v1, %v361_v0  ;;  %v1225_v4 = vld [vmem:[#allocation5 + $0x208] sm:$0xff]  ;;  %v363_v5 = vld [vmem:[#allocation5 + $0x190] sm:$0xff]  ;;  %s4053_s25 = smul.u32 192, %s248_s20  ;;  %s5224_s10 = sld [smem:[#allocation17_spill]] }
  0x6e   : > { %v364_v6 = vld [vmem:[#allocation5 + $0x198] sm:$0xff]  ;;  %v3682_v7 = vpack.c.bf16 %v1225_v4, %v1224_v2  ;;  %v1226_v9 = vld [vmem:[#allocation5 + $0x210] sm:$0xff]  ;;  %v365_v11 = vld [vmem:[#allocation5 + $0x1a0] sm:$0xff]  ;;  %s4054_s5 = smul.u32 48, %s4345_s19  ;;  %s5124_s24 = scalar_lea.sflag [#allocation4], %s248_s20 }
  0x6f   : > { %v3558_v8 = vpack.c.bf16 %v364_v6, %v363_v5  ;;  %v1227_v10 = vld [vmem:[#allocation5 + $0x218] sm:$0xff]  ;;  %3555 = vmatprep.subr.bf16.mxu1 %v3554_v3  ;;  %v366_v13 = vld [vmem:[#allocation5 + $0x1a8] sm:$0xff]  ;;  %v1228_v14 = vld [vmem:[#allocation5 + $0x220] sm:$0xff]  ;;  %s5050_s15 = scalar_lea.vmem [#allocation7], %s4053_s25  ;;  %p5225_p6 = scmp.ne.s32.totalorder %s5210_s27, 0 }
  0x70   : > { %v3686_v12 = vpack.c.bf16 %v1227_v10, %v1226_v9  ;;  %v1229_v15 = vld [vmem:[#allocation5 + $0x228] sm:$0xff]  ;;  %3683 = vmatprep.subr.bf16.mxu0 %v3682_v7  ;;  %3557 = vmatpush3.bf16.msra.mxu1 %v3554_v3  ;;  %v3562_v16 = vpack.c.bf16 %v366_v13, %v365_v11  ;;  %v367_v18 = vld [vmem:[#allocation5 + $0x1b0] sm:$0xff]  ;;  %v368_v19 = vld [vmem:[#allocation5 + $0x1b8] sm:$0xff]  ;;  %s2446_s18 = sadd.s32 %s4054_s5, %s2440_s30  ;;  %s2449_s7 = sshll.u32 %s5050_s15, 4  ;;  %s5116_s7 = int_to_ptr.vmem [resolvable:$true] %s2449_s7 }
  0x71   : > { %3685 = vmatpush3.bf16.msra.mxu0 %v3682_v7  ;;  %3559 = vmatprep.subr.bf16.mxu1 %v3558_v8  ;;  %v3690_v17 = vpack.c.bf16 %v1229_v15, %v1228_v14  ;;  %v1230_v20 = vld [vmem:[#allocation5 + $0x230] sm:$0xff]  ;;  %v1231_v21 = vld [vmem:[#allocation5 + $0x238] sm:$0xff]  ;;  %v3566_v22 = vpack.c.bf16 %v368_v19, %v367_v18  ;;  %v369_v24 = vld [vmem:[#allocation5 + $0x1c0] sm:$0xff]  ;;  %s2579_s19 = sshll.u32 %s2446_s18, 7  ;;  %s4231_s4 = scalar_lea.vmem %s5116_s7, 3072 }
  0x72   : > { %3687 = vmatprep.subr.bf16.mxu0 %v3686_v12  ;;  %v3694_v23 = vpack.c.bf16 %v1231_v21, %v1230_v20  ;;  %v370_v25 = vld [vmem:[#allocation5 + $0x1c8] sm:$0xff]  ;;  %v1232_v27 = vld [vmem:[#allocation5 + $0x240] sm:$0xff]  ;;  %v371_v32 = vld [vmem:[#allocation5 + $0x1d0] sm:$0xff]  ;;  %p4232_p3 = scmp.ne.s32.totalorder %s5116_s7, %s4231_s4  ;;  %s4363_s22 = smov [#allocation7]  }
  0x73   : > { %v4587_v26 = vld [vmem:[%s4576_s23 + $0x18] sm:$0xff]  ;;  %v3570_v30 = vpack.c.bf16 %v370_v25, %v369_v24  ;;  %v372_v33 = vld [vmem:[#allocation5 + $0x1d8] sm:$0xff]  ;;  %v1234_v34 = vld [vmem:[#allocation5 + $0x250] sm:$0xff]  ;;  %s5114_s6 = scalar_lea.hbm %s5224_s10, %s2579_s19  ;;  %s4235_s9 = sshll.u32 %s4363_s22, 4  ;;  %s4236_s9 = int_to_ptr.vmem [resolvable:$false] %s4235_s9 }
  0x74   : > { %3561 = vmatpush3.bf16.msra.mxu1 %v3558_v8  ;;  %v1233_v28 = vld [vmem:[#allocation5 + $0x248] sm:$0xff]  ;;  %2974 = vmatprep.mubr.f32.mxu1 %v4587_v26  ;;  %v1235_v35 = vld [vmem:[#allocation5 + $0x258] sm:$0xff]  ;;  %v3574_v36 = vpack.c.bf16 %v372_v33, %v371_v32  ;;  %v373_v38 = vld [vmem:[#allocation5 + $0x1e0] sm:$0xff]  ;;  %p4233_p10 = pnand %p4232_p3, %p5225_p6  ;;  %s4237_s11 = scalar_lea.vmem %s4236_s9, 6144 }
  0x75   : > { %3689 = vmatpush3.bf16.msra.mxu0 %v3686_v12  ;;  %3563 = vmatprep.subr.bf16.mxu1 %v3562_v16  ;;  %v260_v29 = vld [vmem:[%s4576_s23 + $0x19] sm:$0xff]  ;;  %v3698_v31 = vpack.c.bf16 %v1233_v28, %v1232_v27  ;;  %v3702_v37 = vpack.c.bf16 %v1235_v35, %v1234_v34  ;;  %v376_v45 = vld [vmem:[#allocation5 + $0x1f8] sm:$0xff]  ;;  %p4238_p13 = scmp.lt.s32.totalorder %s5116_s7, %s4236_s9  ;;  %p4239_p0 = scmp.lt.s32.totalorder %s4237_s11, %s4231_s4 }
  0x76   : > { %3691 = vmatprep.subr.bf16.mxu0 %v3690_v17  ;;  %3246 = vmatprep.mubr.f32.mxu0 %v260_v29  ;;  %v374_v39 = vld [vmem:[#allocation5 + $0x1e8] sm:$0xff]  ;;  %v1236_v40 = vld [vmem:[#allocation5 + $0x260] sm:$0xff]  ;;  %v375_v44 = vld [vmem:[#allocation5 + $0x1f0] sm:$0xff]  ;;  %p4234_p11 = pneg %p4233_p10 }
  0x77   : > { %v1237_v41 = vld [vmem:[#allocation5 + $0x268] sm:$0xff]  ;;  %v3578_v42 = vpack.c.bf16 %v374_v39, %v373_v38  ;;  %v1238_v46 = vld [vmem:[#allocation5 + $0x270] sm:$0xff]  ;;  %v1239_v47 = vld [vmem:[#allocation5 + $0x278] sm:$0xff]  ;;  %v3582_v48 = vpack.c.bf16 %v376_v45, %v375_v44  ;;  %p4240_p2 = por %p4239_p0, %p4238_p13 }
  0x78   : > { %3565 = vmatpush3.bf16.msra.mxu1 %v3562_v16  ;;  %v3706_v43 = vpack.c.bf16 %v1237_v41, %v1236_v40  ;;  %v3710_v49 = vpack.c.bf16 %v1239_v47, %v1238_v46  ;;  %v341_v50 = vld [vmem:[#allocation5] sm:$0xff]  ;;  %v342_v51 = vld [vmem:[#allocation5 + $0x8] sm:$0xff]  ;;  %v343_v56 = vld [vmem:[#allocation5 + $0x10] sm:$0xff] }
  0x79   : > { %3693 = vmatpush3.bf16.msra.mxu0 %v3690_v17  ;;  %3567 = vmatprep.subr.bf16.mxu1 %v3566_v22  ;;  %v1450_v52 = vld [vmem:[#allocation5 + $0x380] sm:$0xff]  ;;  %v1451_v53 = vld [vmem:[#allocation5 + $0x388] sm:$0xff]  ;;  %v3586_v54 = vpack.c.bf16 %v342_v51, %v341_v50  ;;  %v344_v57 = vld [vmem:[#allocation5 + $0x18] sm:$0xff]  ;;  %p4241_p5 = pnand %p4240_p2, %p4234_p11 }
  0x7a   : > { %3695 = vmatprep.subr.bf16.mxu0 %v3694_v23  ;;  %v3714_v55 = vpack.c.bf16 %v1451_v53, %v1450_v52  ;;  %v4592_v58 = vld [vmem:[%s4576_s23 + $0x20] sm:$0xff]  ;;  %v1453_v60 = vld [vmem:[#allocation5 + $0x398] sm:$0xff]  ;;  %v3590_v63 = vpack.c.bf16 %v344_v57, %v343_v56  ;;  %v345_v2 = vld [vmem:[#allocation5 + $0x20] sm:$0xff] }
  0x7b   : > { %v1452_v59 = vld [vmem:[#allocation5 + $0x390] sm:$0xff]  ;;  %v346_v3 = vld [vmem:[#allocation5 + $0x28] sm:$0xff]  ;;  %v4606_v4 = vld [vmem:[%s4576_s23 + $0x30] sm:$0xff] }
  0x7c   : > { %3569 = vmatpush3.bf16.msra.mxu1 %v3566_v22  ;;  %v4595_v61 = vld [vmem:[%s4576_s23 + $0x21] sm:$0xff]  ;;  %v4602_v0 = vld [vmem:[%s4576_s23 + $0x29] sm:$0xff]  ;;  %v3718_v1 = vpack.c.bf16 %v1453_v60, %v1452_v59  ;;  %v4610_v7 = vld [vmem:[%s4576_s23 + $0x31] sm:$0xff]  ;;  %v3594_v10 = vpack.c.bf16 %v346_v3, %v345_v2 }
  0x7d   : > { %3697 = vmatpush3.bf16.msra.mxu0 %v3694_v23  ;;  %3571 = vmatprep.subr.bf16.mxu1 %v3570_v30  ;;  %v4598_v62 = vld [vmem:[%s4576_s23 + $0x28] sm:$0xff]  ;;  %v1454_v5 = vld [vmem:[#allocation5 + $0x3a0] sm:$0xff]  ;;  %v1455_v6 = vld [vmem:[#allocation5 + $0x3a8] sm:$0xff] }
  0x7e   : > { %3699 = vmatprep.subr.bf16.mxu0 %v3698_v31  ;;  %v4613_v8 = vld [vmem:[%s4576_s23 + $0x38] sm:$0xff]  ;;  %v3722_v11 = vpack.c.bf16 %v1455_v6, %v1454_v5  ;;  %v347_v12 = vld [vmem:[#allocation5 + $0x30] sm:$0xff]  ;;  %v348_v13 = vld [vmem:[#allocation5 + $0x38] sm:$0xff] }
  0x7f   : > { %v4617_v9 = vld [vmem:[%s4576_s23 + $0x39] sm:$0xff]  ;;  %v1457_v16 = vld [vmem:[#allocation5 + $0x3b8] sm:$0xff]  ;;  %v3598_v20 = vpack.c.bf16 %v348_v13, %v347_v12 }
  0x80   : > { %3573 = vmatpush3.bf16.msra.mxu1 %v3570_v30  ;;  %v4623_v14 = vld [vmem:[%s4576_s23 + $0x40] sm:$0xff]  ;;  %v4630_v18 = vld [vmem:[%s4576_s23 + $0x48] sm:$0xff]  ;;  %v349_v22 = vld [vmem:[#allocation5 + $0x40] sm:$0xff] }
  0x81   : > { %3701 = vmatpush3.bf16.msra.mxu0 %v3698_v31  ;;  %3575 = vmatprep.subr.bf16.mxu1 %v3574_v36  ;;  %v1456_v15 = vld [vmem:[#allocation5 + $0x3b0] sm:$0xff]  ;;  %v350_v23 = vld [vmem:[#allocation5 + $0x48] sm:$0xff]  ;;  %v4639_v24 = vld [vmem:[%s4576_s23 + $0x50] sm:$0xff] }
  0x82   : > { %3703 = vmatprep.subr.bf16.mxu0 %v3702_v37  ;;  %v4627_v17 = vld [vmem:[%s4576_s23 + $0x41] sm:$0xff]  ;;  %v4633_v19 = vld [vmem:[%s4576_s23 + $0x49] sm:$0xff]  ;;  %v3726_v21 = vpack.c.bf16 %v1457_v16, %v1456_v15  ;;  %v4643_v28 = vld [vmem:[%s4576_s23 + $0x51] sm:$0xff]  ;;  %v3602_v31 = vpack.c.bf16 %v350_v23, %v349_v22 }
  0x83   : > { %v1458_v25 = vld [vmem:[#allocation5 + $0x3c0] sm:$0xff]  ;;  %v1459_v27 = vld [vmem:[#allocation5 + $0x3c8] sm:$0xff]  ;;  %v351_v33 = vld [vmem:[#allocation5 + $0x50] sm:$0xff] }
  0x84   : > { %3577 = vmatpush3.bf16.msra.mxu1 %v3574_v36  ;;  %v4646_v29 = vld [vmem:[%s4576_s23 + $0x58] sm:$0xff]  ;;  %v3730_v32 = vpack.c.bf16 %v1459_v27, %v1458_v25  ;;  %v352_v34 = vld [vmem:[#allocation5 + $0x58] sm:$0xff]  ;;  %v4655_v35 = vld [vmem:[%s4576_s23 + $0x60] sm:$0xff] }
  0x85   : > { %3705 = vmatpush3.bf16.msra.mxu0 %v3702_v37  ;;  %3579 = vmatprep.subr.bf16.mxu1 %v3578_v42  ;;  %v4649_v30 = vld [vmem:[%s4576_s23 + $0x59] sm:$0xff]  ;;  %v1461_v37 = vld [vmem:[#allocation5 + $0x3d8] sm:$0xff]  ;;  %v3606_v41 = vpack.c.bf16 %v352_v34, %v351_v33 }
  0x86   : > { %3707 = vmatprep.subr.bf16.mxu0 %v3706_v43  ;;  %v1460_v36 = vld [vmem:[#allocation5 + $0x3d0] sm:$0xff]  ;;  %v354_v44 = vld [vmem:[#allocation5 + $0x68] sm:$0xff]  ;;  %v4671_v45 = vld [vmem:[%s4576_s23 + $0x70] sm:$0xff] }
  0x87   : > { %v4659_v38 = vld [vmem:[%s4576_s23 + $0x61] sm:$0xff]  ;;  %v4665_v40 = vld [vmem:[%s4576_s23 + $0x69] sm:$0xff]  ;;  %v4681_v50 = vld [vmem:[%s4576_s23 + $0x79] sm:$0xff] }
  0x88   : > { %3581 = vmatpush3.bf16.msra.mxu1 %v3578_v42  ;;  %v4662_v39 = vld [vmem:[%s4576_s23 + $0x68] sm:$0xff]  ;;  %v3734_v42 = vpack.c.bf16 %v1461_v37, %v1460_v36  ;;  %v1462_v46 = vld [vmem:[#allocation5 + $0x3e0] sm:$0xff]  ;;  %v1463_v47 = vld [vmem:[#allocation5 + $0x3e8] sm:$0xff] }
  0x89   : > { %3709 = vmatpush3.bf16.msra.mxu0 %v3706_v43  ;;  %3583 = vmatprep.subr.bf16.mxu1 %v3582_v48  ;;  %v353_v43 = vld [vmem:[#allocation5 + $0x60] sm:$0xff]  ;;  %v3738_v52 = vpack.c.bf16 %v1463_v47, %v1462_v46  ;;  %v355_v53 = vld [vmem:[#allocation5 + $0x70] sm:$0xff]  ;;  %v1465_v57 = vld [vmem:[#allocation5 + $0x3f8] sm:$0xff] }
  0x8a   : > { %3711 = vmatprep.subr.bf16.mxu0 %v3710_v49  ;;  %v3610_v51 = vpack.c.bf16 %v354_v44, %v353_v43  ;;  %v1464_v56 = vld [vmem:[#allocation5 + $0x3f0] sm:$0xff]  ;;  %v772_v3 = vld [vmem:[#allocation5 + $0x300] sm:$0xff]  ;;  %v773_v5 = vld [vmem:[#allocation5 + $0x308] sm:$0xff] }
  0x8b   : > { %v4691_v59 = vld [vmem:[%s4576_s23 + $0x81] sm:$0xff]  ;;  %v3742_v2 = vpack.c.bf16 %v1465_v57, %v1464_v56  ;;  %v4703_v6 = vld [vmem:[%s4576_s23 + $0x90] sm:$0xff]  ;;  %v4710_v13 = vld [vmem:[%s4576_s23 + $0x98] sm:$0xff]  ;;  %v3618_v16 = vpack.c.bf16 %v773_v5, %v772_v3 }
  0x8c   : > { %3585 = vmatpush3.bf16.msra.mxu1 %v3582_v48  ;;  %v4675_v48 = vld [vmem:[%s4576_s23 + $0x71] sm:$0xff]  ;;  %v4694_v60 = vld [vmem:[%s4576_s23 + $0x88] sm:$0xff]  ;;  %v4713_v15 = vld [vmem:[%s4576_s23 + $0x99] sm:$0xff] }
  0x8d   : > { %3713 = vmatpush3.bf16.msra.mxu0 %v3710_v49  ;;  %3587 = vmatprep.subr.bf16.mxu1 %v3586_v54  ;;  %v4678_v49 = vld [vmem:[%s4576_s23 + $0x78] sm:$0xff]  ;;  %v4723_v22 = vld [vmem:[%s4576_s23 + $0xa1] sm:$0xff]  ;;  %v4729_v25 = vld [vmem:[%s4576_s23 + $0xa9] sm:$0xff] }
  0x8e   : > { %3715 = vmatprep.subr.bf16.mxu0 %v3714_v55  ;;  %v4707_v12 = vld [vmem:[%s4576_s23 + $0x91] sm:$0xff]  ;;  %v4726_v23 = vld [vmem:[%s4576_s23 + $0xa8] sm:$0xff]  ;;  %v4745_v33 = vld [vmem:[%s4576_s23 + $0xb9] sm:$0xff] }
  0x8f   : > { %2975 = vmatmul.mubr.f32.vlgmr.msra.gmra.mrb[0].mxu1 %v4592_v58  ;;  %v4735_v27 = vld [vmem:[%s4576_s23 + $0xb0] sm:$0xff]  ;;  %v4751_v34 = vld [vmem:[%s4576_s23 + $0xc0] sm:$0xff]  ;;  %v4758_v37 = vld [vmem:[%s4576_s23 + $0xc8] sm:$0xff] }
  0x90   : > { %3247 = vmatmul.mubr.f32.vlgmr.msra.gmra.mrb[0].mxu0 %v4595_v61  ;;  %3589 = vmatpush3.bf16.msra.mxu1 %v3586_v54  ;;  %v356_v54 = vld [vmem:[#allocation5 + $0x78] sm:$0xff]  ;;  %v317_v44 = vld [vmem:[%s4576_s23] sm:$0xff]  ;;  %v1680_v3 = vld [vmem:[#allocation5 + $0x120] sm:$0xff] }
  0x91   : > { %3717 = vmatpush3.bf16.msra.mxu0 %v3714_v55  ;;  %2977 = vmatprep.mubr.f32.mxu1 %v4598_v62  ;;  %v4687_v55 = vld [vmem:[%s4576_s23 + $0x80] sm:$0xff]  ;;  %v4771_v43 = vld [vmem:[%s4576_s23 + $0xd1] sm:$0xff] }
  0x92   : > { %3249 = vmatprep.mubr.f32.mxu0 %v4602_v0  ;;  %3591 = vmatprep.subr.bf16.mxu1 %v3590_v63  ;;  %v4755_v36 = vld [vmem:[%s4576_s23 + $0xc1] sm:$0xff] }
  0x93   : > { %2978 = vmatmul.mubr.f32.gmra.mrb[2].mxu1 %v4606_v4  ;;  %3719 = vmatprep.subr.bf16.mxu0 %v3718_v1  ;;  %v774_v46 = vld [vmem:[#allocation5 + $0x310] sm:$0xff]  ;;  %v775_v47 = vld [vmem:[#allocation5 + $0x318] sm:$0xff]  ;;  %v1681_v5 = vld [vmem:[#allocation5 + $0x128] sm:$0xff] }
  0x94   : > { %3250 = vmatmul.mubr.f32.gmra.mrb[2].mxu0 %v4610_v7  ;;  %2980 = vmatprep.mubr.f32.mxu1 %v4613_v8  ;;  %v3622_v56 = vpack.c.bf16 %v775_v47, %v774_v46  ;;  %v779_v46 = vld [vmem:[#allocation5 + $0x338] sm:$0xff]  ;;  %v1682_v47 = vld [vmem:[#allocation5 + $0x130] sm:$0xff] }
  0x95   : > { %3593 = vmatpush3.bf16.msra.mxu1 %v3590_v63  ;;  %3252 = vmatprep.mubr.f32.mxu0 %v4617_v9  ;;  %v4697_v63 = vld [vmem:[%s4576_s23 + $0x89] sm:$0xff] }
  0x96   : > { %3721 = vmatpush3.bf16.msra.mxu0 %v3718_v1  ;;  %3595 = vmatprep.subr.bf16.mxu1 %v3594_v10  ;;  %v3614_v1 = vpack.c.bf16 %v356_v54, %v355_v53  ;;  %v1679_v53 = vld [vmem:[#allocation5 + $0x118] sm:$0xff] }
  0x97   : > { %2981 = vmatmul.mubr.f32.gmra.mrb[4].mxu1 %v4623_v14  ;;  %3723 = vmatprep.subr.bf16.mxu0 %v3722_v11  ;;  %v319_v54 = vld [vmem:[%s4576_s23 + $0x10] sm:$0xff] }
  0x98   : > { %3253 = vmatmul.mubr.f32.gmra.mrb[4].mxu0 %v4627_v17  ;;  %2983 = vmatprep.mubr.f32.mxu1 %v4630_v18 }
  0x99   : > { %3255 = vmatprep.mubr.f32.mxu0 %v4633_v19  ;;  %3597 = vmatpush3.bf16.msra.mxu1 %v3594_v10  ;;  %v1676_v10 = vld [vmem:[#allocation5 + $0x100] sm:$0xff] }
  0x9a   : > { %3725 = vmatpush3.bf16.msra.mxu0 %v3722_v11  ;;  %3599 = vmatprep.subr.bf16.mxu1 %v3598_v20  ;;  %v1677_v11 = vld [vmem:[#allocation5 + $0x108] sm:$0xff] }
  0x9b   : > { %2984 = vmatmul.mubr.f32.gmra.mrb[6].mxu1 %v4639_v24  ;;  %3727 = vmatprep.subr.bf16.mxu0 %v3726_v21 }
  0x9c   : > { %3256 = vmatmul.mubr.f32.gmra.mrb[6].mxu0 %v4643_v28  ;;  %2986 = vmatprep.mubr.f32.mxu1 %v4646_v29 }
  0x9d   : > { %3258 = vmatprep.mubr.f32.mxu0 %v4649_v30  ;;  %3601 = vmatpush3.bf16.msra.mxu1 %v3598_v20  ;;  %v3746_v20 = vpack.c.bf16 %v1677_v11, %v1676_v10  ;;  %v3754_v11 = vpack.c.bf16 %v1681_v5, %v1680_v3 }
  0x9e   : > { %3729 = vmatpush3.bf16.msra.mxu0 %v3726_v21  ;;  %3603 = vmatprep.subr.bf16.mxu1 %v3602_v31  ;;  %v4719_v21 = vld [vmem:[%s4576_s23 + $0xa0] sm:$0xff] }
  0x9f   : > { %2987 = vmatmul.mubr.f32.gmra.mrb[8].mxu1 %v4655_v35  ;;  %3731 = vmatprep.subr.bf16.mxu0 %v3730_v32 }
  0xa0   : > { %3259 = vmatmul.mubr.f32.gmra.mrb[8].mxu0 %v4659_v38  ;;  %2989 = vmatprep.mubr.f32.mxu1 %v4662_v39 }
  0xa1   : > { %3261 = vmatprep.mubr.f32.mxu0 %v4665_v40  ;;  %3605 = vmatpush3.bf16.msra.mxu1 %v3602_v31  ;;  %v4739_v31 = vld [vmem:[%s4576_s23 + $0xb1] sm:$0xff] }
  0xa2   : > { %3733 = vmatpush3.bf16.msra.mxu0 %v3730_v32  ;;  %3607 = vmatprep.subr.bf16.mxu1 %v3606_v41  ;;  %v4742_v32 = vld [vmem:[%s4576_s23 + $0xb8] sm:$0xff] }
  0xa3   : > { %2990 = vmatmul.mubr.f32.gmra.mrb[10].mxu1 %v4671_v45  ;;  %3735 = vmatprep.subr.bf16.mxu0 %v3734_v42 }
  0xa4   : > { %3262 = vmatmul.mubr.f32.gmra.mrb[10].mxu0 %v4675_v48  ;;  %2992 = vmatprep.mubr.f32.mxu1 %v4678_v49 }
  0xa5   : > { %3264 = vmatprep.mubr.f32.mxu0 %v4681_v50  ;;  %3609 = vmatpush3.bf16.msra.mxu1 %v3606_v41  ;;  %v4761_v41 = vld [vmem:[%s4576_s23 + $0xc9] sm:$0xff] }
  0xa6   : > { %3737 = vmatpush3.bf16.msra.mxu0 %v3734_v42  ;;  %3611 = vmatprep.subr.bf16.mxu1 %v3610_v51  ;;  %v4767_v42 = vld [vmem:[%s4576_s23 + $0xd0] sm:$0xff] }
  0xa7   : > { %2993 = vmatmul.mubr.f32.gmra.mrb[12].mxu1 %v4687_v55  ;;  %3739 = vmatprep.subr.bf16.mxu0 %v3738_v52 }
  0xa8   : > { %3265 = vmatmul.mubr.f32.gmra.mrb[12].mxu0 %v4691_v59  ;;  %2995 = vmatprep.mubr.f32.mxu1 %v4694_v60 }
  0xa9   : > { %3267 = vmatprep.mubr.f32.mxu0 %v4697_v63  ;;  %3613 = vmatpush3.bf16.msra.mxu1 %v3610_v51  ;;  %v318_v51 = vld [vmem:[%s4576_s23 + $0x8] sm:$0xff] }
  0xaa   : > { %3741 = vmatpush3.bf16.msra.mxu0 %v3738_v52  ;;  %3615 = vmatprep.subr.bf16.mxu1 %v3614_v1  ;;  %v1678_v52 = vld [vmem:[#allocation5 + $0x110] sm:$0xff] }
  0xab   : > { %2996 = vmatmul.mubr.f32.gmra.mrb[14].mxu1 %v4703_v6  ;;  %3743 = vmatprep.subr.bf16.mxu0 %v3742_v2  ;;  %v3750_v57 = vpack.c.bf16 %v1679_v53, %v1678_v52  ;;  %v781_v52 = vld [vmem:[#allocation5 + $0x348] sm:$0xff]  ;;  %v1684_v53 = vld [vmem:[#allocation5 + $0x140] sm:$0xff] }
  0xac   : > { %3268 = vmatmul.mubr.f32.gmra.mrb[14].mxu0 %v4707_v12  ;;  %2998 = vmatprep.mubr.f32.mxu1 %v4710_v13 }
  0xad   : > { %3270 = vmatprep.mubr.f32.mxu0 %v4713_v15  ;;  %3617 = vmatpush3.bf16.msra.mxu1 %v3614_v1  ;;  %v776_v1 = vld [vmem:[#allocation5 + $0x320] sm:$0xff] }
  0xae   : > { %3745 = vmatpush3.bf16.msra.mxu0 %v3742_v2  ;;  %3619 = vmatprep.subr.bf16.mxu1 %v3618_v16  ;;  %v777_v2 = vld [vmem:[#allocation5 + $0x328] sm:$0xff] }
  0xaf   : > { %2999 = vmatmul.mubr.f32.gmra.mrb[16].mxu1 %v4719_v21  ;;  %3747 = vmatprep.subr.bf16.mxu0 %v3746_v20  ;;  %v3626_v10 = vpack.c.bf16 %v777_v2, %v776_v1  ;;  %v1686_v1 = vld [vmem:[#allocation5 + $0x150] sm:$0xff]  ;;  %v1687_v2 = vld [vmem:[#allocation5 + $0x158] sm:$0xff] }
  0xb0   : > { %3271 = vmatmul.mubr.f32.gmra.mrb[16].mxu0 %v4723_v22  ;;  %3001 = vmatprep.mubr.f32.mxu1 %v4726_v23  ;;  %v3766_v5 = vpack.c.bf16 %v1687_v2, %v1686_v1 }
  0xb1   : > { %3273 = vmatprep.mubr.f32.mxu0 %v4729_v25 }
  0xb3   : > { %3002 = vmatmul.mubr.f32.gmra.mrb[18].mxu1 %v4735_v27 }
  0xb4   : > { %3274 = vmatmul.mubr.f32.gmra.mrb[18].mxu0 %v4739_v31  ;;  %3004 = vmatprep.mubr.f32.mxu1 %v4742_v32 }
  0xb5   : > { %3276 = vmatprep.mubr.f32.mxu0 %v4745_v33 }
  0xb7   : > { %3005 = vmatmul.mubr.f32.gmra.mrb[20].mxu1 %v4751_v34 }
  0xb8   : > { %3277 = vmatmul.mubr.f32.gmra.mrb[20].mxu0 %v4755_v36  ;;  %3007 = vmatprep.mubr.f32.mxu1 %v4758_v37 }
  0xb9   : > { %3279 = vmatprep.mubr.f32.mxu0 %v4761_v41 }
  0xbb   : > { %3008 = vmatmul.mubr.f32.gmra.mrb[22].mxu1 %v4767_v42 }
  0xbc   : > { %3280 = vmatmul.mubr.f32.gmra.mrb[22].mxu0 %v4771_v43  ;;  %3042 = vmatprep.mubr.f32.mxu1 %v317_v44  ;;  %v778_v44 = vld [vmem:[#allocation5 + $0x330] sm:$0xff] }
  0xbd   : > { %3314 = vmatprep.mubr.f32.mxu0 %v4610_v7 }
  0xbf   : > { %3043 = vmatmul.mubr.f32.vlgmr.msra.gmra.mrb[0].mxu1 %v318_v51  ;;  %v780_v51 = vld [vmem:[#allocation5 + $0x340] sm:$0xff] }
  0xc0   : > { %3315 = vmatmul.mubr.f32.vlgmr.msra.gmra.mrb[0].mxu0 %v4617_v9  ;;  %3621 = vmatpush3.bf16.msra.mxu1 %v3618_v16  ;;  %v1683_v16 = vld [vmem:[#allocation5 + $0x138] sm:$0xff] }
  0xc1   : > { %3749 = vmatpush3.bf16.msra.mxu0 %v3746_v20  ;;  %3045 = vmatprep.mubr.f32.mxu1 %v319_v54  ;;  %v3630_v20 = vpack.c.bf16 %v779_v46, %v778_v44  ;;  %v3634_v54 = vpack.c.bf16 %v781_v52, %v780_v51  ;;  %v1688_v44 = vld [vmem:[#allocation5 + $0x160] sm:$0xff]  ;;  %v1689_v46 = vld [vmem:[#allocation5 + $0x168] sm:$0xff]  ;;  %v1690_v51 = vld [vmem:[#allocation5 + $0x170] sm:$0xff] }
  0xc2   : > { %3317 = vmatprep.mubr.f32.mxu0 %v4627_v17  ;;  %3623 = vmatprep.subr.bf16.mxu1 %v3622_v56  ;;  %v1691_v52 = vld [vmem:[#allocation5 + $0x178] sm:$0xff] }
  0xc3   : > { %3046 = vmatmul.mubr.f32.gmra.mrb[2].mxu1 %v4587_v26  ;;  %3751 = vmatprep.subr.bf16.mxu0 %v3750_v57  ;;  %v3758_v26 = vpack.c.bf16 %v1683_v16, %v1682_v47  ;;  %v3770_v16 = vpack.c.bf16 %v1689_v46, %v1688_v44  ;;  %v1905_v44 = vld [vmem:[#allocation5 + $0x298] sm:$0xff] }
  0xc4   : > { %3318 = vmatmul.mubr.f32.gmra.mrb[2].mxu0 %v4633_v19  ;;  %3048 = vmatprep.mubr.f32.mxu1 %v4592_v58  ;;  %v1685_v58 = vld [vmem:[#allocation5 + $0x148] sm:$0xff]  ;;  %v288_v46 = vld [vmem:[%s4576_s23 + $0xa] sm:$0xff] }
  0xc5   : > { %3625 = vmatpush3.bf16.msra.mxu1 %v3622_v56  ;;  %3320 = vmatprep.mubr.f32.mxu0 %v4643_v28  ;;  %v782_v56 = vld [vmem:[#allocation5 + $0x350] sm:$0xff] }
  0xc6   : > { %3753 = vmatpush3.bf16.msra.mxu0 %v3750_v57  ;;  %3627 = vmatprep.subr.bf16.mxu1 %v3626_v10  ;;  %v783_v57 = vld [vmem:[#allocation5 + $0x358] sm:$0xff] }
  0xc7   : > { %3049 = vmatmul.mubr.f32.gmra.mrb[4].mxu1 %v4598_v62  ;;  %3755 = vmatprep.subr.bf16.mxu0 %v3754_v11  ;;  %v3762_v62 = vpack.c.bf16 %v1685_v58, %v1684_v53  ;;  %v3638_v3 = vpack.c.bf16 %v783_v57, %v782_v56  ;;  %v3774_v58 = vpack.c.bf16 %v1691_v52, %v1690_v51  ;;  %v1902_v56 = vld [vmem:[#allocation5 + $0x280] sm:$0xff]  ;;  %v1903_v57 = vld [vmem:[#allocation5 + $0x288] sm:$0xff] }
  0xc8   : > { %3321 = vmatmul.mubr.f32.gmra.mrb[4].mxu0 %v4649_v30  ;;  %3051 = vmatprep.mubr.f32.mxu1 %v4606_v4  ;;  %v3778_v2 = vpack.c.bf16 %v1903_v57, %v1902_v56  ;;  %v1003_v51 = vld [vmem:[#allocation5 + $0xa8] sm:$0xff]  ;;  %v1906_v52 = vld [vmem:[#allocation5 + $0x2a0] sm:$0xff]  ;;  %v1005_v56 = vld [vmem:[#allocation5 + $0xb8] sm:$0xff] }
  0xc9   : > { %3323 = vmatprep.mubr.f32.mxu0 %v4659_v38  ;;  %3629 = vmatpush3.bf16.msra.mxu1 %v3626_v10  ;;  %v784_v10 = vld [vmem:[#allocation5 + $0x360] sm:$0xff]  ;;  %v1909_v57 = vld [vmem:[#allocation5 + $0x2b8] sm:$0xff] }
  0xca   : > { %3757 = vmatpush3.bf16.msra.mxu0 %v3754_v11  ;;  %3631 = vmatprep.subr.bf16.mxu1 %v3630_v20  ;;  %v785_v11 = vld [vmem:[#allocation5 + $0x368] sm:$0xff] }
  0xcb   : > { %3052 = vmatmul.mubr.f32.gmra.mrb[6].mxu1 %v4613_v8  ;;  %3759 = vmatprep.subr.bf16.mxu0 %v3758_v26  ;;  %v3642_v47 = vpack.c.bf16 %v785_v11, %v784_v10  ;;  %v286_v10 = vld [vmem:[%s4576_s23 + $0xe9] sm:$0xff] }
  0xcc   : > { %3324 = vmatmul.mubr.f32.gmra.mrb[6].mxu0 %v4665_v40  ;;  %3054 = vmatprep.mubr.f32.mxu1 %v4623_v14  ;;  %v1000_v11 = vld [vmem:[#allocation5 + $0x90] sm:$0xff] }
  0xcd   : > { %3326 = vmatprep.mubr.f32.mxu0 %v4675_v48  ;;  %3633 = vmatpush3.bf16.msra.mxu1 %v3630_v20  ;;  %v786_v20 = vld [vmem:[#allocation5 + $0x370] sm:$0xff] }
  0xce   : > { %3761 = vmatpush3.bf16.msra.mxu0 %v3758_v26  ;;  %3635 = vmatprep.subr.bf16.mxu1 %v3634_v54  ;;  %v787_v26 = vld [vmem:[#allocation5 + $0x378] sm:$0xff] }
  0xcf   : > { %3055 = vmatmul.mubr.f32.gmra.mrb[8].mxu1 %v4630_v18  ;;  %3763 = vmatprep.subr.bf16.mxu0 %v3762_v62  ;;  %v3646_v53 = vpack.c.bf16 %v787_v26, %v786_v20  ;;  %v1002_v26 = vld [vmem:[#allocation5 + $0xa0] sm:$0xff] }
  0xd0   : > { %3327 = vmatmul.mubr.f32.gmra.mrb[8].mxu0 %v4681_v50  ;;  %3057 = vmatprep.mubr.f32.mxu1 %v4639_v24 }
  0xd1   : > { %3329 = vmatprep.mubr.f32.mxu0 %v4691_v59  ;;  %3637 = vmatpush3.bf16.msra.mxu1 %v3634_v54  ;;  %v998_v54 = vld [vmem:[#allocation5 + $0x80] sm:$0xff] }
  0xd2   : > { %3765 = vmatpush3.bf16.msra.mxu0 %v3762_v62  ;;  %3639 = vmatprep.subr.bf16.mxu1 %v3638_v3  ;;  %v999_v62 = vld [vmem:[#allocation5 + $0x88] sm:$0xff] }
  0xd3   : > { %3058 = vmatmul.mubr.f32.gmra.mrb[10].mxu1 %v4646_v29  ;;  %3767 = vmatprep.subr.bf16.mxu0 %v3766_v5  ;;  %v3650_v1 = vpack.c.bf16 %v999_v62, %v998_v54  ;;  %v1004_v62 = vld [vmem:[#allocation5 + $0xb0] sm:$0xff] }
  0xd4   : > { %3330 = vmatmul.mubr.f32.gmra.mrb[10].mxu0 %v4697_v63  ;;  %3060 = vmatprep.mubr.f32.mxu1 %v4655_v35 }
  0xd5   : > { %3332 = vmatprep.mubr.f32.mxu0 %v4707_v12  ;;  %3641 = vmatpush3.bf16.msra.mxu1 %v3638_v3  ;;  %v284_v3 = vld [vmem:[%s4576_s23 + $0xd9] sm:$0xff] }
  0xd6   : > { %3769 = vmatpush3.bf16.msra.mxu0 %v3766_v5  ;;  %3643 = vmatprep.subr.bf16.mxu1 %v3642_v47  ;;  %v285_v5 = vld [vmem:[%s4576_s23 + $0xe1] sm:$0xff] }
  0xd7   : > { %3061 = vmatmul.mubr.f32.gmra.mrb[12].mxu1 %v4662_v39  ;;  %3771 = vmatprep.subr.bf16.mxu0 %v3770_v16 }
  0xd8   : > { %3333 = vmatmul.mubr.f32.gmra.mrb[12].mxu0 %v4713_v15  ;;  %3063 = vmatprep.mubr.f32.mxu1 %v4671_v45 }
  0xd9   : > { %3335 = vmatprep.mubr.f32.mxu0 %v4723_v22  ;;  %3645 = vmatpush3.bf16.msra.mxu1 %v3642_v47 }
  0xda   : > { %3773 = vmatpush3.bf16.msra.mxu0 %v3770_v16  ;;  %3647 = vmatprep.subr.bf16.mxu1 %v3646_v53  ;;  %v289_v16 = vld [vmem:[%s4576_s23 + $0x12] sm:$0xff] }
  0xdb   : > { %3064 = vmatmul.mubr.f32.gmra.mrb[14].mxu1 %v4678_v49  ;;  %3775 = vmatprep.subr.bf16.mxu0 %v3774_v58 }
  0xdc   : > { %3336 = vmatmul.mubr.f32.gmra.mrb[14].mxu0 %v4729_v25  ;;  %3066 = vmatprep.mubr.f32.mxu1 %v4687_v55 }
  0xdd   : > { %3338 = vmatprep.mubr.f32.mxu0 %v4739_v31  ;;  %3649 = vmatpush3.bf16.msra.mxu1 %v3646_v53  ;;  %v1907_v53 = vld [vmem:[#allocation5 + $0x2a8] sm:$0xff] }
  0xde   : > { %3777 = vmatpush3.bf16.msra.mxu0 %v3774_v58  ;;  %3651 = vmatprep.subr.bf16.mxu1 %v3650_v1  ;;  %v4833_v58 = vld [vmem:[%s4576_s23 + $0x22] sm:$0xff]  ;;  %v3786_v54 = vpack.c.bf16 %v1907_v53, %v1906_v52  ;;  %v1914_v52 = vld [vmem:[#allocation5 + $0x2e0] sm:$0xff] }
  0xdf   : > { %3067 = vmatmul.mubr.f32.gmra.mrb[16].mxu1 %v4694_v60  ;;  %3779 = vmatprep.subr.bf16.mxu0 %v3778_v2  ;;  %v1915_v53 = vld [vmem:[#allocation5 + $0x2e8] sm:$0xff] }
  0xe0   : > { %3339 = vmatmul.mubr.f32.gmra.mrb[16].mxu0 %v4745_v33  ;;  %3069 = vmatprep.mubr.f32.mxu1 %v4703_v6 }
  0xe1   : > { %3341 = vmatprep.mubr.f32.mxu0 %v4755_v36  ;;  %v287_v36 = vld [vmem:[%s4576_s23 + $0x2] sm:$0xff] }
  0xe3   : > { %3070 = vmatmul.mubr.f32.gmra.mrb[18].mxu1 %v4710_v13 }
  0xe4   : > { %3342 = vmatmul.mubr.f32.gmra.mrb[18].mxu0 %v4761_v41  ;;  %3072 = vmatprep.mubr.f32.mxu1 %v4719_v21  ;;  %v1001_v41 = vld [vmem:[#allocation5 + $0x98] sm:$0xff] }
  0xe5   : > { %3344 = vmatprep.mubr.f32.mxu0 %v4771_v43  ;;  %v1904_v43 = vld [vmem:[#allocation5 + $0x290] sm:$0xff]  ;;  %v3654_v47 = vpack.c.bf16 %v1001_v41, %v1000_v11 }
  0xe6   : > { %v3782_v20 = vpack.c.bf16 %v1905_v44, %v1904_v43  ;;  %v4850_v11 = vld [vmem:[%s4576_s23 + $0x3a] sm:$0xff]  ;;  %v4853_v41 = vld [vmem:[%s4576_s23 + $0x42] sm:$0xff] }
  0xe7   : > { %3073 = vmatmul.mubr.f32.gmra.mrb[20].mxu1 %v4726_v23  ;;  %v1008_v44 = vld [vmem:[#allocation5 + $0xd0] sm:$0xff] }
  0xe8   : > { %3345 = vmatmul.mubr.f32.gmra.mrb[20].mxu0 %v284_v3  ;;  %3075 = vmatprep.mubr.f32.mxu1 %v4735_v27 }
  0xe9   : > { %3347 = vmatprep.mubr.f32.mxu0 %v285_v5  ;;  %v1006_v5 = vld [vmem:[#allocation5 + $0xc0] sm:$0xff] }
  0xeb   : > { %3076 = vmatmul.mubr.f32.gmra.mrb[22].mxu1 %v4742_v32 }
  0xec   : > { %3348 = vmatmul.mubr.f32.gmra.mrb[22].mxu0 %v286_v10  ;;  %3110 = vmatprep.mubr.f32.mxu1 %v4606_v4  ;;  %v4830_v4 = vld [vmem:[%s4576_s23 + $0x1a] sm:$0xff] }
  0xed   : > { %3382 = vmatprep.mubr.f32.mxu0 %v287_v36  ;;  %v1910_v10 = vld [vmem:[#allocation5 + $0x2c0] sm:$0xff]  ;;  %v1911_v36 = vld [vmem:[#allocation5 + $0x2c8] sm:$0xff] }
  0xee   : > { %v3794_v43 = vpack.c.bf16 %v1911_v36, %v1910_v10  ;;  %v4890_v10 = vld [vmem:[%s4576_s23 + $0x7a] sm:$0xff]  ;;  %v4893_v36 = vld [vmem:[%s4576_s23 + $0x82] sm:$0xff] }
  0xef   : > { %3111 = vmatmul.mubr.f32.vlgmr.msra.gmra.mrb[0].mxu1 %v4613_v8  ;;  %v3658_v8 = vpack.c.bf16 %v1003_v51, %v1002_v26  ;;  %v1010_v51 = vld [vmem:[#allocation5 + $0xe0] sm:$0xff] }
  0xf0   : > { %3383 = vmatmul.mubr.f32.vlgmr.msra.gmra.mrb[0].mxu0 %v288_v46  ;;  %3653 = vmatpush3.bf16.msra.mxu1 %v3650_v1  ;;  %v4840_v1 = vld [vmem:[%s4576_s23 + $0x2a] sm:$0xff] }
  0xf1   : > { %3781 = vmatpush3.bf16.msra.mxu0 %v3778_v2  ;;  %3113 = vmatprep.mubr.f32.mxu1 %v4623_v14  ;;  %v1908_v14 = vld [vmem:[#allocation5 + $0x2b0] sm:$0xff]  ;;  %v4843_v2 = vld [vmem:[%s4576_s23 + $0x32] sm:$0xff] }
  0xf2   : > { %3385 = vmatprep.mubr.f32.mxu0 %v289_v16  ;;  %3655 = vmatprep.subr.bf16.mxu1 %v3654_v47  ;;  %v3790_v3 = vpack.c.bf16 %v1909_v57, %v1908_v14  ;;  %v1912_v46 = vld [vmem:[#allocation5 + $0x2d0] sm:$0xff]  ;;  %v1917_v57 = vld [vmem:[#allocation5 + $0x2f8] sm:$0xff] }
  0xf3   : > { %3114 = vmatmul.mubr.f32.gmra.mrb[2].mxu1 %v4630_v18  ;;  %3783 = vmatprep.subr.bf16.mxu0 %v3782_v20  ;;  %v3662_v18 = vpack.c.bf16 %v1005_v56, %v1004_v62  ;;  %v4860_v16 = vld [vmem:[%s4576_s23 + $0x4a] sm:$0xff]  ;;  %v3802_v62 = vpack.c.bf16 %v1915_v53, %v1914_v52  ;;  %v2133_v52 = vld [vmem:[#allocation5 + $0x428] sm:$0xff] }
  0xf4   : > { %3386 = vmatmul.mubr.f32.gmra.mrb[2].mxu0 %v4830_v4  ;;  %3116 = vmatprep.mubr.f32.mxu1 %v4639_v24  ;;  %v1007_v24 = vld [vmem:[#allocation5 + $0xc8] sm:$0xff]  ;;  %v1012_v56 = vld [vmem:[#allocation5 + $0xf0] sm:$0xff] }
  0xf5   : > { %3657 = vmatpush3.bf16.msra.mxu1 %v3654_v47  ;;  %3388 = vmatprep.mubr.f32.mxu0 %v4833_v58  ;;  %v1913_v47 = vld [vmem:[#allocation5 + $0x2d8] sm:$0xff]  ;;  %v1916_v14 = vld [vmem:[#allocation5 + $0x2f0] sm:$0xff] }
  0xf6   : > { %3785 = vmatpush3.bf16.msra.mxu0 %v3782_v20  ;;  %3659 = vmatprep.subr.bf16.mxu1 %v3658_v8  ;;  %v4863_v20 = vld [vmem:[%s4576_s23 + $0x52] sm:$0xff]  ;;  %v3798_v26 = vpack.c.bf16 %v1913_v47, %v1912_v46  ;;  %v2130_v46 = vld [vmem:[#allocation5 + $0x410] sm:$0xff] }
  0xf7   : > { %3117 = vmatmul.mubr.f32.gmra.mrb[4].mxu1 %v4646_v29  ;;  %3787 = vmatprep.subr.bf16.mxu0 %v3786_v54  ;;  %v3666_v29 = vpack.c.bf16 %v1007_v24, %v1006_v5  ;;  %v3806_v5 = vpack.c.bf16 %v1917_v57, %v1916_v14  ;;  %v2128_v24 = vld [vmem:[#allocation5 + $0x400] sm:$0xff]  ;;  %v2131_v47 = vld [vmem:[#allocation5 + $0x418] sm:$0xff]  ;;  %v2141_v57 = vld [vmem:[#allocation5 + $0x468] sm:$0xff] }
  0xf8   : > { %3389 = vmatmul.mubr.f32.gmra.mrb[4].mxu0 %v4840_v1  ;;  %3119 = vmatprep.mubr.f32.mxu1 %v4655_v35  ;;  %v1009_v35 = vld [vmem:[#allocation5 + $0xd8] sm:$0xff] }
  0xf9   : > { %3391 = vmatprep.mubr.f32.mxu0 %v4843_v2  ;;  %3661 = vmatpush3.bf16.msra.mxu1 %v3658_v8  ;;  %v4870_v8 = vld [vmem:[%s4576_s23 + $0x5a] sm:$0xff]  ;;  %v2139_v14 = vld [vmem:[#allocation5 + $0x458] sm:$0xff] }
  0xfa   : > { %3789 = vmatpush3.bf16.msra.mxu0 %v3786_v54  ;;  %3663 = vmatprep.subr.bf16.mxu1 %v3662_v18  ;;  %v4873_v54 = vld [vmem:[%s4576_s23 + $0x62] sm:$0xff] }
  0xfb   : > { %3120 = vmatmul.mubr.f32.gmra.mrb[6].mxu1 %v4662_v39  ;;  %3791 = vmatprep.subr.bf16.mxu0 %v3790_v3  ;;  %v3670_v39 = vpack.c.bf16 %v1009_v35, %v1008_v44  ;;  %v4925_v44 = vld [vmem:[%s4576_s23 + $0xb2] sm:$0xff]  ;;  %v770_v35 = vld [vmem:[%s4576_s23 + $0xe8] sm:$0xff] }
  0xfc   : > { %3392 = vmatmul.mubr.f32.gmra.mrb[6].mxu0 %v4850_v11  ;;  %3122 = vmatprep.mubr.f32.mxu1 %v4671_v45  ;;  %v1011_v45 = vld [vmem:[#allocation5 + $0xe8] sm:$0xff] }
  0xfd   : > { %3394 = vmatprep.mubr.f32.mxu0 %v4853_v41  ;;  %3665 = vmatpush3.bf16.msra.mxu1 %v3662_v18  ;;  %v4880_v18 = vld [vmem:[%s4576_s23 + $0x6a] sm:$0xff] }
  0xfe   : > { %3793 = vmatpush3.bf16.msra.mxu0 %v3790_v3  ;;  %3667 = vmatprep.subr.bf16.mxu1 %v3666_v29  ;;  %v4883_v3 = vld [vmem:[%s4576_s23 + $0x72] sm:$0xff] }
  0xff   : > { %3123 = vmatmul.mubr.f32.gmra.mrb[8].mxu1 %v4678_v49  ;;  %3795 = vmatprep.subr.bf16.mxu0 %v3794_v43  ;;  %v3674_v49 = vpack.c.bf16 %v1011_v45, %v1010_v51  ;;  %v3814_v51 = vpack.c.bf16 %v2131_v47, %v2130_v46  ;;  %v2132_v45 = vld [vmem:[#allocation5 + $0x420] sm:$0xff] }
 0x100   : > { %3395 = vmatmul.mubr.f32.gmra.mrb[8].mxu0 %v4860_v16  ;;  %3125 = vmatprep.mubr.f32.mxu1 %v4687_v55  ;;  %v1013_v55 = vld [vmem:[#allocation5 + $0xf8] sm:$0xff]  ;;  %v3818_v53 = vpack.c.bf16 %v2133_v52, %v2132_v45 }
 0x101   : > { %3397 = vmatprep.mubr.f32.mxu0 %v4863_v20  ;;  %3669 = vmatpush3.bf16.msra.mxu1 %v3666_v29  ;;  %v4903_v29 = vld [vmem:[%s4576_s23 + $0x92] sm:$0xff] }
 0x102   : > { %3797 = vmatpush3.bf16.msra.mxu0 %v3794_v43  ;;  %3671 = vmatprep.subr.bf16.mxu1 %v3670_v39  ;;  %v4921_v43 = vld [vmem:[%s4576_s23 + $0xaa] sm:$0xff] }
 0x103   : > { %3126 = vmatmul.mubr.f32.gmra.mrb[10].mxu1 %v4694_v60  ;;  %3799 = vmatprep.subr.bf16.mxu0 %v3798_v26  ;;  %v3678_v60 = vpack.c.bf16 %v1013_v55, %v1012_v56  ;;  %v2135_v56 = vld [vmem:[#allocation5 + $0x438] sm:$0xff]  ;;  %v2138_v55 = vld [vmem:[#allocation5 + $0x450] sm:$0xff] }
 0x104   : > { %3398 = vmatmul.mubr.f32.gmra.mrb[10].mxu0 %v4870_v8  ;;  %3128 = vmatprep.mubr.f32.mxu1 %v4703_v6  ;;  %v2129_v6 = vld [vmem:[#allocation5 + $0x408] sm:$0xff] }
 0x105   : > { %3400 = vmatprep.mubr.f32.mxu0 %v4873_v54  ;;  %3673 = vmatpush3.bf16.msra.mxu1 %v3670_v39  ;;  %v258_v39 = vld [vmem:[%s4576_s23 + $0x9] sm:$0xff] }
 0x106   : > { %3801 = vmatpush3.bf16.msra.mxu0 %v3798_v26  ;;  %3675 = vmatprep.subr.bf16.mxu1 %v3674_v49  ;;  %v259_v26 = vld [vmem:[%s4576_s23 + $0x11] sm:$0xff] }
 0x107   : > { %3129 = vmatmul.mubr.f32.gmra.mrb[12].mxu1 %v4710_v13  ;;  %3803 = vmatprep.subr.bf16.mxu0 %v3802_v62  ;;  %v3810_v13 = vpack.c.bf16 %v2129_v6, %v2128_v24 }
 0x108   : > { %3401 = vmatmul.mubr.f32.gmra.mrb[12].mxu0 %v4880_v18  ;;  %3131 = vmatprep.mubr.f32.mxu1 %v4719_v21  ;;  %v4900_v21 = vld [vmem:[%s4576_s23 + $0x8a] sm:$0xff] }
 0x109   : > { %3403 = vmatprep.mubr.f32.mxu0 %v4883_v3  ;;  %3677 = vmatpush3.bf16.msra.mxu1 %v3674_v49  ;;  %v4172_v49 = vld [vmem:[%s4576_s23 + $0x19] sm:$0xff] }
 0x10a   : > { %3805 = vmatpush3.bf16.msra.mxu0 %v3802_v62  ;;  %3679 = vmatprep.subr.bf16.mxu1 %v3678_v60  ;;  %v2134_v62 = vld [vmem:[#allocation5 + $0x430] sm:$0xff] }
 0x10b   : > { %3132 = vmatmul.mubr.f32.gmra.mrb[14].mxu1 %v4726_v23  ;;  %3807 = vmatprep.subr.bf16.mxu0 %v3806_v5  ;;  %v4910_v23 = vld [vmem:[%s4576_s23 + $0x9a] sm:$0xff] }
 0x10c   : > { %3404 = vmatmul.mubr.f32.gmra.mrb[14].mxu0 %v4890_v10  ;;  %3134 = vmatprep.mubr.f32.mxu1 %v4735_v27  ;;  %v4913_v27 = vld [vmem:[%s4576_s23 + $0xa2] sm:$0xff] }
 0x10d   : > { %3406 = vmatprep.mubr.f32.mxu0 %v4893_v36  ;;  %3681 = vmatpush3.bf16.msra.mxu1 %v3678_v60  ;;  %v2143_v60 = vld [vmem:[#allocation5 + $0x478] sm:$0xff] }
 0x10e   : > { %3809 = vmatpush3.bf16.msra.mxu0 %v3806_v5  ;;  %3842 = vmatprep.subr.bf16.mxu1 %v3810_v13 }
 0x10f   : > { %3135 = vmatmul.mubr.f32.gmra.mrb[16].mxu1 %v4742_v32  ;;  %3811 = vmatprep.subr.bf16.mxu0 %v3810_v13  ;;  %v768_v32 = vld [vmem:[%s4576_s23 + $0xd8] sm:$0xff] }
 0x110   : > { %3407 = vmatmul.mubr.f32.gmra.mrb[16].mxu0 %v4900_v21  ;;  %3137 = vmatprep.mubr.f32.mxu1 %v4751_v34  ;;  %v769_v34 = vld [vmem:[%s4576_s23 + $0xe0] sm:$0xff] }
 0x111   : > { %3409 = vmatprep.mubr.f32.mxu0 %v4903_v29 }
 0x113   : > { %3138 = vmatmul.mubr.f32.gmra.mrb[18].mxu1 %v4758_v37  ;;  %v4931_v37 = vld [vmem:[%s4576_s23 + $0xba] sm:$0xff] }
 0x114   : > { %3410 = vmatmul.mubr.f32.gmra.mrb[18].mxu0 %v4910_v23  ;;  %3140 = vmatprep.mubr.f32.mxu1 %v4767_v42  ;;  %v257_v42 = vld [vmem:[%s4576_s23 + $0x1] sm:$0xff] }
 0x115   : > { %3412 = vmatprep.mubr.f32.mxu0 %v4913_v27 }
 0x117   : > { %3141 = vmatmul.mubr.f32.gmra.mrb[20].mxu1 %v768_v32 }
 0x118   : > { %3413 = vmatmul.mubr.f32.gmra.mrb[20].mxu0 %v4921_v43  ;;  %3143 = vmatprep.mubr.f32.mxu1 %v769_v34 }
 0x119   : > { %3415 = vmatprep.mubr.f32.mxu0 %v4925_v44 }
 0x11b   : > { %3144 = vmatmul.mubr.f32.gmra.mrb[22].mxu1 %v770_v35 }
 0x11c   : > { %3416 = vmatmul.mubr.f32.gmra.mrb[22].mxu0 %v4931_v37  ;;  %3178 = vmatprep.mubr.f32.mxu1 %v257_v42 }
 0x11d   : > { %3450 = vmatprep.mubr.f32.mxu0 %v4830_v4  ;;  %v3822_v4 = vpack.c.bf16 %v2135_v56, %v2134_v62 }
 0x11f   : > { %3179 = vmatmul.mubr.f32.vlgmr.msra.gmra.mrb[0].mxu1 %v258_v39 }
 0x120   : > { %3451 = vmatmul.mubr.f32.vlgmr.msra.gmra.mrb[0].mxu0 %v4833_v58  ;;  %3850 = vmatpush3.bf16.msra.mxu1 %v3810_v13  ;;  %v2136_v58 = vld [vmem:[#allocation5 + $0x440] sm:$0xff] }
 0x121   : > { %3813 = vmatpush3.bf16.msra.mxu0 %v3810_v13  ;;  %3181 = vmatprep.mubr.f32.mxu1 %v259_v26 }
 0x122   : > { %3453 = vmatprep.mubr.f32.mxu0 %v4840_v1  ;;  %3815 = vmatprep.subr.bf16.mxu0 %v3814_v51  ;;  %v2137_v1 = vld [vmem:[#allocation5 + $0x448] sm:$0xff] }
 0x123   : > { %3182 = vmatmul.mubr.f32.gmra.mrb[2].mxu1 %v4172_v49  ;;  %3843 = vmatprep.subr.bf16.mxu1 %v3814_v51 }
 0x124   : > { %3454 = vmatmul.mubr.f32.gmra.mrb[2].mxu0 %v4843_v2  ;;  %3184 = vmatprep.mubr.f32.mxu1 %v4595_v61  ;;  %v3826_v61 = vpack.c.bf16 %v2137_v1, %v2136_v58 }
 0x125   : > { %3456 = vmatprep.mubr.f32.mxu0 %v4850_v11  ;;  %3817 = vmatpush3.bf16.msra.mxu0 %v3814_v51 }
 0x126   : > { %3851 = vmatpush3.bf16.msra.mxu1 %v3814_v51  ;;  %3819 = vmatprep.subr.bf16.mxu0 %v3818_v53 }
 0x127   : > { %3185 = vmatmul.mubr.f32.gmra.mrb[4].mxu1 %v4602_v0  ;;  %3844 = vmatprep.subr.bf16.mxu1 %v3818_v53  ;;  %v3830_v0 = vpack.c.bf16 %v2139_v14, %v2138_v55 }
 0x128   : > { %3457 = vmatmul.mubr.f32.gmra.mrb[4].mxu0 %v4853_v41  ;;  %3187 = vmatprep.mubr.f32.mxu1 %v4610_v7  ;;  %v2140_v7 = vld [vmem:[#allocation5 + $0x460] sm:$0xff] }
 0x129   : > { %3459 = vmatprep.mubr.f32.mxu0 %v4860_v16  ;;  %3821 = vmatpush3.bf16.msra.mxu0 %v3818_v53 }
 0x12a   : > { %3852 = vmatpush3.bf16.msra.mxu1 %v3818_v53  ;;  %3823 = vmatprep.subr.bf16.mxu0 %v3822_v4 }
 0x12b   : > { %3188 = vmatmul.mubr.f32.gmra.mrb[6].mxu1 %v4617_v9  ;;  %3845 = vmatprep.subr.bf16.mxu1 %v3822_v4  ;;  %v3834_v9 = vpack.c.bf16 %v2141_v57, %v2140_v7 }
 0x12c   : > { %3460 = vmatmul.mubr.f32.gmra.mrb[6].mxu0 %v4863_v20  ;;  %3190 = vmatprep.mubr.f32.mxu1 %v4627_v17  ;;  %v2142_v17 = vld [vmem:[#allocation5 + $0x470] sm:$0xff] }
 0x12d   : > { %3462 = vmatprep.mubr.f32.mxu0 %v4870_v8  ;;  %3825 = vmatpush3.bf16.msra.mxu0 %v3822_v4 }
 0x12e   : > { %3853 = vmatpush3.bf16.msra.mxu1 %v3822_v4  ;;  %3827 = vmatprep.subr.bf16.mxu0 %v3826_v61 }
 0x12f   : > { %3191 = vmatmul.mubr.f32.gmra.mrb[8].mxu1 %v4633_v19  ;;  %3846 = vmatprep.subr.bf16.mxu1 %v3826_v61  ;;  %v3838_v19 = vpack.c.bf16 %v2143_v60, %v2142_v17 }
 0x130   : > { %3463 = vmatmul.mubr.f32.gmra.mrb[8].mxu0 %v4873_v54  ;;  %3193 = vmatprep.mubr.f32.mxu1 %v4643_v28  ;;  %v311_v28 = vld [vmem:[%s4576_s23 + $0xc2] sm:$0xff] }
 0x131   : > { %3465 = vmatprep.mubr.f32.mxu0 %v4880_v18  ;;  %3829 = vmatpush3.bf16.msra.mxu0 %v3826_v61 }
 0x132   : > { %3854 = vmatpush3.bf16.msra.mxu1 %v3826_v61  ;;  %3831 = vmatprep.subr.bf16.mxu0 %v3830_v0  ;;  %v5043_v61 = vld [vmem:[%s5187_s2] ss:$0 sm:$0xff] }
 0x133   : > { %3194 = vmatmul.mubr.f32.gmra.mrb[10].mxu1 %v4649_v30  ;;  %3847 = vmatprep.subr.bf16.mxu1 %v3830_v0  ;;  %v312_v30 = vld [vmem:[%s4576_s23 + $0xca] sm:$0xff] }
 0x134   : > { %3466 = vmatmul.mubr.f32.gmra.mrb[10].mxu0 %v4883_v3  ;;  %3196 = vmatprep.mubr.f32.mxu1 %v4659_v38  ;;  %v313_v38 = vld [vmem:[%s4576_s23 + $0xd2] sm:$0xff] }
 0x135   : > { %3468 = vmatprep.mubr.f32.mxu0 %v4890_v10  ;;  %3833 = vmatpush3.bf16.msra.mxu0 %v3830_v0 }
 0x136   : > { %3855 = vmatpush3.bf16.msra.mxu1 %v3830_v0  ;;  %3835 = vmatprep.subr.bf16.mxu0 %v3834_v9 }
 0x137   : > { %3197 = vmatmul.mubr.f32.gmra.mrb[12].mxu1 %v4665_v40  ;;  %3848 = vmatprep.subr.bf16.mxu1 %v3834_v9  ;;  %v314_v40 = vld [vmem:[%s4576_s23 + $0xda] sm:$0xff] }
 0x138   : > { %3469 = vmatmul.mubr.f32.gmra.mrb[12].mxu0 %v4893_v36  ;;  %3199 = vmatprep.mubr.f32.mxu1 %v4675_v48  ;;  %v315_v48 = vld [vmem:[%s4576_s23 + $0xe2] sm:$0xff] }
 0x139   : > { %3471 = vmatprep.mubr.f32.mxu0 %v4900_v21  ;;  %3837 = vmatpush3.bf16.msra.mxu0 %v3834_v9 }
 0x13a   : > { %3856 = vmatpush3.bf16.msra.mxu1 %v3834_v9  ;;  %3839 = vmatprep.subr.bf16.mxu0 %v3838_v19 }
 0x13b   : > { %3200 = vmatmul.mubr.f32.gmra.mrb[14].mxu1 %v4681_v50  ;;  %3849 = vmatprep.subr.bf16.mxu1 %v3838_v19  ;;  %v316_v50 = vld [vmem:[%s4576_s23 + $0xea] sm:$0xff] }
 0x13c   : > { %3472 = vmatmul.mubr.f32.gmra.mrb[14].mxu0 %v4903_v29  ;;  %3202 = vmatprep.mubr.f32.mxu1 %v4691_v59 }
 0x13d   : > { %3474 = vmatprep.mubr.f32.mxu0 %v4910_v23  ;;  %3841 = vmatpush3.bf16.msra.mxu0 %v3838_v19 }
 0x13e   : > { %3857 = vmatpush3.bf16.msra.mxu1 %v3838_v19 }
 0x13f   : > { %3203 = vmatmul.mubr.f32.gmra.mrb[16].mxu1 %v4697_v63 }
 0x140   : > { %3475 = vmatmul.mubr.f32.gmra.mrb[16].mxu0 %v4913_v27  ;;  %3205 = vmatprep.mubr.f32.mxu1 %v4707_v12 }
 0x141   : > { %3477 = vmatprep.mubr.f32.mxu0 %v4921_v43 }
 0x143   : > { %3206 = vmatmul.mubr.f32.gmra.mrb[18].mxu1 %v4713_v15 }
 0x144   : > { %3478 = vmatmul.mubr.f32.gmra.mrb[18].mxu0 %v4925_v44  ;;  %3208 = vmatprep.mubr.f32.mxu1 %v4723_v22 }
 0x145   : > { %3480 = vmatprep.mubr.f32.mxu0 %v4931_v37 }
 0x147   : > { %3209 = vmatmul.mubr.f32.gmra.mrb[20].mxu1 %v4729_v25 }
 0x148   : > { %3481 = vmatmul.mubr.f32.gmra.mrb[20].mxu0 %v311_v28  ;;  %3211 = vmatprep.mubr.f32.mxu1 %v4739_v31 }
 0x149   : > { %3483 = vmatprep.mubr.f32.mxu0 %v312_v30 }
 0x14b   : > { %3212 = vmatmul.mubr.f32.gmra.mrb[22].mxu1 %v4745_v33 }
 0x14c   : > { %3484 = vmatmul.mubr.f32.gmra.mrb[22].mxu0 %v313_v38  ;;  %3536 = vmatprep.mubr.f32.mxu1 %v4903_v29 }
 0x14d   : > { %3518 = vmatprep.mubr.f32.mxu0 %v4843_v2 }
 0x14f   : > { %3537 = vmatmul.mubr.f32.vlgmr.msra.gmra.mrb[24].mxu1 %v4910_v23 }
 0x150   : > { %3519 = vmatmul.mubr.f32.vlgmr.msra.gmra.mrb[0].mxu0 %v4850_v11  ;;  %3539 = vmatprep.mubr.f32.mxu1 %v4913_v27 }
 0x151   : > { %3521 = vmatprep.mubr.f32.mxu0 %v4853_v41 }
 0x153   : > { %3540 = vmatmul.mubr.f32.gmra.mrb[26].mxu1 %v4921_v43 }
 0x154   : > { %3522 = vmatmul.mubr.f32.gmra.mrb[2].mxu0 %v4860_v16  ;;  %3542 = vmatprep.mubr.f32.mxu1 %v4925_v44 }
 0x155   : > { %3524 = vmatprep.mubr.f32.mxu0 %v4863_v20 }
 0x157   : > { %3543 = vmatmul.mubr.f32.gmra.mrb[28].mxu1 %v4931_v37 }
 0x158   : > { %3525 = vmatmul.mubr.f32.gmra.mrb[4].mxu0 %v4870_v8  ;;  %3545 = vmatprep.mubr.f32.mxu1 %v311_v28 }
 0x159   : > { %3527 = vmatprep.mubr.f32.mxu0 %v4873_v54 }
 0x15b   : > { %3546 = vmatmul.mubr.f32.gmra.mrb[30].mxu1 %v312_v30 }
 0x15c   : > { %3528 = vmatmul.mubr.f32.gmra.mrb[6].mxu0 %v4880_v18  ;;  %3548 = vmatprep.mubr.f32.mxu1 %v313_v38 }
 0x15d   : > { %3530 = vmatprep.mubr.f32.mxu0 %v4883_v3 }
 0x15f   : > { %3549 = vmatmul.mubr.f32.gmra.mrb[32].mxu1 %v314_v40 }
 0x160   : > { %3531 = vmatmul.mubr.f32.gmra.mrb[8].mxu0 %v4890_v10  ;;  %3551 = vmatprep.mubr.f32.mxu1 %v315_v48 }
 0x161   : > { %3533 = vmatprep.mubr.f32.mxu0 %v4893_v36 }
 0x163   : > { %3552 = vmatmul.mubr.f32.gmra.mrb[34].mxu1 %v316_v50 }
 0x164   : > { %3534 = vmatmul.mubr.f32.gmra.mrb[10].mxu0 %v4900_v21 }
 0x1f2   : > { %v3180_v59 = vpop.f32.mrb[0].mxu1 }
 0x1f3   : > { %v1080_v63 = vpop.f32.mrb[1].mxu1 }
 0x1f6   : > { %v5003_v12 = vpop.f32.mrb[2].mxu1 }
 0x1f7   : > { %v5005_v15 = vpop.f32.mrb[3].mxu1 }
 0x1fa   : > { %v5007_v22 = vpop.f32.mrb[4].mxu1 }
 0x1fb   : > { %v5009_v25 = vpop.f32.mrb[5].mxu1 }
 0x1fe   : > { %v5011_v31 = vpop.f32.mrb[6].mxu1 }
 0x1ff   : > { %v5013_v33 = vpop.f32.mrb[7].mxu1 }
 0x202   : > { %v5015_v2 = vpop.f32.mrb[8].mxu1 }
 0x203   : > { %v5017_v11 = vpop.f32.mrb[9].mxu1 }
 0x206   : > { %v5019_v41 = vpop.f32.mrb[10].mxu1 }
 0x207   : > { %v5021_v16 = vpop.f32.mrb[11].mxu1 }
 0x20a   : > { %v3198_v20 = vpop.f32.mrb[12].mxu1 }
 0x20b   : > { %v3470_v8 = vpop.f32.mrb[12].mxu0  ;;  %v1140_v54 = vpop.f32.mrb[13].mxu1 }
 0x20c   : > { %v3870_v18 = vadd.f32 %v3470_v8, %v3198_v20  ;;  %v2044_v3 = vpop.f32.mrb[13].mxu0 }
 0x20d   : > { %v3872_v5 = vadd.f32 %v2044_v3, %v1140_v54 }
 0x20e   : > { %v3201_v24 = vpop.f32.mrb[14].mxu1 }
 0x20f   : > { %v3473_v6 = vpop.f32.mrb[14].mxu0  ;;  %v1150_v10 = vpop.f32.mrb[15].mxu1 }
 0x210   : > { %v3874_v36 = vadd.f32 %v3473_v6, %v3201_v24  ;;  %v2054_v13 = vpop.f32.mrb[15].mxu0 }
 0x211   : > { %v3876_v21 = vadd.f32 %v2054_v13, %v1150_v10 }
 0x212   : > { %v3204_v29 = vpop.f32.mrb[16].mxu1 }
 0x213   : > { %v3476_v23 = vpop.f32.mrb[16].mxu0  ;;  %v1160_v27 = vpop.f32.mrb[17].mxu1 }
 0x214   : > { %v3878_v32 = vadd.f32 %v3476_v23, %v3204_v29  ;;  %v2064_v43 = vpop.f32.mrb[17].mxu0 }
 0x215   : > { %v5023_v34 = vadd.f32 %v2064_v43, %v1160_v27 }
 0x216   : > { %v3207_v44 = vpop.f32.mrb[18].mxu1 }
 0x217   : > { %v3479_v35 = vpop.f32.mrb[18].mxu0  ;;  %v1170_v37 = vpop.f32.mrb[19].mxu1 }
 0x218   : > { %v5025_v42 = vadd.f32 %v3479_v35, %v3207_v44  ;;  %v2074_v46 = vpop.f32.mrb[19].mxu0 }
 0x219   : > { %v5027_v47 = vadd.f32 %v2074_v46, %v1170_v37 }
 0x21a   : > { %v3210_v39 = vpop.f32.mrb[20].mxu1 }
 0x21b   : > { %v3482_v26 = vpop.f32.mrb[20].mxu0  ;;  %v1180_v51 = vpop.f32.mrb[21].mxu1 }
 0x21c   : > { %v5029_v45 = vadd.f32 %v3482_v26, %v3210_v39  ;;  %v2084_v52 = vpop.f32.mrb[21].mxu0 }
 0x21d   : > { %v5031_v53 = vadd.f32 %v2084_v52, %v1180_v51 }
 0x21e   : > { %v3213_v49 = vpop.f32.mrb[22].mxu1 }
 0x21f   : > { %v3485_v62 = vpop.f32.mrb[22].mxu0  ;;  %v1190_v56 = vpop.f32.mrb[23].mxu1 }
 0x220   : > { %v5034_v4 = vadd.f32 %v3485_v62, %v3213_v49  ;;  %v2094_v58 = vpop.f32.mrb[23].mxu0 }
 0x221   : > { %v5036_v1 = vadd.f32 %v2094_v58, %v1190_v56 }
 0x222   : > { %v3538_v55 = vpop.f32.mrb[24].mxu1 }
 0x223   : > { %v3520_v14 = vpop.f32.mrb[0].mxu0  ;;  %v3871_v0 = vadd.f32 %v3870_v18, %v3538_v55  ;;  %v2270_v7 = vpop.f32.mrb[25].mxu1 }
 0x224   : > { %v3858_v57 = vadd.f32 %v3520_v14, %v3180_v59  ;;  %v2210_v9 = vpop.f32.mrb[1].mxu0  ;;  %v3873_v17 = vadd.f32 %v3872_v5, %v2270_v7 }
 0x225   : > { %v2373_v60 = vadd.f32 %v3871_v0, %v5043_v61  ;;  %v3859_v19 = vadd.f32 %v2210_v9, %v1080_v63 }
 0x226   : > { %v2361_v28 = vadd.f32 %v3858_v57, %v5043_v61  ;;  %v2372_v30 = vadd.f32 %v3873_v17, %v5043_v61  ;;  %v3541_v38 = vpop.f32.mrb[26].mxu1 }
 0x227   : > { %v2397_v40 = vmax.f32 %v2373_v60, 0.0  ;;  %v2360_v48 = vadd.f32 %v3859_v19, %v5043_v61  ;;  %v3523_v50 = vpop.f32.mrb[2].mxu0  ;;  %v3875_v20 = vadd.f32 %v3874_v36, %v3541_v38  ;;  %v2280_v8 = vpop.f32.mrb[27].mxu1 }
 0x228   : > { %v2385_v54 = vmax.f32 %v2361_v28, 0.0  ;;  %v2396_v18 = vmax.f32 %v2372_v30, 0.0  ;;  %v3860_v59 = vadd.f32 %v3523_v50, %v5003_v12  ;;  %v2220_v3 = vpop.f32.mrb[3].mxu0  ;;  %v3877_v5 = vadd.f32 %v3876_v21, %v2280_v8 }
 0x229   : > { %2421 = vst [vmem:[%s5050_s15 + $0x68] sm:$0xff] %v2397_v40  ;;  %v2384_v63 = vmax.f32 %v2360_v48, 0.0  ;;  %v2375_v24 = vadd.f32 %v3875_v20, %v5043_v61  ;;  %v3861_v6 = vadd.f32 %v2220_v3, %v5005_v15 }
 0x22a   : > { %2409 = vst [vmem:[%s5050_s15 + $0x8] sm:$0xff] %v2385_v54  ;;  %2420 = vst [vmem:[%s5050_s15 + $0x60] sm:$0xff] %v2396_v18  ;;  %v2363_v10 = vadd.f32 %v3860_v59, %v5043_v61  ;;  %v2374_v12 = vadd.f32 %v3877_v5, %v5043_v61  ;;  %v3544_v36 = vpop.f32.mrb[28].mxu1 }
 0x22b   : > { %2408 = vst [vmem:[%s5050_s15] sm:$0xff] %v2384_v63  ;;  %v2399_v13 = vmax.f32 %v2375_v24, 0.0  ;;  %v2362_v21 = vadd.f32 %v3861_v6, %v5043_v61  ;;  %v3526_v29 = vpop.f32.mrb[4].mxu0  ;;  %v3879_v23 = vadd.f32 %v3878_v32, %v3544_v36  ;;  %v2290_v27 = vpop.f32.mrb[29].mxu1 }
 0x22c   : > { %v2387_v43 = vmax.f32 %v2363_v10, 0.0  ;;  %v2398_v15 = vmax.f32 %v2374_v12, 0.0  ;;  %v3862_v44 = vadd.f32 %v3526_v29, %v5007_v22  ;;  %v2230_v35 = vpop.f32.mrb[5].mxu0  ;;  %v3881_v37 = vadd.f32 %v5023_v34, %v2290_v27 }
 0x22d   : > { %2423 = vst [vmem:[%s5050_s15 + $0x78] sm:$0xff] %v2399_v13  ;;  %v2386_v46 = vmax.f32 %v2362_v21, 0.0  ;;  %v2377_v39 = vadd.f32 %v3879_v23, %v5043_v61  ;;  %v3863_v26 = vadd.f32 %v2230_v35, %v5009_v25 }
 0x22e   : > { %2411 = vst [vmem:[%s5050_s15 + $0x18] sm:$0xff] %v2387_v43  ;;  %2422 = vst [vmem:[%s5050_s15 + $0x70] sm:$0xff] %v2398_v15  ;;  %v2365_v32 = vadd.f32 %v3862_v44, %v5043_v61  ;;  %v2376_v51 = vadd.f32 %v3881_v37, %v5043_v61  ;;  %v3547_v52 = vpop.f32.mrb[30].mxu1 }
 0x22f   : > { %2410 = vst [vmem:[%s5050_s15 + $0x10] sm:$0xff] %v2386_v46  ;;  %v2401_v22 = vmax.f32 %v2377_v39, 0.0  ;;  %v2364_v34 = vadd.f32 %v3863_v26, %v5043_v61  ;;  %v3529_v49 = vpop.f32.mrb[6].mxu0  ;;  %v3883_v62 = vadd.f32 %v5025_v42, %v3547_v52  ;;  %v2300_v56 = vpop.f32.mrb[31].mxu1 }
 0x230   : > { %v2389_v25 = vmax.f32 %v2365_v32, 0.0  ;;  %v2400_v58 = vmax.f32 %v2376_v51, 0.0  ;;  %v3864_v55 = vadd.f32 %v3529_v49, %v5011_v31  ;;  %v2240_v14 = vpop.f32.mrb[7].mxu0  ;;  %v3885_v0 = vadd.f32 %v5027_v47, %v2300_v56 }
 0x231   : > { %2425 = vst [vmem:[%s5050_s15 + $0x88] sm:$0xff] %v2401_v22  ;;  %v2388_v7 = vmax.f32 %v2364_v34, 0.0  ;;  %v2379_v57 = vadd.f32 %v3883_v62, %v5043_v61  ;;  %v3865_v9 = vadd.f32 %v2240_v14, %v5013_v33 }
 0x232   : > { %2413 = vst [vmem:[%s5050_s15 + $0x28] sm:$0xff] %v2389_v25  ;;  %2424 = vst [vmem:[%s5050_s15 + $0x80] sm:$0xff] %v2400_v58  ;;  %v2367_v42 = vadd.f32 %v3864_v55, %v5043_v61  ;;  %v2378_v17 = vadd.f32 %v3885_v0, %v5043_v61  ;;  %v3550_v60 = vpop.f32.mrb[32].mxu1 }
 0x233   : > { %2412 = vst [vmem:[%s5050_s15 + $0x20] sm:$0xff] %v2388_v7  ;;  %v2403_v31 = vmax.f32 %v2379_v57, 0.0  ;;  %v2366_v47 = vadd.f32 %v3865_v9, %v5043_v61  ;;  %v3532_v19 = vpop.f32.mrb[8].mxu0  ;;  %v3887_v28 = vadd.f32 %v5029_v45, %v3550_v60  ;;  %v2310_v33 = vpop.f32.mrb[33].mxu1 }
 0x234   : > { %v2391_v30 = vmax.f32 %v2367_v42, 0.0  ;;  %v2402_v38 = vmax.f32 %v2378_v17, 0.0  ;;  %v3866_v40 = vadd.f32 %v3532_v19, %v5015_v2  ;;  %v2250_v48 = vpop.f32.mrb[9].mxu0  ;;  %v3889_v50 = vadd.f32 %v5031_v53, %v2310_v33 }
 0x235   : > { %2427 = vst [vmem:[%s5050_s15 + $0x98] sm:$0xff] %v2403_v31  ;;  %v2390_v20 = vmax.f32 %v2366_v47, 0.0  ;;  %v2381_v8 = vadd.f32 %v3887_v28, %v5043_v61  ;;  %v3867_v54 = vadd.f32 %v2250_v48, %v5017_v11 }
 0x236   : > { %2415 = vst [vmem:[%s5050_s15 + $0x38] sm:$0xff] %v2391_v30  ;;  %2426 = vst [vmem:[%s5050_s15 + $0x90] sm:$0xff] %v2402_v38  ;;  %v2369_v45 = vadd.f32 %v3866_v40, %v5043_v61  ;;  %v2380_v18 = vadd.f32 %v3889_v50, %v5043_v61  ;;  %v3553_v59 = vpop.f32.mrb[34].mxu1 }
 0x237   : > { %2414 = vst [vmem:[%s5050_s15 + $0x30] sm:$0xff] %v2390_v20  ;;  %v2405_v2 = vmax.f32 %v2381_v8, 0.0  ;;  %v2368_v53 = vadd.f32 %v3867_v54, %v5043_v61  ;;  %v3535_v3 = vpop.f32.mrb[10].mxu0  ;;  %v3891_v5 = vadd.f32 %v5034_v4, %v3553_v59  ;;  %v2320_v11 = vpop.f32.mrb[35].mxu1 }
 0x238   : > { %v2393_v63 = vmax.f32 %v2369_v45, 0.0  ;;  %v2404_v24 = vmax.f32 %v2380_v18, 0.0  ;;  %v3868_v6 = vadd.f32 %v3535_v3, %v5019_v41  ;;  %v2260_v10 = vpop.f32.mrb[11].mxu0  ;;  %v3893_v12 = vadd.f32 %v5036_v1, %v2320_v11 }
 0x239   : > { %2429 = vst [vmem:[%s5050_s15 + $0xa8] sm:$0xff] %v2405_v2  ;;  %v2392_v36 = vmax.f32 %v2368_v53, 0.0  ;;  %v2383_v13 = vadd.f32 %v3891_v5, %v5043_v61  ;;  %v3869_v21 = vadd.f32 %v2260_v10, %v5021_v16 }
 0x23a   : > { %2417 = vst [vmem:[%s5050_s15 + $0x48] sm:$0xff] %v2393_v63  ;;  %2428 = vst [vmem:[%s5050_s15 + $0xa0] sm:$0xff] %v2404_v24  ;;  %v2371_v41 = vadd.f32 %v3868_v6, %v5043_v61  ;;  %v2382_v4 = vadd.f32 %v3893_v12, %v5043_v61 }
 0x23b   : > { %2416 = vst [vmem:[%s5050_s15 + $0x40] sm:$0xff] %v2392_v36  ;;  %v2407_v1 = vmax.f32 %v2383_v13, 0.0  ;;  %v2370_v29 = vadd.f32 %v3869_v21, %v5043_v61 }
 0x23c   : > { %v2395_v23 = vmax.f32 %v2371_v41, 0.0  ;;  %v2406_v27 = vmax.f32 %v2382_v4, 0.0 }
 0x23d   : > { %2431 = vst [vmem:[%s5050_s15 + $0xb8] sm:$0xff] %v2407_v1  ;;  %v2394_v16 = vmax.f32 %v2370_v29, 0.0 }
 0x23e   : > { %2419 = vst [vmem:[%s5050_s15 + $0x58] sm:$0xff] %v2395_v23  ;;  %2430 = vst [vmem:[%s5050_s15 + $0xb0] sm:$0xff] %v2406_v27 }
 0x23f   : > { %2418 = vst [vmem:[%s5050_s15 + $0x50] sm:$0xff] %v2394_v16 }
 0x240   : > { %4244 = shalt.err (!%p4241_p5)
}
 0x241   : > { %s4245_s23 = scalar_lea.hbm %s5114_s6, 3072  ;;  %s4249_s26 = scalar_lea.hbm %s5224_s10, 12288 }
 0x242   : > { %p4246_p8 = scmp.ne.s32.totalorder %s5114_s6, %s4245_s23  ;;  %p4250_p7 = scmp.lt.u32.totalorder %s5114_s6, %s5224_s10 }
 0x243   : > { %p4251_p9 = scmp.lt.u32.totalorder %s4249_s26, %s4245_s23  ;;  %p4253_p3 = scmp.lt.u32.totalorder %s4245_s23, %s5114_s6 }
 0x244   : > { %p4247_p12 = pnand %p4246_p8, %p5225_p6 }
 0x245   : > { %p4252_p4 = por %p4251_p9, %p4250_p7 }
 0x246   : > { %p4248_p1 = pneg %p4247_p12 }
 0x247   : > { %p4254_p10 = por %p4253_p3, %p4252_p4 }
 0x249   : > { %p4255_p11 = pnand %p4254_p10, %p4248_p1 }
 0x24b   : > { %4258 = shalt.err (!%p4255_p11)
}
 0x24c   : > { %s4364_s30 = smov 128   ;;  %s4365_s5 = smov 8  }
 0x24d   : > { %4061 = dma.vmem_to_hbm [thread:$0]  (%p5225_p6), %s5116_s7, 3072, %s5114_s6, %s5124_s24, %s4364_s30, %s4364_s30, %s4365_s5  }
 0x24e PF: > { %s5226_s18 = sld [smem:[#allocation13_spill]]  ;;  %s5227_s19 = sld [smem:[#allocation11_spill]] }
 0x24f   : > { %s5228_s1 = sld [smem:[#allocation14_spill]] }
 0x254   : > { %p4078_p13 = scmp.ge.s32.totalorder %s5226_s18, 2  ;;  %s2464_s3 = sand.u32 1, %s5227_s19  }
 0x255   : > { %p5229_p0 = scmp.ne.s32.totalorder %s5228_s1, 0  ;;  %s2465_s4 = scalar_lea.sflag [#allocation4], %s2464_s3 }
 0x257   : > { %p4072_p2 = pnand %p4078_p13, %p5229_p0 }
 0x259   : > { %4312 = dma.done.wait (!%p4072_p2), %s2465_s4, 3072  }
 0x25a   : > { %4314 = vsyncadd (!%p4072_p2), %s2465_s4, 4294964224  ;;  %s20_s22 = sadd.s32 1, %s5226_s18   ;;  %s5230_s27 = smov %s4527_s12 }
 0x25b   : > { %p17_p5 = scmp.ge.s32.totalorder %s20_s22, 6   ;;  %s5231_s18 = sld [smem:[#allocation12_spill]] }
 0x25c   : > { %s5232_s7 = sld [smem:[#allocation15_spill]]  ;;  %s5233_s12 = smov %s4321_s13 }
 0x25d   : > { %s5234_s13 = smov %s4325_s14  ;;  %s5235_s14 = smov %s4524_s28 }
 0x25e   : > { %s5236_s15 = smov %s4333_s16  ;;  %s5237_s16 = smov %s4337_s17 }
 0x25f   : > { %s5238_s17 = smov %s5230_s27  ;;  %s5239_s19 = smov %s4353_s21 }
 0x260   : > { %s5240_s20 = smov %s5243_s8  ;;  %19 = sbr.rel (!%p17_p5) target bundleno = 13 (0xd), region = 93 }
 0x262   : > { %s5241_s21 = smov %s5232_s7 }
 0x267   :  { %2470 = vsyncpa [#allocation3], 1 }
 0x268   :  { %2472 = vsyncpa [#allocation3 + $0x1], 1 }
 0x269   :  { %2473 = vsyncpa [#allocation6], 1 }
 0x26a   :  { %2474 = vsyncpa [#allocation4], 1 }
 0x26b   :  { %2476 = vsyncpa [#allocation4 + $0x1], 1 }

</bundles_post_ra>
